<compile_context>
chip_gen: v7x
topology: tpu7x:2x2x1
jax: 0.10.0
libtpu: 0.0.40
codegen_flags: <defaults>
</compile_context>

<pallas_src>
import jax
import jax.numpy as jnp
from jax.experimental import pallas as pl
from jax.experimental.pallas import tpu as pltpu

X_DIM = 4096   # forward() hard-codes the (-1, 4096) reshape
H_DIM = 256
Z_DIM = 64
BATCH = 2

# ---- layout of the packed small-parameter slab (f32, lane width = H_DIM) ----
SLAB_B1_ROW = 0                       # b1      : (1, 256)
SLAB_B3_ROW = 1                       # b3      : (1, 256)
SLAB_BMULV_ROW = 2                    # bmu|blv : (1, 128)  (lanes 0..127)
SLAB_WMULV_ROW0 = 8                   # wmu|wlv : (256, 128) rows 8..263
SLAB_W3_ROW0 = SLAB_WMULV_ROW0 + H_DIM  # w3    : (64, 256)  rows 264..327
SLAB_ROWS = SLAB_W3_ROW0 + Z_DIM      # 328 (multiple of 8)
SLAB_COLS = H_DIM                     # 256


def _vae_kernel(x_ref, eps_ref, slab_ref, w1_ref, w4_ref, b4_ref,
                recon_ref, mulv_ref):
    """Fused VAE forward, executed in a single grid step.

    x_ref   : (B, X)  bf16
    slab_ref: (328, 256) f32  packed {b1, b3, bmu|blv, wmu|wlv, w3}
    w1_ref  : (X, H)  bf16
    w4_ref  : (H, X)  bf16
    b4_ref  : (1, X)  f32
    """
    # Static views into the packed slab (no extra DMAs).
    b1 = slab_ref[SLAB_B1_ROW:SLAB_B1_ROW + 1, :]                      # (1, H)
    b3 = slab_ref[SLAB_B3_ROW:SLAB_B3_ROW + 1, :]                      # (1, H)
    bmulv = slab_ref[SLAB_BMULV_ROW:SLAB_BMULV_ROW + 1, :2 * Z_DIM]    # (1, 2Z)
    wmulv = slab_ref[SLAB_WMULV_ROW0:SLAB_WMULV_ROW0 + H_DIM, :2 * Z_DIM]  # (H, 2Z)
    w3 = slab_ref[SLAB_W3_ROW0:SLAB_W3_ROW0 + Z_DIM, :]                # (Z, H)

    # ---- encoder: fc1 + relu (bf16 weights/activations, f32 accumulation) ----
    h = jnp.dot(x_ref[...], w1_ref[...],
                preferred_element_type=jnp.float32) + b1
    h = jnp.maximum(h, 0.0)                                            # (B, H) f32

    # ---- fused fc2_mu | fc2_logvar: one lane-dense N=128 matmul ----
    mulv = jnp.dot(h, wmulv, preferred_element_type=jnp.float32) + bmulv
    mulv_ref[...] = mulv                                               # (B, 2Z)

    mu = mulv[:, :Z_DIM]
    logvar = mulv[:, Z_DIM:]

    # ---- sampling: z = eps * exp(0.5*logvar) + mu ----
    z = eps_ref[...] * jnp.exp(0.5 * logvar) + mu                      # (B, Z)

    # ---- decoder: fc3 + relu, then fc4 + sigmoid ----
    h2 = jnp.dot(z, w3, preferred_element_type=jnp.float32) + b3
    h2 = jnp.maximum(h2, 0.0)                                          # (B, H)

    logits = jnp.dot(h2.astype(jnp.bfloat16), w4_ref[...],
                     preferred_element_type=jnp.float32) + b4_ref[...]
    recon_ref[...] = jax.nn.sigmoid(logits)                            # (B, X)


def prepare_params(params):
    """One-time packing of weights into kernel-ready layout (call OUTSIDE jit).

    Big weights (fc1, fc4) are stored as bf16; the small f32 params are packed
    into a single padded slab so the kernel issues one DMA for all of them.
    """
    wmulv = jnp.concatenate([params["wmu"], params["wlv"]], axis=1)    # (H, 2Z)
    bmulv = jnp.concatenate([params["bmu"], params["blv"]], axis=1)    # (1, 2Z)

    slab = jnp.zeros((SLAB_ROWS, SLAB_COLS), jnp.float32)
    slab = slab.at[SLAB_B1_ROW, :].set(params["b1"][0])
    slab = slab.at[SLAB_B3_ROW, :].set(params["b3"][0])
    slab = slab.at[SLAB_BMULV_ROW, :2 * Z_DIM].set(bmulv[0])
    slab = slab.at[SLAB_WMULV_ROW0:SLAB_WMULV_ROW0 + H_DIM, :2 * Z_DIM].set(wmulv)
    slab = slab.at[SLAB_W3_ROW0:SLAB_W3_ROW0 + Z_DIM, :].set(params["w3"])

    return dict(
        w1=params["w1"].astype(jnp.bfloat16),   # (X, H)
        w4=params["w4"].astype(jnp.bfloat16),   # (H, X)
        b4=params["b4"],                        # (1, X) f32
        slab=slab,                              # (328, 256) f32
    )


@jax.jit
def vae_forward(x, eps, kparams):
    """x: any shape that flattens to (B, X_DIM); returns (recon, mu, logvar)."""
    x2d = jnp.reshape(x, (-1, X_DIM)).astype(jnp.bfloat16)   # np.reshape(x, (-1, 4096))
    b = x2d.shape[0]

    recon, mulv = pl.pallas_call(
        _vae_kernel,
        out_shape=(
            jax.ShapeDtypeStruct((b, X_DIM), jnp.float32),        # recon
            jax.ShapeDtypeStruct((b, 2 * Z_DIM), jnp.float32),    # mu | logvar
        ),
        grid_spec=pltpu.PrefetchScalarGridSpec(
            num_scalar_prefetch=0,
            grid=(1,),
            in_specs=[
                pl.BlockSpec((b, X_DIM), lambda i: (0, 0)),            # x (bf16)
                pl.BlockSpec((b, Z_DIM), lambda i: (0, 0)),            # eps
                pl.BlockSpec((SLAB_ROWS, SLAB_COLS), lambda i: (0, 0)),  # packed small params
                pl.BlockSpec((X_DIM, H_DIM), lambda i: (0, 0)),        # w1 (bf16)
                pl.BlockSpec((H_DIM, X_DIM), lambda i: (0, 0)),        # w4 (bf16)
                pl.BlockSpec((1, X_DIM), lambda i: (0, 0)),            # b4
            ],
            out_specs=(
                pl.BlockSpec((b, X_DIM), lambda i: (0, 0)),            # recon
                pl.BlockSpec((b, 2 * Z_DIM), lambda i: (0, 0)),        # mu|logvar
            ),
        ),
        compiler_params=pltpu.CompilerParams(
            dimension_semantics=("arbitrary",),
            vmem_limit_bytes=24 * 1024 * 1024,
        ),
    )(x2d, eps, kparams["slab"], kparams["w1"], kparams["w4"], kparams["b4"])

    mu = mulv[:, :Z_DIM]
    logvar = mulv[:, Z_DIM:]
    return recon, mu, logvar


def init_params(key):
    """Deterministic init mimicking nn.Linear (uniform +/- 1/sqrt(fan_in)).

    Weights are stored already transposed to (in, out) so the kernel computes
    x @ W + b, matching PyTorch's x @ W^T + b.
    """
    def linear(k, fan_in, fan_out):
        kw, kb = jax.random.split(k)
        bound = 1.0 / jnp.sqrt(fan_in)
        w = jax.random.uniform(kw, (fan_in, fan_out), jnp.float32, -bound, bound)
        b = jax.random.uniform(kb, (1, fan_out), jnp.float32, -bound, bound)
        return w, b

    k1, k2, k3, k4, k5 = jax.random.split(key, 5)
    w1, b1 = linear(k1, X_DIM, H_DIM)     # fc1
    wmu, bmu = linear(k2, H_DIM, Z_DIM)   # fc2_mu
    wlv, blv = linear(k3, H_DIM, Z_DIM)   # fc2_logvar
    w3, b3 = linear(k4, Z_DIM, H_DIM)     # fc3
    w4, b4 = linear(k5, H_DIM, X_DIM)     # fc4
    return dict(w1=w1, b1=b1, wmu=wmu, bmu=bmu, wlv=wlv, blv=blv,
                w3=w3, b3=b3, w4=w4, b4=b4)


def vae_reference(x, eps, params):
    """Pure-JAX f32 reference matching the PyTorch forward()."""
    x2d = jnp.reshape(x, (-1, X_DIM)).astype(jnp.float32)
    h = jnp.maximum(x2d @ params["w1"] + params["b1"], 0.0)
    mu = h @ params["wmu"] + params["bmu"]
    logvar = h @ params["wlv"] + params["blv"]
    z = eps * jnp.exp(0.5 * logvar) + mu
    h2 = jnp.maximum(z @ params["w3"] + params["b3"], 0.0)
    recon = jax.nn.sigmoid(h2 @ params["w4"] + params["b4"])
    return recon, mu, logvar


if __name__ == "__main__":
    key = jax.random.PRNGKey(0)
    k_params, k_x, k_eps = jax.random.split(key, 3)

    params = init_params(k_params)
    kparams = prepare_params(params)   # one-time packing, outside the jitted forward

    # NCHW image batch: (2, 1, 64, 64) -> flattens to (2, 4096)
    x = jax.random.uniform(k_x, (BATCH, 1, 64, 64), jnp.float32)
    # eps mirrors torch.randn_like(std); drawn outside the kernel for determinism.
    eps = jax.random.normal(k_eps, (BATCH, Z_DIM), jnp.float32)

    recon, mu, logvar = vae_forward(x, eps, kparams)
    jax.block_until_ready((recon, mu, logvar))

    assert recon.shape == (BATCH, X_DIM)
    assert mu.shape == (BATCH, Z_DIM)
    assert logvar.shape == (BATCH, Z_DIM)
    assert bool(jnp.all(jnp.isfinite(recon)))
    assert bool(jnp.all((recon >= 0.0) & (recon <= 1.0)))

    # Validate bf16 weight path against the f32 reference (loose tolerance).
    r_ref, mu_ref, lv_ref = vae_reference(x, eps, params)
    assert bool(jnp.allclose(recon, r_ref, atol=5e-2, rtol=5e-2))
    assert bool(jnp.allclose(mu, mu_ref, atol=5e-2, rtol=5e-2))
    assert bool(jnp.allclose(logvar, lv_ref, atol=5e-2, rtol=5e-2))

    print("KERNEL_OK")
</pallas_src>

<mosaic_0001>
module attributes {stable_mosaic.version = 11 : i64} {
  func.func @_vae_kernel(%arg0: i32, %arg1: memref<2x4096xbf16, #tpu.memory_space<vmem>>, %arg2: memref<2x64xf32, #tpu.memory_space<vmem>>, %arg3: memref<328x256xf32, #tpu.memory_space<vmem>>, %arg4: memref<4096x256xbf16, #tpu.memory_space<vmem>>, %arg5: memref<256x4096xbf16, #tpu.memory_space<vmem>>, %arg6: memref<1x4096xf32, #tpu.memory_space<vmem>>, %arg7: memref<2x4096xf32, #tpu.memory_space<vmem>>, %arg8: memref<2x128xf32, #tpu.memory_space<vmem>>) attributes {dimension_semantics = [#tpu.dimension_semantics<arbitrary>], iteration_bounds = array<i64: 1>, scalar_prefetch = 0 : i64, scratch_operands = 0 : i64, tpu.core_type = #tpu.core_type<tc>, window_params = [{pipeline_mode = #tpu.pipeline_mode<synchronous>, transform_indices = @transform_0, window_bounds = array<i64: 2, 4096>}, {pipeline_mode = #tpu.pipeline_mode<synchronous>, transform_indices = @transform_1, window_bounds = array<i64: 2, 64>}, {pipeline_mode = #tpu.pipeline_mode<synchronous>, transform_indices = @transform_2, window_bounds = array<i64: 328, 256>}, {pipeline_mode = #tpu.pipeline_mode<synchronous>, transform_indices = @transform_3, window_bounds = array<i64: 4096, 256>}, {pipeline_mode = #tpu.pipeline_mode<synchronous>, transform_indices = @transform_4, window_bounds = array<i64: 256, 4096>}, {pipeline_mode = #tpu.pipeline_mode<synchronous>, transform_indices = @transform_5, window_bounds = array<i64: 1, 4096>}, {pipeline_mode = #tpu.pipeline_mode<synchronous>, transform_indices = @transform_6, window_bounds = array<i64: 2, 4096>}, {pipeline_mode = #tpu.pipeline_mode<synchronous>, transform_indices = @transform_7, window_bounds = array<i64: 2, 128>}]} {
    %c0 = arith.constant 0 : index
    %c0_0 = arith.constant 0 : index
    %0 = vector.load %arg3[%c0, %c0_0] : memref<328x256xf32, #tpu.memory_space<vmem>>, vector<1x256xf32>
    %c1 = arith.constant 1 : index
    %c0_1 = arith.constant 0 : index
    %1 = vector.load %arg3[%c1, %c0_1] : memref<328x256xf32, #tpu.memory_space<vmem>>, vector<1x256xf32>
    %c2 = arith.constant 2 : index
    %c0_2 = arith.constant 0 : index
    %2 = vector.load %arg3[%c2, %c0_2] : memref<328x256xf32, #tpu.memory_space<vmem>>, vector<1x128xf32>
    %c8 = arith.constant 8 : index
    %c0_3 = arith.constant 0 : index
    %3 = vector.load %arg3[%c8, %c0_3] : memref<328x256xf32, #tpu.memory_space<vmem>>, vector<256x128xf32>
    %c264 = arith.constant 264 : index
    %c0_4 = arith.constant 0 : index
    %4 = vector.load %arg3[%c264, %c0_4] : memref<328x256xf32, #tpu.memory_space<vmem>>, vector<64x256xf32>
    %c0_5 = arith.constant 0 : index
    %c0_6 = arith.constant 0 : index
    %5 = vector.load %arg1[%c0_5, %c0_6] : memref<2x4096xbf16, #tpu.memory_space<vmem>>, vector<2x4096xbf16>
    %c0_7 = arith.constant 0 : index
    %c0_8 = arith.constant 0 : index
    %6 = vector.load %arg4[%c0_7, %c0_8] : memref<4096x256xbf16, #tpu.memory_space<vmem>>, vector<4096x256xbf16>
    %cst = arith.constant dense<0.000000e+00> : vector<2x256xf32>
    %7 = tpu.matmul %5, %6, %cst {dimension_numbers = #tpu.dot_dimension_numbers<[1], [0], [0], [1], [0, 0, 1, 1], [], []>} : vector<2x4096xbf16>, vector<4096x256xbf16>, vector<2x256xf32> -> vector<2x256xf32>
    %8 = vector.broadcast %0 : vector<1x256xf32> to vector<2x256xf32>
    %9 = arith.addf %7, %8 : vector<2x256xf32>
    %cst_9 = arith.constant 0.000000e+00 : f32
    %10 = vector.broadcast %cst_9 : f32 to vector<2x256xf32>
    %11 = arith.maximumf %9, %10 : vector<2x256xf32>
    %cst_10 = arith.constant dense<0.000000e+00> : vector<2x128xf32>
    %12 = tpu.matmul %11, %3, %cst_10 {dimension_numbers = #tpu.dot_dimension_numbers<[1], [0], [0], [1], [0, 0, 1, 1], [], []>} : vector<2x256xf32>, vector<256x128xf32>, vector<2x128xf32> -> vector<2x128xf32>
    %13 = vector.broadcast %2 : vector<1x128xf32> to vector<2x128xf32>
    %14 = arith.addf %12, %13 : vector<2x128xf32>
    %c0_11 = arith.constant 0 : index
    %c0_12 = arith.constant 0 : index
    %15 = vector.load %arg8[%c0_11, %c0_12] : memref<2x128xf32, #tpu.memory_space<vmem>>, vector<2x128xf32>
    tpu.vector_store %arg8[%c0_11, %c0_12], %14 {strides = array<i32>} : memref<2x128xf32, #tpu.memory_space<vmem>>, vector<2x128xf32>,
    %16 = vector.extract_strided_slice %14 {offsets = [0, 0], sizes = [2, 64], strides = [1, 1]} : vector<2x128xf32> to vector<2x64xf32>
    %17 = vector.extract_strided_slice %14 {offsets = [0, 64], sizes = [2, 64], strides = [1, 1]} : vector<2x128xf32> to vector<2x64xf32>
    %c0_13 = arith.constant 0 : index
    %c0_14 = arith.constant 0 : index
    %18 = vector.load %arg2[%c0_13, %c0_14] : memref<2x64xf32, #tpu.memory_space<vmem>>, vector<2x64xf32>
    %cst_15 = arith.constant 5.000000e-01 : f32
    %19 = vector.broadcast %cst_15 : f32 to vector<2x64xf32>
    %20 = arith.mulf %19, %17 : vector<2x64xf32>
    %21 = math.exp %20 : vector<2x64xf32>
    %22 = arith.mulf %18, %21 : vector<2x64xf32>
    %23 = arith.addf %22, %16 : vector<2x64xf32>
    %cst_16 = arith.constant dense<0.000000e+00> : vector<2x256xf32>
    %24 = tpu.matmul %23, %4, %cst_16 {dimension_numbers = #tpu.dot_dimension_numbers<[1], [0], [0], [1], [0, 0, 1, 1], [], []>} : vector<2x64xf32>, vector<64x256xf32>, vector<2x256xf32> -> vector<2x256xf32>
    %25 = vector.broadcast %1 : vector<1x256xf32> to vector<2x256xf32>
    %26 = arith.addf %24, %25 : vector<2x256xf32>
    %cst_17 = arith.constant 0.000000e+00 : f32
    %27 = vector.broadcast %cst_17 : f32 to vector<2x256xf32>
    %28 = arith.maximumf %26, %27 : vector<2x256xf32>
    %29 = arith.truncf %28 : vector<2x256xf32> to vector<2x256xbf16>
    %c0_18 = arith.constant 0 : index
    %c0_19 = arith.constant 0 : index
    %30 = vector.load %arg5[%c0_18, %c0_19] : memref<256x4096xbf16, #tpu.memory_space<vmem>>, vector<256x4096xbf16>
    %cst_20 = arith.constant dense<0.000000e+00> : vector<2x4096xf32>
    %31 = tpu.matmul %29, %30, %cst_20 {dimension_numbers = #tpu.dot_dimension_numbers<[1], [0], [0], [1], [0, 0, 1, 1], [], []>} : vector<2x256xbf16>, vector<256x4096xbf16>, vector<2x4096xf32> -> vector<2x4096xf32>
    %c0_21 = arith.constant 0 : index
    %c0_22 = arith.constant 0 : index
    %32 = vector.load %arg6[%c0_21, %c0_22] : memref<1x4096xf32, #tpu.memory_space<vmem>>, vector<1x4096xf32>
    %33 = vector.broadcast %32 : vector<1x4096xf32> to vector<2x4096xf32>
    %34 = arith.addf %31, %33 : vector<2x4096xf32>
    %35 = arith.negf %34 : vector<2x4096xf32>
    %36 = math.exp %35 : vector<2x4096xf32>
    %cst_23 = arith.constant 1.000000e+00 : f32
    %37 = vector.broadcast %cst_23 : f32 to vector<2x4096xf32>
    %38 = arith.addf %37, %36 : vector<2x4096xf32>
    %39 = arith.divf %37, %38 : vector<2x4096xf32>
    %c0_24 = arith.constant 0 : index
    %c0_25 = arith.constant 0 : index
    %40 = vector.load %arg7[%c0_24, %c0_25] : memref<2x4096xf32, #tpu.memory_space<vmem>>, vector<2x4096xf32>
    tpu.vector_store %arg7[%c0_24, %c0_25], %39 {strides = array<i32>} : memref<2x4096xf32, #tpu.memory_space<vmem>>, vector<2x4096xf32>,
    return
  }
  func.func @transform_0(%arg0: i32) -> (i32, i32) {
    %c0_i32 = arith.constant 0 : i32
    %c0_i32_0 = arith.constant 0 : i32
    %c0_i32_1 = arith.constant 0 : i32
    return %c0_i32, %c0_i32_0 : i32, i32
  }
  func.func @transform_1(%arg0: i32) -> (i32, i32) {
    %c0_i32 = arith.constant 0 : i32
    %c0_i32_0 = arith.constant 0 : i32
    %c0_i32_1 = arith.constant 0 : i32
    return %c0_i32, %c0_i32_0 : i32, i32
  }
  func.func @transform_2(%arg0: i32) -> (i32, i32) {
    %c0_i32 = arith.constant 0 : i32
    %c0_i32_0 = arith.constant 0 : i32
    %c0_i32_1 = arith.constant 0 : i32
    return %c0_i32, %c0_i32_0 : i32, i32
  }
  func.func @transform_3(%arg0: i32) -> (i32, i32) {
    %c0_i32 = arith.constant 0 : i32
    %c0_i32_0 = arith.constant 0 : i32
    %c0_i32_1 = arith.constant 0 : i32
    return %c0_i32, %c0_i32_0 : i32, i32
  }
  func.func @transform_4(%arg0: i32) -> (i32, i32) {
    %c0_i32 = arith.constant 0 : i32
    %c0_i32_0 = arith.constant 0 : i32
    %c0_i32_1 = arith.constant 0 : i32
    return %c0_i32, %c0_i32_0 : i32, i32
  }
  func.func @transform_5(%arg0: i32) -> (i32, i32) {
    %c0_i32 = arith.constant 0 : i32
    %c0_i32_0 = arith.constant 0 : i32
    %c0_i32_1 = arith.constant 0 : i32
    return %c0_i32, %c0_i32_0 : i32, i32
  }
  func.func @transform_6(%arg0: i32) -> (i32, i32) {
    %c0_i32 = arith.constant 0 : i32
    %c0_i32_0 = arith.constant 0 : i32
    %c0_i32_1 = arith.constant 0 : i32
    return %c0_i32, %c0_i32_0 : i32, i32
  }
  func.func @transform_7(%arg0: i32) -> (i32, i32) {
    %c0_i32 = arith.constant 0 : i32
    %c0_i32_0 = arith.constant 0 : i32
    %c0_i32_1 = arith.constant 0 : i32
    return %c0_i32, %c0_i32_0 : i32, i32
  }
}

</mosaic_0001>

<bundles_post_ra>
// kernel: vae_forward.1
= control target key start
LH: loop header
LB: loop body
LE: loop exit
PB: predicated region body
PF: predicated region fallthrough
CT: control target
= control target key end

     0   :  { %13 = vsyncpa [#allocation3], 0  ;;  %s11355_s0 = inlined_call_operand.vmem [shape: bf16[2,4096], index: 0, kind: input, shape index: {}]   ;;  %s11356_s1 = inlined_call_operand.hbm [shape: f32[2,64], index: 1, kind: input, shape index: {}]   ;;  %s11357_s2 = inlined_call_operand.hbm [shape: f32[328,256], index: 2, kind: input, shape index: {}]   ;;  %s11358_s3 = inlined_call_operand.hbm [shape: bf16[4096,256], index: 3, kind: input, shape index: {}]   ;;  %s11359_s4 = inlined_call_operand.hbm [shape: bf16[256,4096], index: 4, kind: input, shape index: {}]   ;;  %s11360_s5 = inlined_call_operand.hbm [shape: f32[1,4096], index: 5, kind: input, shape index: {}]   ;;  %s11361_s6 = inlined_call_operand.hbm [shape: f32[2,4096], index: 6, kind: output, shape index: {0}]   ;;  %s11362_s7 = inlined_call_operand.vmem [shape: f32[2,128], index: 7, kind: output, shape index: {1}]  }
   0x1   :  { %14 = vsyncpa [#allocation6], 0 }
   0x2   :  { %15 = vsyncpa [#allocation9], 0 }
   0x3   :  { %16 = vsyncpa [#allocation4], 0  ;;  %s10842_s24 = smov [#allocation5]   ;;  %s10702_s28 = scalar_lea.hbm %s11357_s2, 10496 }
   0x4   :  { %s34_s25 = sshll.u32 %s10842_s24, 4  ;;  %p10703_p0 = scmp.ne.s32.totalorder %s11357_s2, %s10702_s28  ;;  %s35_s25 = int_to_ptr.vmem [resolvable:$true] %s34_s25 }
   0x5   :  { %p10706_p1 = scmp.lt.u32.totalorder %s10702_s28, %s11357_s2 }
   0x7   :  { %p10708_p2 = pnand %p10706_p1, %p10703_p0 }
   0x9   :  { %10711 = shalt.err (!%p10708_p2)
}
   0xa   :  { %s10712_s10 = scalar_lea.vmem %s35_s25, 10496  ;;  %p10717_p4 = scmp.lt.s32.totalorder %s35_s25, %s35_s25 }
   0xb   :  { %p10713_p3 = scmp.ne.s32.totalorder %s35_s25, %s10712_s10  ;;  %p10718_p5 = scmp.lt.s32.totalorder %s10712_s10, %s10712_s10 }
   0xd   :  { %p10719_p6 = por %p10718_p5, %p10717_p4 }
   0xf   :  { %p10720_p7 = pnand %p10719_p6, %p10713_p3 }
  0x11   :  { %10723 = shalt.err (!%p10720_p7)
}
  0x12   :  { %s10843_s11 = smov 256   ;;  %s10844_s12 = smov 16  }
  0x13   :  { %40 = dma.hbm_to_vmem [thread:$0]  %s11357_s2, 10496, %s35_s25, [#allocation6], %s10843_s11, %s10843_s11, %s10844_s12  }
  0x14   :  { %s10845_s15 = smov [#allocation8]   ;;  %s10846_s17 = smov [#allocation2]  }
  0x15   :  { %s58_s16 = sshll.u32 %s10845_s15, 4  ;;  %s25_s18 = sshll.u32 %s10846_s17, 4  ;;  %s59_s16 = int_to_ptr.vmem [resolvable:$true] %s58_s16  ;;  %s26_s18 = int_to_ptr.vmem [resolvable:$true] %s25_s18 }
  0x16   :  { %s10724_s21 = scalar_lea.hbm %s11359_s4, 65536 }
  0x17   :  { %p10725_p8 = scmp.ne.s32.totalorder %s11359_s4, %s10724_s21  ;;  %p10728_p9 = scmp.lt.u32.totalorder %s10724_s21, %s11359_s4 }
  0x19   :  { %p10730_p10 = pnand %p10728_p9, %p10725_p8 }
  0x1b   :  { %10733 = shalt.err (!%p10730_p10)
}
  0x1c   :  { %s10734_s2 = scalar_lea.vmem %s59_s16, 65536  ;;  %p10739_p12 = scmp.lt.s32.totalorder %s59_s16, %s59_s16 }
  0x1d   :  { %p10735_p11 = scmp.ne.s32.totalorder %s59_s16, %s10734_s2  ;;  %p10740_p13 = scmp.lt.s32.totalorder %s10734_s2, %s10734_s2 }
  0x1f   :  { %p10741_p0 = por %p10740_p13, %p10739_p12 }
  0x21   :  { %p10742_p1 = pnand %p10741_p0, %p10735_p11 }
  0x23   :  { %10745 = shalt.err (!%p10742_p1)
}
  0x24   :  { %s10847_s25 = smov 2048   ;;  %s10848_s27 = smov 128  }
  0x25   :  { %64 = dma.hbm_to_vmem [thread:$0]  %s11359_s4, 65536, %s59_s16, [#allocation9], %s10847_s25, %s10847_s25, %s10848_s27  }
  0x26   :  { %s10746_s9 = scalar_lea.hbm %s11356_s1, 32 }
  0x27   :  { %p10747_p2 = scmp.ne.s32.totalorder %s11356_s1, %s10746_s9  ;;  %p10750_p3 = scmp.lt.u32.totalorder %s10746_s9, %s11356_s1 }
  0x29   :  { %p10752_p4 = pnand %p10750_p3, %p10747_p2 }
  0x2b   :  { %10755 = shalt.err (!%p10752_p4)
}
  0x2c   :  { %s10756_s14 = scalar_lea.vmem %s26_s18, 32  ;;  %p10761_p6 = scmp.lt.s32.totalorder %s26_s18, %s26_s18 }
  0x2d   :  { %p10757_p5 = scmp.ne.s32.totalorder %s26_s18, %s10756_s14  ;;  %p10762_p7 = scmp.lt.s32.totalorder %s10756_s14, %s10756_s14 }
  0x2f   :  { %p10763_p8 = por %p10762_p7, %p10761_p6 }
  0x31   :  { %p10764_p9 = pnand %p10763_p8, %p10757_p5 }
  0x33   :  { %10767 = shalt.err (!%p10764_p9)
}
  0x34   :  { %28 = dma.hbm_to_vmem [thread:$0]  %s11356_s1, 32, %s26_s18, [#allocation3]  }
  0x35   :  { %s10849_s16 = smov [#allocation7]   ;;  %s10768_s21 = scalar_lea.hbm %s11358_s3, 65536 }
  0x36   :  { %s46_s17 = sshll.u32 %s10849_s16, 4  ;;  %p10769_p10 = scmp.ne.s32.totalorder %s11358_s3, %s10768_s21  ;;  %s47_s17 = int_to_ptr.vmem [resolvable:$true] %s46_s17 }
  0x37   :  { %p10772_p11 = scmp.lt.u32.totalorder %s10768_s21, %s11358_s3 }
  0x39   :  { %p10774_p12 = pnand %p10772_p11, %p10769_p10 }
  0x3b   :  { %10777 = shalt.err (!%p10774_p12)
}
  0x3c   :  { %s10778_s2 = scalar_lea.vmem %s47_s17, 65536  ;;  %p10783_p0 = scmp.lt.s32.totalorder %s47_s17, %s47_s17 }
  0x3d   :  { %p10779_p13 = scmp.ne.s32.totalorder %s47_s17, %s10778_s2  ;;  %p10784_p1 = scmp.lt.s32.totalorder %s10778_s2, %s10778_s2 }
  0x3f   :  { %p10785_p2 = por %p10784_p1, %p10783_p0 }
  0x41   :  { %p10786_p3 = pnand %p10785_p2, %p10779_p13 }
  0x43   :  { %10789 = shalt.err (!%p10786_p3)
}
  0x44   :  { %s10850_s1 = smov 8   ;;  %s10851_s28 = smov [#allocation10]  }
  0x45   :  { %52 = dma.hbm_to_vmem [thread:$0]  %s11358_s3, 65536, %s47_s17, [#allocation6], %s10848_s27, %s10848_s27, %s10850_s1  }
  0x46   :  { %s71_s29 = sshll.u32 %s10851_s28, 4  ;;  %s10790_s9 = scalar_lea.hbm %s11360_s5, 512  ;;  %s72_s29 = int_to_ptr.vmem [resolvable:$true] %s71_s29 }
  0x47   :  { %p10791_p4 = scmp.ne.s32.totalorder %s11360_s5, %s10790_s9  ;;  %p10794_p5 = scmp.lt.u32.totalorder %s10790_s9, %s11360_s5 }
  0x49   :  { %p10796_p6 = pnand %p10794_p5, %p10791_p4 }
  0x4b   :  { %10799 = shalt.err (!%p10796_p6)
}
  0x4c   :  { %s10800_s14 = scalar_lea.vmem %s72_s29, 512  ;;  %p10805_p8 = scmp.lt.s32.totalorder %s72_s29, %s72_s29 }
  0x4d   :  { %p10801_p7 = scmp.ne.s32.totalorder %s72_s29, %s10800_s14  ;;  %p10806_p9 = scmp.lt.s32.totalorder %s10800_s14, %s10800_s14 }
  0x4f   :  { %p10807_p10 = por %p10806_p9, %p10805_p8 }
  0x51   :  { %p10808_p11 = pnand %p10807_p10, %p10801_p7 }
  0x53   :  { %10811 = shalt.err (!%p10808_p11)
}
  0x54   :  { %74 = dma.hbm_to_vmem [thread:$0]  %s11360_s5, 512, %s72_s29, [#allocation9]  }
  0x55   :  { %10834 = dma.done.wait [#allocation3], 32  }
  0x56   :  { %10835 = vsyncadd [#allocation3], 4294967264 }
  0x57   :  { %10836 = dma.done.wait [#allocation6], 76032  }
  0x58   :  { %10837 = vsyncadd [#allocation6], 4294891264 }
  0x59   :  { %10838 = dma.done.wait [#allocation9], 66048  }
  0x5a   :  { %10839 = vsyncadd [#allocation9], 4294901248  ;;  %v9800_v0 = vld [vmem:[#allocation7 + $0x4] ss:$8 sps:$4 sm:$0xff]   ;;  %v9802_v1 = vld [vmem:[#allocation7] ss:$8 sps:$4 sm:$0xff]   ;;  %v659_v7 = vlaneseq }
  0x5b   :  { %3461 = vmatprep.subr.bf16.mxu0 %v9800_v0  ;;  %v9803_v2 = vld [vmem:[#allocation7 + $0x14] ss:$8 sps:$4 sm:$0xff]   ;;  %v9805_v3 = vld [vmem:[#allocation7 + $0x10] ss:$8 sps:$4 sm:$0xff]   ;;  %v9806_v4 = vld [vmem:[#allocation7 + $0x24] ss:$8 sps:$4 sm:$0xff]  }
  0x5c   :  { %3462 = vmatpush1.bf16.msra.mxu0 %v9802_v1  ;;  %v9808_v5 = vld [vmem:[#allocation7 + $0x20] ss:$8 sps:$4 sm:$0xff]   ;;  %v9809_v6 = vld [vmem:[#allocation7 + $0x34] ss:$8 sps:$4 sm:$0xff]   ;;  %v10852_v8 = vmov 1966171168  }
  0x5d   :  { %3463 = vmatprep.subr.bf16.mxu0 %v9803_v2  ;;  %v675_v9 = vunpack.c.l.s4 %v10852_v8  ;;  %v9811_v10 = vld [vmem:[#allocation7 + $0x30] ss:$8 sps:$4 sm:$0xff]   ;;  %v9812_v11 = vld [vmem:[#allocation7 + $0x44] ss:$8 sps:$4 sm:$0xff]   ;;  %v10960_v12 = vshrl.u32 %v659_v7, 7  ;;  %s10854_s23 = smov 64  }
  0x5e   :  { %v9814_v14 = vld [vmem:[#allocation7 + $0x40] ss:$8 sps:$4 sm:$0xff]   ;;  %v9815_v15 = vld [vmem:[#allocation7 + $0x54] ss:$8 sps:$4 sm:$0xff]   ;;  %v9817_v17 = vld [vmem:[#allocation7 + $0x50] ss:$8 sps:$4 sm:$0xff]  }
  0x5f   :  { %v676_v13 = vunpack.c.0.s8 %v675_v9  ;;  %v9818_v18 = vld [vmem:[#allocation7 + $0x64] ss:$8 sps:$4 sm:$0xff]   ;;  %v9820_v21 = vld [vmem:[#allocation7 + $0x60] ss:$8 sps:$4 sm:$0xff]   ;;  %v9821_v22 = vld [vmem:[#allocation7 + $0x74] ss:$8 sps:$4 sm:$0xff]  }
  0x60   :  { %3464 = vmatpush1.bf16.msra.mxu0 %v9805_v3  ;;  %v10968_v19 = vld [vmem:[%s11355_s0] sm:$0xff]  ;;  %v9826_v27 = vld [vmem:[#allocation7 + $0x80] ss:$8 sps:$4 sm:$0xff]   ;;  %vm4211_vm0 = vcmask 523264  }
  0x61   :  { %3465 = vmatprep.subr.bf16.mxu0 %v9806_v4  ;;  %v10963_v16 = vsub.s32 %v676_v13, %v10960_v12  ;;  %v9823_v25 = vld [vmem:[#allocation7 + $0x70] ss:$8 sps:$4 sm:$0xff]   ;;  %v9824_v26 = vld [vmem:[#allocation7 + $0x84] ss:$8 sps:$4 sm:$0xff]   ;;  %v9827_v28 = vld [vmem:[#allocation7 + $0x94] ss:$8 sps:$4 sm:$0xff]   ;;  %v673_v7 = vcombine.high %v10968_v19, %v10968_v19 }
  0x62   :  { %v9829_v29 = vld [vmem:[#allocation7 + $0x90] ss:$8 sps:$4 sm:$0xff]   ;;  %v9830_v30 = vld [vmem:[#allocation7 + $0xa4] ss:$8 sps:$4 sm:$0xff]   ;;  %v9832_v31 = vld [vmem:[#allocation7 + $0xa0] ss:$8 sps:$4 sm:$0xff]  }
  0x63   :  { %v680_v20 = vrot.slane %v10968_v19, %v10963_v16  ;;  %v9833_v32 = vld [vmem:[#allocation7 + $0xb4] ss:$8 sps:$4 sm:$0xff]   ;;  %v9835_v33 = vld [vmem:[#allocation7 + $0xb0] ss:$8 sps:$4 sm:$0xff]   ;;  %v9836_v34 = vld [vmem:[#allocation7 + $0xc4] ss:$8 sps:$4 sm:$0xff]   ;;  %v10980_v13 = vrot.slane %v673_v7, %v10963_v16 }
  0x64   :  { %3466 = vmatpush1.bf16.msra.mxu0 %v9808_v5  ;;  %v9838_v35 = vld [vmem:[#allocation7 + $0xc0] ss:$8 sps:$4 sm:$0xff]   ;;  %v9839_v36 = vld [vmem:[#allocation7 + $0xd4] ss:$8 sps:$4 sm:$0xff]   ;;  %v9841_v37 = vld [vmem:[#allocation7 + $0xd0] ss:$8 sps:$4 sm:$0xff]  }
  0x65   :  { %3467 = vmatprep.subr.bf16.mxu0 %v9809_v6  ;;  %v688_v23 = vcombine.high %v680_v20, %v680_v20  ;;  %v9842_v38 = vld [vmem:[#allocation7 + $0xe4] ss:$8 sps:$4 sm:$0xff]   ;;  %v9844_v39 = vld [vmem:[#allocation7 + $0xe0] ss:$8 sps:$4 sm:$0xff]   ;;  %v9845_v40 = vld [vmem:[#allocation7 + $0xf4] ss:$8 sps:$4 sm:$0xff]   ;;  %v10974_v43 = vrot.slane %v680_v20, %v10963_v16 }
  0x66   :  { %v9847_v41 = vld [vmem:[#allocation7 + $0xf0] ss:$8 sps:$4 sm:$0xff]   ;;  %v9851_v42 = vld [vmem:[#allocation7 + $0x104] ss:$8 sps:$4 sm:$0xff]   ;;  %v9849_v45 = vld [vmem:[#allocation7 + $0x100] ss:$8 sps:$4 sm:$0xff]  }
  0x67   :  { %v710_v24 = vrot.slane %v688_v23, %v10963_v16  ;;  %v9854_v46 = vld [vmem:[#allocation7 + $0x114] ss:$8 sps:$4 sm:$0xff]   ;;  %v9852_v47 = vld [vmem:[#allocation7 + $0x110] ss:$8 sps:$4 sm:$0xff]   ;;  %v9857_v48 = vld [vmem:[#allocation7 + $0x124] ss:$8 sps:$4 sm:$0xff]  }
  0x68   :  { %3468 = vmatpush1.bf16.msra.mxu0 %v9811_v10  ;;  %v9855_v49 = vld [vmem:[#allocation7 + $0x120] ss:$8 sps:$4 sm:$0xff]   ;;  %v9860_v50 = vld [vmem:[#allocation7 + $0x134] ss:$8 sps:$4 sm:$0xff]   ;;  %v9858_v51 = vld [vmem:[#allocation7 + $0x130] ss:$8 sps:$4 sm:$0xff]  }
  0x69   :  { %3469 = vmatprep.subr.bf16.mxu0 %v9812_v11  ;;  %3493 = vmatprep.mubr.bf16.mxu0 %v710_v24  ;;  %v720_v44 = vcombine.high %v710_v24, %v710_v24  ;;  %v9863_v52 = vld [vmem:[#allocation7 + $0x144] ss:$8 sps:$4 sm:$0xff]   ;;  %v9861_v53 = vld [vmem:[#allocation7 + $0x140] ss:$8 sps:$4 sm:$0xff]   ;;  %v9866_v54 = vld [vmem:[#allocation7 + $0x154] ss:$8 sps:$4 sm:$0xff]  }
  0x6a   :  { %v9864_v55 = vld [vmem:[#allocation7 + $0x150] ss:$8 sps:$4 sm:$0xff]   ;;  %v9869_v56 = vld [vmem:[#allocation7 + $0x164] ss:$8 sps:$4 sm:$0xff]   ;;  %v9867_v57 = vld [vmem:[#allocation7 + $0x160] ss:$8 sps:$4 sm:$0xff]  }
  0x6b   :  { %v9872_v58 = vld [vmem:[#allocation7 + $0x174] ss:$8 sps:$4 sm:$0xff]   ;;  %v9870_v59 = vld [vmem:[#allocation7 + $0x170] ss:$8 sps:$4 sm:$0xff]   ;;  %v9875_v60 = vld [vmem:[#allocation7 + $0x184] ss:$8 sps:$4 sm:$0xff]  }
  0x6c   :  { %3470 = vmatpush1.bf16.msra.mxu0 %v9814_v14  ;;  %v9873_v61 = vld [vmem:[#allocation7 + $0x180] ss:$8 sps:$4 sm:$0xff]   ;;  %v9878_v62 = vld [vmem:[#allocation7 + $0x194] ss:$8 sps:$4 sm:$0xff]   ;;  %v9876_v63 = vld [vmem:[#allocation7 + $0x190] ss:$8 sps:$4 sm:$0xff]  }
  0x6d   :  { %3471 = vmatprep.subr.bf16.mxu0 %v9815_v15  ;;  %v9881_v0 = vld [vmem:[#allocation7 + $0x1a4] ss:$8 sps:$4 sm:$0xff]   ;;  %v9879_v1 = vld [vmem:[#allocation7 + $0x1a0] ss:$8 sps:$4 sm:$0xff]   ;;  %v9884_v2 = vld [vmem:[#allocation7 + $0x1b4] ss:$8 sps:$4 sm:$0xff]  }
  0x6e   :  { %v9882_v3 = vld [vmem:[#allocation7 + $0x1b0] ss:$8 sps:$4 sm:$0xff]   ;;  %v9887_v4 = vld [vmem:[#allocation7 + $0x1c4] ss:$8 sps:$4 sm:$0xff]   ;;  %v9885_v5 = vld [vmem:[#allocation7 + $0x1c0] ss:$8 sps:$4 sm:$0xff]  }
  0x6f   :  { %v9890_v6 = vld [vmem:[#allocation7 + $0x1d4] ss:$8 sps:$4 sm:$0xff]   ;;  %v9888_v8 = vld [vmem:[#allocation7 + $0x1d0] ss:$8 sps:$4 sm:$0xff]   ;;  %v9893_v9 = vld [vmem:[#allocation7 + $0x1e4] ss:$8 sps:$4 sm:$0xff]  }
  0x70   :  { %3472 = vmatpush1.bf16.msra.mxu0 %v9817_v17  ;;  %v9891_v10 = vld [vmem:[#allocation7 + $0x1e0] ss:$8 sps:$4 sm:$0xff]   ;;  %v9896_v11 = vld [vmem:[#allocation7 + $0x1f4] ss:$8 sps:$4 sm:$0xff]   ;;  %v9894_v14 = vld [vmem:[#allocation7 + $0x1f0] ss:$8 sps:$4 sm:$0xff]   ;;  %v689_v17 = vcombine.high %v10980_v13, %v10980_v13 }
  0x71   :  { %3473 = vmatprep.subr.bf16.mxu0 %v9818_v18  ;;  %v9899_v15 = vld [vmem:[#allocation7 + $0x204] ss:$8 sps:$4 sm:$0xff]   ;;  %v718_v18 = vcombine.high %v10974_v43, %v10974_v43  ;;  %v9897_v19 = vld [vmem:[#allocation7 + $0x200] ss:$8 sps:$4 sm:$0xff]   ;;  %v9902_v20 = vld [vmem:[#allocation7 + $0x214] ss:$8 sps:$4 sm:$0xff]  }
  0x72   :  { %v9905_v23 = vld [vmem:[#allocation7 + $0x224] ss:$8 sps:$4 sm:$0xff]   ;;  %v9903_v24 = vld [vmem:[#allocation7 + $0x220] ss:$8 sps:$4 sm:$0xff]   ;;  %v9974_v7 = vld [vmem:[#allocation7 + $0x394] ss:$8 sps:$4 sm:$0xff]  }
  0x74   :  { %3474 = vmatpush1.bf16.msra.mxu0 %v9820_v21  ;;  %v10987_v21 = vrot.slane %v689_v17, %v10963_v16  ;;  %v9986_v17 = vld [vmem:[#allocation7 + $0x3d4] ss:$8 sps:$4 sm:$0xff]  }
  0x75   :  { %3475 = vmatprep.subr.bf16.mxu0 %v9821_v22  ;;  %v9900_v22 = vld [vmem:[#allocation7 + $0x210] ss:$8 sps:$4 sm:$0xff]  }
  0x78   :  { %3476 = vmatpush1.bf16.msra.mxu0 %v9823_v25  ;;  %v9908_v25 = vld [vmem:[#allocation7 + $0x234] ss:$8 sps:$4 sm:$0xff]  }
  0x79   :  { %3477 = vmatprep.subr.bf16.mxu0 %v9824_v26  ;;  %v9906_v26 = vld [vmem:[#allocation7 + $0x230] ss:$8 sps:$4 sm:$0xff]  }
  0x7c   :  { %3478 = vmatpush1.bf16.msra.mxu0 %v9826_v27  ;;  %v9911_v27 = vld [vmem:[#allocation7 + $0x244] ss:$8 sps:$4 sm:$0xff]  }
  0x7d   :  { %3479 = vmatprep.subr.bf16.mxu0 %v9827_v28  ;;  %v9909_v28 = vld [vmem:[#allocation7 + $0x240] ss:$8 sps:$4 sm:$0xff]  }
  0x80   :  { %3480 = vmatpush1.bf16.msra.mxu0 %v9829_v29  ;;  %v9914_v29 = vld [vmem:[#allocation7 + $0x254] ss:$8 sps:$4 sm:$0xff]  }
  0x81   :  { %3481 = vmatprep.subr.bf16.mxu0 %v9830_v30  ;;  %v9912_v30 = vld [vmem:[#allocation7 + $0x250] ss:$8 sps:$4 sm:$0xff]  }
  0x84   :  { %3482 = vmatpush1.bf16.msra.mxu0 %v9832_v31  ;;  %v9917_v31 = vld [vmem:[#allocation7 + $0x264] ss:$8 sps:$4 sm:$0xff]  }
  0x85   :  { %3483 = vmatprep.subr.bf16.mxu0 %v9833_v32  ;;  %v9915_v32 = vld [vmem:[#allocation7 + $0x260] ss:$8 sps:$4 sm:$0xff]  }
  0x88   :  { %3484 = vmatpush1.bf16.msra.mxu0 %v9835_v33  ;;  %v9920_v33 = vld [vmem:[#allocation7 + $0x274] ss:$8 sps:$4 sm:$0xff]  }
  0x89   :  { %3485 = vmatprep.subr.bf16.mxu0 %v9836_v34  ;;  %v9918_v34 = vld [vmem:[#allocation7 + $0x270] ss:$8 sps:$4 sm:$0xff]  }
  0x8c   :  { %3486 = vmatpush1.bf16.msra.mxu0 %v9838_v35  ;;  %v9923_v35 = vld [vmem:[#allocation7 + $0x284] ss:$8 sps:$4 sm:$0xff]  }
  0x8d   :  { %3487 = vmatprep.subr.bf16.mxu0 %v9839_v36  ;;  %v9921_v36 = vld [vmem:[#allocation7 + $0x280] ss:$8 sps:$4 sm:$0xff]  }
  0x90   :  { %3488 = vmatpush1.bf16.msra.mxu0 %v9841_v37  ;;  %v9926_v37 = vld [vmem:[#allocation7 + $0x294] ss:$8 sps:$4 sm:$0xff]  }
  0x91   :  { %3489 = vmatprep.subr.bf16.mxu0 %v9842_v38  ;;  %v9924_v38 = vld [vmem:[#allocation7 + $0x290] ss:$8 sps:$4 sm:$0xff]  }
  0x94   :  { %3490 = vmatpush1.bf16.msra.mxu0 %v9844_v39  ;;  %v9929_v39 = vld [vmem:[#allocation7 + $0x2a4] ss:$8 sps:$4 sm:$0xff]  }
  0x95   :  { %3491 = vmatprep.subr.bf16.mxu0 %v9845_v40  ;;  %v9927_v40 = vld [vmem:[#allocation7 + $0x2a0] ss:$8 sps:$4 sm:$0xff]  }
  0x98   :  { %3492 = vmatpush1.bf16.msra.mxu0 %v9847_v41  ;;  %v9932_v41 = vld [vmem:[#allocation7 + $0x2b4] ss:$8 sps:$4 sm:$0xff]  }
  0x99   :  { %3502 = vmatprep.subr.bf16.mxu0 %v9851_v42  ;;  %v9930_v42 = vld [vmem:[#allocation7 + $0x2b0] ss:$8 sps:$4 sm:$0xff]  }
  0x9b   :  { %3494 = vmatmul.mubr.bf16.vlgmr.msra.gmra.mrb[0].mxu0 %v10974_v43  ;;  %v9935_v43 = vld [vmem:[#allocation7 + $0x2c4] ss:$8 sps:$4 sm:$0xff]  }
  0x9c   :  { %3503 = vmatpush1.bf16.msra.mxu0 %v9849_v45  ;;  %3534 = vmatprep.mubr.bf16.mxu0 %v720_v44  ;;  %v9933_v44 = vld [vmem:[#allocation7 + $0x2c0] ss:$8 sps:$4 sm:$0xff]   ;;  %v9938_v45 = vld [vmem:[#allocation7 + $0x2d4] ss:$8 sps:$4 sm:$0xff]  }
  0x9d   :  { %3504 = vmatprep.subr.bf16.mxu0 %v9854_v46  ;;  %v9936_v46 = vld [vmem:[#allocation7 + $0x2d0] ss:$8 sps:$4 sm:$0xff]  }
  0xa0   :  { %3505 = vmatpush1.bf16.msra.mxu0 %v9852_v47  ;;  %v9941_v47 = vld [vmem:[#allocation7 + $0x2e4] ss:$8 sps:$4 sm:$0xff]  }
  0xa1   :  { %3506 = vmatprep.subr.bf16.mxu0 %v9857_v48  ;;  %v9939_v48 = vld [vmem:[#allocation7 + $0x2e0] ss:$8 sps:$4 sm:$0xff]  }
  0xa4   :  { %3507 = vmatpush1.bf16.msra.mxu0 %v9855_v49  ;;  %v9944_v49 = vld [vmem:[#allocation7 + $0x2f4] ss:$8 sps:$4 sm:$0xff]  }
  0xa5   :  { %3508 = vmatprep.subr.bf16.mxu0 %v9860_v50  ;;  %v9942_v50 = vld [vmem:[#allocation7 + $0x2f0] ss:$8 sps:$4 sm:$0xff]  }
  0xa8   :  { %3509 = vmatpush1.bf16.msra.mxu0 %v9858_v51  ;;  %v9947_v51 = vld [vmem:[#allocation7 + $0x304] ss:$8 sps:$4 sm:$0xff]  }
  0xa9   :  { %3510 = vmatprep.subr.bf16.mxu0 %v9863_v52  ;;  %v10992_v52 = vrot.slane %v10980_v13, %v10963_v16  ;;  %v9978_v13 = vld [vmem:[#allocation7 + $0x3b0] ss:$8 sps:$4 sm:$0xff]  }
  0xac   :  { %3511 = vmatpush1.bf16.msra.mxu0 %v9861_v53  ;;  %v9945_v53 = vld [vmem:[#allocation7 + $0x300] ss:$8 sps:$4 sm:$0xff]  }
  0xad   :  { %3512 = vmatprep.subr.bf16.mxu0 %v9866_v54  ;;  %v9950_v54 = vld [vmem:[#allocation7 + $0x314] ss:$8 sps:$4 sm:$0xff]  }
  0xb0   :  { %3513 = vmatpush1.bf16.msra.mxu0 %v9864_v55  ;;  %v721_v55 = vcombine.high %v10987_v21, %v10987_v21 }
  0xb1   :  { %3514 = vmatprep.subr.bf16.mxu0 %v9869_v56  ;;  %v9948_v56 = vld [vmem:[#allocation7 + $0x310] ss:$8 sps:$4 sm:$0xff]  }
  0xb4   :  { %3515 = vmatpush1.bf16.msra.mxu0 %v9867_v57  ;;  %v9953_v57 = vld [vmem:[#allocation7 + $0x324] ss:$8 sps:$4 sm:$0xff]  }
  0xb5   :  { %3516 = vmatprep.subr.bf16.mxu0 %v9872_v58  ;;  %v9951_v58 = vld [vmem:[#allocation7 + $0x320] ss:$8 sps:$4 sm:$0xff]  }
  0xb8   :  { %3517 = vmatpush1.bf16.msra.mxu0 %v9870_v59  ;;  %v9956_v59 = vld [vmem:[#allocation7 + $0x334] ss:$8 sps:$4 sm:$0xff]  }
  0xb9   :  { %3518 = vmatprep.subr.bf16.mxu0 %v9875_v60  ;;  %v9954_v60 = vld [vmem:[#allocation7 + $0x330] ss:$8 sps:$4 sm:$0xff]  }
  0xbc   :  { %3519 = vmatpush1.bf16.msra.mxu0 %v9873_v61  ;;  %v9959_v61 = vld [vmem:[#allocation7 + $0x344] ss:$8 sps:$4 sm:$0xff]  }
  0xbd   :  { %3520 = vmatprep.subr.bf16.mxu0 %v9878_v62  ;;  %v9957_v62 = vld [vmem:[#allocation7 + $0x340] ss:$8 sps:$4 sm:$0xff]  }
  0xc0   :  { %3521 = vmatpush1.bf16.msra.mxu0 %v9876_v63  ;;  %v9962_v63 = vld [vmem:[#allocation7 + $0x354] ss:$8 sps:$4 sm:$0xff]  }
  0xc1   :  { %3522 = vmatprep.subr.bf16.mxu0 %v9881_v0  ;;  %v9960_v0 = vld [vmem:[#allocation7 + $0x350] ss:$8 sps:$4 sm:$0xff]  }
  0xc4   :  { %3523 = vmatpush1.bf16.msra.mxu0 %v9879_v1  ;;  %v9965_v1 = vld [vmem:[#allocation7 + $0x364] ss:$8 sps:$4 sm:$0xff]  }
  0xc5   :  { %3524 = vmatprep.subr.bf16.mxu0 %v9884_v2  ;;  %v9963_v2 = vld [vmem:[#allocation7 + $0x360] ss:$8 sps:$4 sm:$0xff]  }
  0xc8   :  { %3525 = vmatpush1.bf16.msra.mxu0 %v9882_v3  ;;  %v9968_v3 = vld [vmem:[#allocation7 + $0x374] ss:$8 sps:$4 sm:$0xff]  }
  0xc9   :  { %3526 = vmatprep.subr.bf16.mxu0 %v9887_v4  ;;  %v9966_v4 = vld [vmem:[#allocation7 + $0x370] ss:$8 sps:$4 sm:$0xff]  }
  0xcc   :  { %3527 = vmatpush1.bf16.msra.mxu0 %v9885_v5  ;;  %v9971_v5 = vld [vmem:[#allocation7 + $0x384] ss:$8 sps:$4 sm:$0xff]  }
  0xcd   :  { %3528 = vmatprep.subr.bf16.mxu0 %v9890_v6  ;;  %v9969_v6 = vld [vmem:[#allocation7 + $0x380] ss:$8 sps:$4 sm:$0xff]  }
  0xd0   :  { %3529 = vmatpush1.bf16.msra.mxu0 %v9888_v8  ;;  %v9972_v8 = vld [vmem:[#allocation7 + $0x390] ss:$8 sps:$4 sm:$0xff]  }
  0xd1   :  { %3530 = vmatprep.subr.bf16.mxu0 %v9893_v9  ;;  %v9977_v9 = vld [vmem:[#allocation7 + $0x3a4] ss:$8 sps:$4 sm:$0xff]  }
  0xd4   :  { %3531 = vmatpush1.bf16.msra.mxu0 %v9891_v10  ;;  %v9975_v10 = vld [vmem:[#allocation7 + $0x3a0] ss:$8 sps:$4 sm:$0xff]  }
  0xd5   :  { %3532 = vmatprep.subr.bf16.mxu0 %v9896_v11  ;;  %v9980_v11 = vld [vmem:[#allocation7 + $0x3b4] ss:$8 sps:$4 sm:$0xff]  }
  0xd8   :  { %3533 = vmatpush1.bf16.msra.mxu0 %v9894_v14  ;;  %v9983_v14 = vld [vmem:[#allocation7 + $0x3c4] ss:$8 sps:$4 sm:$0xff]  }
  0xd9   :  { %3543 = vmatprep.subr.bf16.mxu0 %v9899_v15  ;;  %v9981_v15 = vld [vmem:[#allocation7 + $0x3c0] ss:$8 sps:$4 sm:$0xff]  }
  0xdb   :  { %3535 = vmatmul.mubr.bf16.vlgmr.msra.gmra.mrb[0].mxu0 %v718_v18  ;;  %v9984_v18 = vld [vmem:[#allocation7 + $0x3d0] ss:$8 sps:$4 sm:$0xff]  }
  0xdc   :  { %3544 = vmatpush1.bf16.msra.mxu0 %v9897_v19  ;;  %3575 = vmatprep.mubr.bf16.mxu0 %v10987_v21  ;;  %v9989_v19 = vld [vmem:[#allocation7 + $0x3e4] ss:$8 sps:$4 sm:$0xff]   ;;  %v9987_v21 = vld [vmem:[#allocation7 + $0x3e0] ss:$8 sps:$4 sm:$0xff]  }
  0xdd   :  { %3545 = vmatprep.subr.bf16.mxu0 %v9902_v20  ;;  %v11000_v20 = vld [vmem:[%s11355_s0 + $0x8] sm:$0xff] }
  0xe0   :  { %3546 = vmatpush1.bf16.msra.mxu0 %v9900_v22  ;;  %v11004_v22 = vrot.slane %v11000_v20, %v10963_v16 }
  0xe1   :  { %3547 = vmatprep.subr.bf16.mxu0 %v9905_v23  ;;  %v9992_v23 = vld [vmem:[#allocation7 + $0x3f4] ss:$8 sps:$4 sm:$0xff]  }
  0xe4   :  { %3548 = vmatpush1.bf16.msra.mxu0 %v9903_v24  ;;  %v9990_v24 = vld [vmem:[#allocation7 + $0x3f0] ss:$8 sps:$4 sm:$0xff]  }
  0xe5   :  { %3549 = vmatprep.subr.bf16.mxu0 %v9908_v25  ;;  %v737_v25 = vcombine.high %v11004_v22, %v11004_v22 }
  0xe8   :  { %3550 = vmatpush1.bf16.msra.mxu0 %v9906_v26  ;;  %v9995_v26 = vld [vmem:[#allocation7 + $0x404] ss:$8 sps:$4 sm:$0xff]  }
  0xe9   :  { %3551 = vmatprep.subr.bf16.mxu0 %v9911_v27  ;;  %v719_v27 = vcombine.high %v10992_v52, %v10992_v52 }
  0xec   :  { %3552 = vmatpush1.bf16.msra.mxu0 %v9909_v28  ;;  %v9993_v28 = vld [vmem:[#allocation7 + $0x400] ss:$8 sps:$4 sm:$0xff]  }
  0xed   :  { %3553 = vmatprep.subr.bf16.mxu0 %v9914_v29  ;;  %v11011_v29 = vrot.slane %v737_v25, %v10963_v16  ;;  %v10079_v25 = vld [vmem:[#allocation7 + $0x5c4] ss:$8 sps:$4 sm:$0xff]  }
  0xf0   :  { %3554 = vmatpush1.bf16.msra.mxu0 %v9912_v30  ;;  %v9998_v30 = vld [vmem:[#allocation7 + $0x414] ss:$8 sps:$4 sm:$0xff]  }
  0xf1   :  { %3555 = vmatprep.subr.bf16.mxu0 %v9917_v31  ;;  %v9996_v31 = vld [vmem:[#allocation7 + $0x410] ss:$8 sps:$4 sm:$0xff]  }
  0xf4   :  { %3556 = vmatpush1.bf16.msra.mxu0 %v9915_v32  ;;  %v10001_v32 = vld [vmem:[#allocation7 + $0x424] ss:$8 sps:$4 sm:$0xff]  }
  0xf5   :  { %3557 = vmatprep.subr.bf16.mxu0 %v9920_v33  ;;  %v9999_v33 = vld [vmem:[#allocation7 + $0x420] ss:$8 sps:$4 sm:$0xff]  }
  0xf8   :  { %3558 = vmatpush1.bf16.msra.mxu0 %v9918_v34  ;;  %v10004_v34 = vld [vmem:[#allocation7 + $0x434] ss:$8 sps:$4 sm:$0xff]  }
  0xf9   :  { %3559 = vmatprep.subr.bf16.mxu0 %v9923_v35  ;;  %v10002_v35 = vld [vmem:[#allocation7 + $0x430] ss:$8 sps:$4 sm:$0xff]  }
  0xfc   :  { %3560 = vmatpush1.bf16.msra.mxu0 %v9921_v36  ;;  %v10007_v36 = vld [vmem:[#allocation7 + $0x444] ss:$8 sps:$4 sm:$0xff]  }
  0xfd   :  { %3561 = vmatprep.subr.bf16.mxu0 %v9926_v37  ;;  %v10005_v37 = vld [vmem:[#allocation7 + $0x440] ss:$8 sps:$4 sm:$0xff]  }
 0x100   :  { %3562 = vmatpush1.bf16.msra.mxu0 %v9924_v38  ;;  %v10010_v38 = vld [vmem:[#allocation7 + $0x454] ss:$8 sps:$4 sm:$0xff]  }
 0x101   :  { %3563 = vmatprep.subr.bf16.mxu0 %v9929_v39  ;;  %v10008_v39 = vld [vmem:[#allocation7 + $0x450] ss:$8 sps:$4 sm:$0xff]  }
 0x104   :  { %3564 = vmatpush1.bf16.msra.mxu0 %v9927_v40  ;;  %v10013_v40 = vld [vmem:[#allocation7 + $0x464] ss:$8 sps:$4 sm:$0xff]  }
 0x105   :  { %3565 = vmatprep.subr.bf16.mxu0 %v9932_v41  ;;  %v10011_v41 = vld [vmem:[#allocation7 + $0x460] ss:$8 sps:$4 sm:$0xff]  }
 0x108   :  { %3566 = vmatpush1.bf16.msra.mxu0 %v9930_v42  ;;  %v10016_v42 = vld [vmem:[#allocation7 + $0x474] ss:$8 sps:$4 sm:$0xff]  }
 0x109   :  { %3567 = vmatprep.subr.bf16.mxu0 %v9935_v43  ;;  %v10014_v43 = vld [vmem:[#allocation7 + $0x470] ss:$8 sps:$4 sm:$0xff]  }
 0x10c   :  { %3568 = vmatpush1.bf16.msra.mxu0 %v9933_v44  ;;  %v10019_v44 = vld [vmem:[#allocation7 + $0x484] ss:$8 sps:$4 sm:$0xff]  }
 0x10d   :  { %3569 = vmatprep.subr.bf16.mxu0 %v9938_v45  ;;  %v10017_v45 = vld [vmem:[#allocation7 + $0x480] ss:$8 sps:$4 sm:$0xff]  }
 0x110   :  { %3570 = vmatpush1.bf16.msra.mxu0 %v9936_v46  ;;  %v10022_v46 = vld [vmem:[#allocation7 + $0x494] ss:$8 sps:$4 sm:$0xff]  }
 0x111   :  { %3571 = vmatprep.subr.bf16.mxu0 %v9941_v47  ;;  %v10020_v47 = vld [vmem:[#allocation7 + $0x490] ss:$8 sps:$4 sm:$0xff]  }
 0x114   :  { %3572 = vmatpush1.bf16.msra.mxu0 %v9939_v48  ;;  %v10025_v48 = vld [vmem:[#allocation7 + $0x4a4] ss:$8 sps:$4 sm:$0xff]  }
 0x115   :  { %3573 = vmatprep.subr.bf16.mxu0 %v9944_v49  ;;  %v10023_v49 = vld [vmem:[#allocation7 + $0x4a0] ss:$8 sps:$4 sm:$0xff]  }
 0x118   :  { %3574 = vmatpush1.bf16.msra.mxu0 %v9942_v50  ;;  %v10028_v50 = vld [vmem:[#allocation7 + $0x4b4] ss:$8 sps:$4 sm:$0xff]  }
 0x119   :  { %3584 = vmatprep.subr.bf16.mxu0 %v9947_v51  ;;  %v10026_v51 = vld [vmem:[#allocation7 + $0x4b0] ss:$8 sps:$4 sm:$0xff]  }
 0x11b   :  { %3576 = vmatmul.mubr.bf16.vlgmr.msra.gmra.mrb[0].mxu0 %v10992_v52  ;;  %v10031_v52 = vld [vmem:[#allocation7 + $0x4c4] ss:$8 sps:$4 sm:$0xff]  }
 0x11c   :  { %3585 = vmatpush1.bf16.msra.mxu0 %v9945_v53  ;;  %3616 = vmatprep.mubr.bf16.mxu0 %v721_v55  ;;  %v10029_v53 = vld [vmem:[#allocation7 + $0x4c0] ss:$8 sps:$4 sm:$0xff]   ;;  %v10032_v55 = vld [vmem:[#allocation7 + $0x4d0] ss:$8 sps:$4 sm:$0xff]  }
 0x11d   :  { %3586 = vmatprep.subr.bf16.mxu0 %v9950_v54  ;;  %v10034_v54 = vld [vmem:[#allocation7 + $0x4d4] ss:$8 sps:$4 sm:$0xff]  }
 0x120   :  { %3587 = vmatpush1.bf16.msra.mxu0 %v9948_v56  ;;  %v10037_v56 = vld [vmem:[#allocation7 + $0x4e4] ss:$8 sps:$4 sm:$0xff]  }
 0x121   :  { %3588 = vmatprep.subr.bf16.mxu0 %v9953_v57  ;;  %v10035_v57 = vld [vmem:[#allocation7 + $0x4e0] ss:$8 sps:$4 sm:$0xff]  }
 0x124   :  { %3589 = vmatpush1.bf16.msra.mxu0 %v9951_v58  ;;  %v10040_v58 = vld [vmem:[#allocation7 + $0x4f4] ss:$8 sps:$4 sm:$0xff]  }
 0x125   :  { %3590 = vmatprep.subr.bf16.mxu0 %v9956_v59  ;;  %v10038_v59 = vld [vmem:[#allocation7 + $0x4f0] ss:$8 sps:$4 sm:$0xff]  }
 0x128   :  { %3591 = vmatpush1.bf16.msra.mxu0 %v9954_v60  ;;  %v10043_v60 = vld [vmem:[#allocation7 + $0x504] ss:$8 sps:$4 sm:$0xff]  }
 0x129   :  { %3592 = vmatprep.subr.bf16.mxu0 %v9959_v61  ;;  %v11016_v61 = vrot.slane %v11004_v22, %v10963_v16  ;;  %v10071_v22 = vld [vmem:[#allocation7 + $0x5a0] ss:$8 sps:$4 sm:$0xff]  }
 0x12c   :  { %3593 = vmatpush1.bf16.msra.mxu0 %v9957_v62  ;;  %v10041_v62 = vld [vmem:[#allocation7 + $0x500] ss:$8 sps:$4 sm:$0xff]  }
 0x12d   :  { %3594 = vmatprep.subr.bf16.mxu0 %v9962_v63  ;;  %v769_v63 = vcombine.high %v11011_v29, %v11011_v29 }
 0x130   :  { %3595 = vmatpush1.bf16.msra.mxu0 %v9960_v0  ;;  %v10046_v0 = vld [vmem:[#allocation7 + $0x514] ss:$8 sps:$4 sm:$0xff]  }
 0x131   :  { %3596 = vmatprep.subr.bf16.mxu0 %v9965_v1  ;;  %v10044_v1 = vld [vmem:[#allocation7 + $0x510] ss:$8 sps:$4 sm:$0xff]  }
 0x134   :  { %3597 = vmatpush1.bf16.msra.mxu0 %v9963_v2  ;;  %v10049_v2 = vld [vmem:[#allocation7 + $0x524] ss:$8 sps:$4 sm:$0xff]  }
 0x135   :  { %3598 = vmatprep.subr.bf16.mxu0 %v9968_v3  ;;  %v10047_v3 = vld [vmem:[#allocation7 + $0x520] ss:$8 sps:$4 sm:$0xff]  }
 0x138   :  { %3599 = vmatpush1.bf16.msra.mxu0 %v9966_v4  ;;  %v10052_v4 = vld [vmem:[#allocation7 + $0x534] ss:$8 sps:$4 sm:$0xff]  }
 0x139   :  { %3600 = vmatprep.subr.bf16.mxu0 %v9971_v5  ;;  %v10050_v5 = vld [vmem:[#allocation7 + $0x530] ss:$8 sps:$4 sm:$0xff]  }
 0x13c   :  { %3601 = vmatpush1.bf16.msra.mxu0 %v9969_v6  ;;  %v10055_v6 = vld [vmem:[#allocation7 + $0x544] ss:$8 sps:$4 sm:$0xff]  }
 0x13d   :  { %3602 = vmatprep.subr.bf16.mxu0 %v9974_v7  ;;  %v10053_v7 = vld [vmem:[#allocation7 + $0x540] ss:$8 sps:$4 sm:$0xff]  }
 0x140   :  { %3603 = vmatpush1.bf16.msra.mxu0 %v9972_v8  ;;  %v10058_v8 = vld [vmem:[#allocation7 + $0x554] ss:$8 sps:$4 sm:$0xff]  }
 0x141   :  { %3604 = vmatprep.subr.bf16.mxu0 %v9977_v9  ;;  %v10056_v9 = vld [vmem:[#allocation7 + $0x550] ss:$8 sps:$4 sm:$0xff]  }
 0x144   :  { %3605 = vmatpush1.bf16.msra.mxu0 %v9975_v10  ;;  %v10061_v10 = vld [vmem:[#allocation7 + $0x564] ss:$8 sps:$4 sm:$0xff]  }
 0x145   :  { %3606 = vmatprep.subr.bf16.mxu0 %v9980_v11  ;;  %v10059_v11 = vld [vmem:[#allocation7 + $0x560] ss:$8 sps:$4 sm:$0xff]  }
 0x148   :  { %3607 = vmatpush1.bf16.msra.mxu0 %v9978_v13  ;;  %v10064_v13 = vld [vmem:[#allocation7 + $0x574] ss:$8 sps:$4 sm:$0xff]  }
 0x149   :  { %3608 = vmatprep.subr.bf16.mxu0 %v9983_v14  ;;  %v10062_v14 = vld [vmem:[#allocation7 + $0x570] ss:$8 sps:$4 sm:$0xff]  }
 0x14c   :  { %3609 = vmatpush1.bf16.msra.mxu0 %v9981_v15  ;;  %v10067_v15 = vld [vmem:[#allocation7 + $0x584] ss:$8 sps:$4 sm:$0xff]  }
 0x14d   :  { %3610 = vmatprep.subr.bf16.mxu0 %v9986_v17  ;;  %v10065_v17 = vld [vmem:[#allocation7 + $0x580] ss:$8 sps:$4 sm:$0xff]  }
 0x150   :  { %3611 = vmatpush1.bf16.msra.mxu0 %v9984_v18  ;;  %v10070_v18 = vld [vmem:[#allocation7 + $0x594] ss:$8 sps:$4 sm:$0xff]  }
 0x151   :  { %3612 = vmatprep.subr.bf16.mxu0 %v9989_v19  ;;  %v10068_v19 = vld [vmem:[#allocation7 + $0x590] ss:$8 sps:$4 sm:$0xff]  }
 0x154   :  { %3613 = vmatpush1.bf16.msra.mxu0 %v9987_v21  ;;  %v10073_v21 = vld [vmem:[#allocation7 + $0x5a4] ss:$8 sps:$4 sm:$0xff]  }
 0x155   :  { %3614 = vmatprep.subr.bf16.mxu0 %v9992_v23  ;;  %v10076_v23 = vld [vmem:[#allocation7 + $0x5b4] ss:$8 sps:$4 sm:$0xff]  }
 0x158   :  { %3615 = vmatpush1.bf16.msra.mxu0 %v9990_v24  ;;  %v10074_v24 = vld [vmem:[#allocation7 + $0x5b0] ss:$8 sps:$4 sm:$0xff]  }
 0x159   :  { %3625 = vmatprep.subr.bf16.mxu0 %v9995_v26  ;;  %v10077_v26 = vld [vmem:[#allocation7 + $0x5c0] ss:$8 sps:$4 sm:$0xff]  }
 0x15b   :  { %3617 = vmatmul.mubr.bf16.vlgmr.msra.gmra.mrb[0].mxu0 %v719_v27  ;;  %v10082_v27 = vld [vmem:[#allocation7 + $0x5d4] ss:$8 sps:$4 sm:$0xff]  }
 0x15c   :  { %3626 = vmatpush1.bf16.msra.mxu0 %v9993_v28  ;;  %3657 = vmatprep.mubr.bf16.mxu0 %v11011_v29  ;;  %v10080_v28 = vld [vmem:[#allocation7 + $0x5d0] ss:$8 sps:$4 sm:$0xff]   ;;  %v722_v29 = vcombine.high %v11000_v20, %v11000_v20  ;;  %v10089_v20 = vld [vmem:[#allocation7 + $0x600] ss:$8 sps:$4 sm:$0xff]  }
 0x15d   :  { %3627 = vmatprep.subr.bf16.mxu0 %v9998_v30  ;;  %v10085_v30 = vld [vmem:[#allocation7 + $0x5e4] ss:$8 sps:$4 sm:$0xff]  }
 0x160   :  { %3628 = vmatpush1.bf16.msra.mxu0 %v9996_v31  ;;  %v10083_v31 = vld [vmem:[#allocation7 + $0x5e0] ss:$8 sps:$4 sm:$0xff]  }
 0x161   :  { %3629 = vmatprep.subr.bf16.mxu0 %v10001_v32  ;;  %v11024_v32 = vrot.slane %v722_v29, %v10963_v16  ;;  %v10165_v29 = vld [vmem:[#allocation7 + $0x790] ss:$8 sps:$4 sm:$0xff]  }
 0x164   :  { %3630 = vmatpush1.bf16.msra.mxu0 %v9999_v33  ;;  %v10088_v33 = vld [vmem:[#allocation7 + $0x5f4] ss:$8 sps:$4 sm:$0xff]  }
 0x165   :  { %3631 = vmatprep.subr.bf16.mxu0 %v10004_v34  ;;  %v10086_v34 = vld [vmem:[#allocation7 + $0x5f0] ss:$8 sps:$4 sm:$0xff]  }
 0x168   :  { %3632 = vmatpush1.bf16.msra.mxu0 %v10002_v35  ;;  %v738_v35 = vcombine.high %v11024_v32, %v11024_v32 }
 0x169   :  { %3633 = vmatprep.subr.bf16.mxu0 %v10007_v36  ;;  %v10091_v36 = vld [vmem:[#allocation7 + $0x604] ss:$8 sps:$4 sm:$0xff]  }
 0x16c   :  { %3634 = vmatpush1.bf16.msra.mxu0 %v10005_v37  ;;  %v767_v37 = vcombine.high %v11016_v61, %v11016_v61 }
 0x16d   :  { %3635 = vmatprep.subr.bf16.mxu0 %v10010_v38  ;;  %v11031_v38 = vrot.slane %v738_v35, %v10963_v16  ;;  %v10174_v35 = vld [vmem:[#allocation7 + $0x7c0] ss:$8 sps:$4 sm:$0xff]  }
 0x170   :  { %3636 = vmatpush1.bf16.msra.mxu0 %v10008_v39  ;;  %v10094_v39 = vld [vmem:[#allocation7 + $0x614] ss:$8 sps:$4 sm:$0xff]  }
 0x171   :  { %3637 = vmatprep.subr.bf16.mxu0 %v10013_v40  ;;  %v10092_v40 = vld [vmem:[#allocation7 + $0x610] ss:$8 sps:$4 sm:$0xff]  }
 0x174   :  { %3638 = vmatpush1.bf16.msra.mxu0 %v10011_v41  ;;  %v10097_v41 = vld [vmem:[#allocation7 + $0x624] ss:$8 sps:$4 sm:$0xff]  }
 0x175   :  { %3639 = vmatprep.subr.bf16.mxu0 %v10016_v42  ;;  %v10095_v42 = vld [vmem:[#allocation7 + $0x620] ss:$8 sps:$4 sm:$0xff]  }
 0x178   :  { %3640 = vmatpush1.bf16.msra.mxu0 %v10014_v43  ;;  %v10100_v43 = vld [vmem:[#allocation7 + $0x634] ss:$8 sps:$4 sm:$0xff]  }
 0x179   :  { %3641 = vmatprep.subr.bf16.mxu0 %v10019_v44  ;;  %v10098_v44 = vld [vmem:[#allocation7 + $0x630] ss:$8 sps:$4 sm:$0xff]  }
 0x17c   :  { %3642 = vmatpush1.bf16.msra.mxu0 %v10017_v45  ;;  %v10103_v45 = vld [vmem:[#allocation7 + $0x644] ss:$8 sps:$4 sm:$0xff]  }
 0x17d   :  { %3643 = vmatprep.subr.bf16.mxu0 %v10022_v46  ;;  %v10101_v46 = vld [vmem:[#allocation7 + $0x640] ss:$8 sps:$4 sm:$0xff]  }
 0x180   :  { %3644 = vmatpush1.bf16.msra.mxu0 %v10020_v47  ;;  %v10106_v47 = vld [vmem:[#allocation7 + $0x654] ss:$8 sps:$4 sm:$0xff]  }
 0x181   :  { %3645 = vmatprep.subr.bf16.mxu0 %v10025_v48  ;;  %v10104_v48 = vld [vmem:[#allocation7 + $0x650] ss:$8 sps:$4 sm:$0xff]  }
 0x184   :  { %3646 = vmatpush1.bf16.msra.mxu0 %v10023_v49  ;;  %v10109_v49 = vld [vmem:[#allocation7 + $0x664] ss:$8 sps:$4 sm:$0xff]  }
 0x185   :  { %3647 = vmatprep.subr.bf16.mxu0 %v10028_v50  ;;  %v10107_v50 = vld [vmem:[#allocation7 + $0x660] ss:$8 sps:$4 sm:$0xff]  }
 0x188   :  { %3648 = vmatpush1.bf16.msra.mxu0 %v10026_v51  ;;  %v10112_v51 = vld [vmem:[#allocation7 + $0x674] ss:$8 sps:$4 sm:$0xff]  }
 0x189   :  { %3649 = vmatprep.subr.bf16.mxu0 %v10031_v52  ;;  %v10110_v52 = vld [vmem:[#allocation7 + $0x670] ss:$8 sps:$4 sm:$0xff]  }
 0x18c   :  { %3650 = vmatpush1.bf16.msra.mxu0 %v10029_v53  ;;  %v10115_v53 = vld [vmem:[#allocation7 + $0x684] ss:$8 sps:$4 sm:$0xff]  }
 0x18d   :  { %3651 = vmatprep.subr.bf16.mxu0 %v10034_v54  ;;  %v10113_v54 = vld [vmem:[#allocation7 + $0x680] ss:$8 sps:$4 sm:$0xff]  }
 0x190   :  { %3652 = vmatpush1.bf16.msra.mxu0 %v10032_v55  ;;  %v10118_v55 = vld [vmem:[#allocation7 + $0x694] ss:$8 sps:$4 sm:$0xff]  }
 0x191   :  { %3653 = vmatprep.subr.bf16.mxu0 %v10037_v56  ;;  %v10116_v56 = vld [vmem:[#allocation7 + $0x690] ss:$8 sps:$4 sm:$0xff]  }
 0x194   :  { %3654 = vmatpush1.bf16.msra.mxu0 %v10035_v57  ;;  %v10121_v57 = vld [vmem:[#allocation7 + $0x6a4] ss:$8 sps:$4 sm:$0xff]  }
 0x195   :  { %3655 = vmatprep.subr.bf16.mxu0 %v10040_v58  ;;  %v10119_v58 = vld [vmem:[#allocation7 + $0x6a0] ss:$8 sps:$4 sm:$0xff]  }
 0x198   :  { %3656 = vmatpush1.bf16.msra.mxu0 %v10038_v59  ;;  %v10124_v59 = vld [vmem:[#allocation7 + $0x6b4] ss:$8 sps:$4 sm:$0xff]  }
 0x199   :  { %3666 = vmatprep.subr.bf16.mxu0 %v10043_v60  ;;  %v10122_v60 = vld [vmem:[#allocation7 + $0x6b0] ss:$8 sps:$4 sm:$0xff]  }
 0x19b   :  { %3658 = vmatmul.mubr.bf16.vlgmr.msra.gmra.mrb[0].mxu0 %v11016_v61  ;;  %v10127_v61 = vld [vmem:[#allocation7 + $0x6c4] ss:$8 sps:$4 sm:$0xff]  }
 0x19c   :  { %3667 = vmatpush1.bf16.msra.mxu0 %v10041_v62  ;;  %3698 = vmatprep.mubr.bf16.mxu0 %v769_v63  ;;  %v10125_v62 = vld [vmem:[#allocation7 + $0x6c0] ss:$8 sps:$4 sm:$0xff]   ;;  %v10130_v63 = vld [vmem:[#allocation7 + $0x6d4] ss:$8 sps:$4 sm:$0xff]  }
 0x19d   :  { %3668 = vmatprep.subr.bf16.mxu0 %v10046_v0  ;;  %v10128_v0 = vld [vmem:[#allocation7 + $0x6d0] ss:$8 sps:$4 sm:$0xff]  }
 0x1a0   :  { %3669 = vmatpush1.bf16.msra.mxu0 %v10044_v1  ;;  %v10133_v1 = vld [vmem:[#allocation7 + $0x6e4] ss:$8 sps:$4 sm:$0xff]  }
 0x1a1   :  { %3670 = vmatprep.subr.bf16.mxu0 %v10049_v2  ;;  %v10131_v2 = vld [vmem:[#allocation7 + $0x6e0] ss:$8 sps:$4 sm:$0xff]  }
 0x1a4   :  { %3671 = vmatpush1.bf16.msra.mxu0 %v10047_v3  ;;  %v10136_v3 = vld [vmem:[#allocation7 + $0x6f4] ss:$8 sps:$4 sm:$0xff]  }
 0x1a5   :  { %3672 = vmatprep.subr.bf16.mxu0 %v10052_v4  ;;  %v10134_v4 = vld [vmem:[#allocation7 + $0x6f0] ss:$8 sps:$4 sm:$0xff]  }
 0x1a8   :  { %3673 = vmatpush1.bf16.msra.mxu0 %v10050_v5  ;;  %v10140_v5 = vld [vmem:[#allocation7 + $0x704] ss:$8 sps:$4 sm:$0xff]  }
 0x1a9   :  { %3674 = vmatprep.subr.bf16.mxu0 %v10055_v6  ;;  %v11036_v6 = vrot.slane %v11024_v32, %v10963_v16  ;;  %v10173_v32 = vld [vmem:[#allocation7 + $0x7b4] ss:$8 sps:$4 sm:$0xff]  }
 0x1ac   :  { %3675 = vmatpush1.bf16.msra.mxu0 %v10053_v7  ;;  %v10138_v7 = vld [vmem:[#allocation7 + $0x700] ss:$8 sps:$4 sm:$0xff]  }
 0x1ad   :  { %3676 = vmatprep.subr.bf16.mxu0 %v10058_v8  ;;  %v770_v8 = vcombine.high %v11031_v38, %v11031_v38 }
 0x1b0   :  { %3677 = vmatpush1.bf16.msra.mxu0 %v10056_v9  ;;  %v10143_v9 = vld [vmem:[#allocation7 + $0x714] ss:$8 sps:$4 sm:$0xff]  }
 0x1b1   :  { %3678 = vmatprep.subr.bf16.mxu0 %v10061_v10  ;;  %v10141_v10 = vld [vmem:[#allocation7 + $0x710] ss:$8 sps:$4 sm:$0xff]  }
 0x1b4   :  { %3679 = vmatpush1.bf16.msra.mxu0 %v10059_v11  ;;  %v10146_v11 = vld [vmem:[#allocation7 + $0x724] ss:$8 sps:$4 sm:$0xff]  }
 0x1b5   :  { %3680 = vmatprep.subr.bf16.mxu0 %v10064_v13  ;;  %v10144_v13 = vld [vmem:[#allocation7 + $0x720] ss:$8 sps:$4 sm:$0xff]  }
 0x1b8   :  { %3681 = vmatpush1.bf16.msra.mxu0 %v10062_v14  ;;  %v10149_v14 = vld [vmem:[#allocation7 + $0x734] ss:$8 sps:$4 sm:$0xff]  }
 0x1b9   :  { %3682 = vmatprep.subr.bf16.mxu0 %v10067_v15  ;;  %v10147_v15 = vld [vmem:[#allocation7 + $0x730] ss:$8 sps:$4 sm:$0xff]  }
 0x1bc   :  { %3683 = vmatpush1.bf16.msra.mxu0 %v10065_v17  ;;  %v10152_v17 = vld [vmem:[#allocation7 + $0x744] ss:$8 sps:$4 sm:$0xff]  }
 0x1bd   :  { %3684 = vmatprep.subr.bf16.mxu0 %v10070_v18  ;;  %v10150_v18 = vld [vmem:[#allocation7 + $0x740] ss:$8 sps:$4 sm:$0xff]  }
 0x1c0   :  { %3685 = vmatpush1.bf16.msra.mxu0 %v10068_v19  ;;  %v10155_v19 = vld [vmem:[#allocation7 + $0x754] ss:$8 sps:$4 sm:$0xff]  }
 0x1c1   :  { %3686 = vmatprep.subr.bf16.mxu0 %v10073_v21  ;;  %v10153_v21 = vld [vmem:[#allocation7 + $0x750] ss:$8 sps:$4 sm:$0xff]  }
 0x1c4   :  { %3687 = vmatpush1.bf16.msra.mxu0 %v10071_v22  ;;  %v10158_v22 = vld [vmem:[#allocation7 + $0x764] ss:$8 sps:$4 sm:$0xff]  }
 0x1c5   :  { %3688 = vmatprep.subr.bf16.mxu0 %v10076_v23  ;;  %v10156_v23 = vld [vmem:[#allocation7 + $0x760] ss:$8 sps:$4 sm:$0xff]  }
 0x1c8   :  { %3689 = vmatpush1.bf16.msra.mxu0 %v10074_v24  ;;  %v10161_v24 = vld [vmem:[#allocation7 + $0x774] ss:$8 sps:$4 sm:$0xff]  }
 0x1c9   :  { %3690 = vmatprep.subr.bf16.mxu0 %v10079_v25  ;;  %v10159_v25 = vld [vmem:[#allocation7 + $0x770] ss:$8 sps:$4 sm:$0xff]  }
 0x1cc   :  { %3691 = vmatpush1.bf16.msra.mxu0 %v10077_v26  ;;  %v10164_v26 = vld [vmem:[#allocation7 + $0x784] ss:$8 sps:$4 sm:$0xff]  }
 0x1cd   :  { %3692 = vmatprep.subr.bf16.mxu0 %v10082_v27  ;;  %v10162_v27 = vld [vmem:[#allocation7 + $0x780] ss:$8 sps:$4 sm:$0xff]  }
 0x1d0   :  { %3693 = vmatpush1.bf16.msra.mxu0 %v10080_v28  ;;  %v10167_v28 = vld [vmem:[#allocation7 + $0x794] ss:$8 sps:$4 sm:$0xff]  }
 0x1d1   :  { %3694 = vmatprep.subr.bf16.mxu0 %v10085_v30  ;;  %v10170_v30 = vld [vmem:[#allocation7 + $0x7a4] ss:$8 sps:$4 sm:$0xff]  }
 0x1d4   :  { %3695 = vmatpush1.bf16.msra.mxu0 %v10083_v31  ;;  %v10168_v31 = vld [vmem:[#allocation7 + $0x7a0] ss:$8 sps:$4 sm:$0xff]  }
 0x1d5   :  { %3696 = vmatprep.subr.bf16.mxu0 %v10088_v33  ;;  %v10171_v33 = vld [vmem:[#allocation7 + $0x7b0] ss:$8 sps:$4 sm:$0xff]  }
 0x1d8   :  { %3697 = vmatpush1.bf16.msra.mxu0 %v10086_v34  ;;  %v10176_v34 = vld [vmem:[#allocation7 + $0x7c4] ss:$8 sps:$4 sm:$0xff]  }
 0x1d9   :  { %3707 = vmatprep.subr.bf16.mxu0 %v10091_v36  ;;  %v10179_v36 = vld [vmem:[#allocation7 + $0x7d4] ss:$8 sps:$4 sm:$0xff]  }
 0x1db   :  { %3699 = vmatmul.mubr.bf16.vlgmr.msra.gmra.mrb[0].mxu0 %v767_v37  ;;  %v10177_v37 = vld [vmem:[#allocation7 + $0x7d0] ss:$8 sps:$4 sm:$0xff]  }
 0x1dc   :  { %3708 = vmatpush1.bf16.msra.mxu0 %v10089_v20  ;;  %3739 = vmatprep.mubr.bf16.mxu0 %v11031_v38  ;;  %v10182_v20 = vld [vmem:[#allocation7 + $0x7e4] ss:$8 sps:$4 sm:$0xff]  }
 0x1dd   :  { %3709 = vmatprep.subr.bf16.mxu0 %v10094_v39  ;;  %v11044_v38 = vld [vmem:[%s11355_s0 + $0x10] sm:$0xff] }
 0x1de   :  { %v10180_v39 = vld [vmem:[#allocation7 + $0x7e0] ss:$8 sps:$4 sm:$0xff]  }
 0x1e0   :  { %3710 = vmatpush1.bf16.msra.mxu0 %v10092_v40  ;;  %v11048_v40 = vrot.slane %v11044_v38, %v10963_v16 }
 0x1e1   :  { %3711 = vmatprep.subr.bf16.mxu0 %v10097_v41  ;;  %v10185_v41 = vld [vmem:[#allocation7 + $0x7f4] ss:$8 sps:$4 sm:$0xff]  }
 0x1e4   :  { %3712 = vmatpush1.bf16.msra.mxu0 %v10095_v42  ;;  %v10183_v42 = vld [vmem:[#allocation7 + $0x7f0] ss:$8 sps:$4 sm:$0xff]  }
 0x1e5   :  { %3713 = vmatprep.subr.bf16.mxu0 %v10100_v43  ;;  %v786_v43 = vcombine.high %v11048_v40, %v11048_v40 }
 0x1e8   :  { %3714 = vmatpush1.bf16.msra.mxu0 %v10098_v44  ;;  %v10188_v44 = vld [vmem:[#allocation7 + $0x804] ss:$8 sps:$4 sm:$0xff]  }
 0x1e9   :  { %3715 = vmatprep.subr.bf16.mxu0 %v10103_v45  ;;  %v768_v45 = vcombine.high %v11036_v6, %v11036_v6 }
 0x1ec   :  { %3716 = vmatpush1.bf16.msra.mxu0 %v10101_v46  ;;  %v10186_v46 = vld [vmem:[#allocation7 + $0x800] ss:$8 sps:$4 sm:$0xff]  }
 0x1ed   :  { %3717 = vmatprep.subr.bf16.mxu0 %v10106_v47  ;;  %v11055_v47 = vrot.slane %v786_v43, %v10963_v16  ;;  %v10272_v43 = vld [vmem:[#allocation7 + $0x9c4] ss:$8 sps:$4 sm:$0xff]  }
 0x1f0   :  { %3718 = vmatpush1.bf16.msra.mxu0 %v10104_v48  ;;  %v10191_v48 = vld [vmem:[#allocation7 + $0x814] ss:$8 sps:$4 sm:$0xff]  }
 0x1f1   :  { %3719 = vmatprep.subr.bf16.mxu0 %v10109_v49  ;;  %v10189_v49 = vld [vmem:[#allocation7 + $0x810] ss:$8 sps:$4 sm:$0xff]  }
 0x1f4   :  { %3720 = vmatpush1.bf16.msra.mxu0 %v10107_v50  ;;  %v10194_v50 = vld [vmem:[#allocation7 + $0x824] ss:$8 sps:$4 sm:$0xff]  }
 0x1f5   :  { %3721 = vmatprep.subr.bf16.mxu0 %v10112_v51  ;;  %v10192_v51 = vld [vmem:[#allocation7 + $0x820] ss:$8 sps:$4 sm:$0xff]  }
 0x1f8   :  { %3722 = vmatpush1.bf16.msra.mxu0 %v10110_v52  ;;  %v10197_v52 = vld [vmem:[#allocation7 + $0x834] ss:$8 sps:$4 sm:$0xff]  }
 0x1f9   :  { %3723 = vmatprep.subr.bf16.mxu0 %v10115_v53  ;;  %v10195_v53 = vld [vmem:[#allocation7 + $0x830] ss:$8 sps:$4 sm:$0xff]  }
 0x1fc   :  { %3724 = vmatpush1.bf16.msra.mxu0 %v10113_v54  ;;  %v10200_v54 = vld [vmem:[#allocation7 + $0x844] ss:$8 sps:$4 sm:$0xff]  }
 0x1fd   :  { %3725 = vmatprep.subr.bf16.mxu0 %v10118_v55  ;;  %v10198_v55 = vld [vmem:[#allocation7 + $0x840] ss:$8 sps:$4 sm:$0xff]  }
 0x200   :  { %3726 = vmatpush1.bf16.msra.mxu0 %v10116_v56  ;;  %v10203_v56 = vld [vmem:[#allocation7 + $0x854] ss:$8 sps:$4 sm:$0xff]  }
 0x201   :  { %3727 = vmatprep.subr.bf16.mxu0 %v10121_v57  ;;  %v10201_v57 = vld [vmem:[#allocation7 + $0x850] ss:$8 sps:$4 sm:$0xff]  }
 0x204   :  { %3728 = vmatpush1.bf16.msra.mxu0 %v10119_v58  ;;  %v10206_v58 = vld [vmem:[#allocation7 + $0x864] ss:$8 sps:$4 sm:$0xff]  }
 0x205   :  { %3729 = vmatprep.subr.bf16.mxu0 %v10124_v59  ;;  %v10204_v59 = vld [vmem:[#allocation7 + $0x860] ss:$8 sps:$4 sm:$0xff]  }
 0x208   :  { %3730 = vmatpush1.bf16.msra.mxu0 %v10122_v60  ;;  %v10209_v60 = vld [vmem:[#allocation7 + $0x874] ss:$8 sps:$4 sm:$0xff]  }
 0x209   :  { %3731 = vmatprep.subr.bf16.mxu0 %v10127_v61  ;;  %v10207_v61 = vld [vmem:[#allocation7 + $0x870] ss:$8 sps:$4 sm:$0xff]  }
 0x20c   :  { %3732 = vmatpush1.bf16.msra.mxu0 %v10125_v62  ;;  %v10212_v62 = vld [vmem:[#allocation7 + $0x884] ss:$8 sps:$4 sm:$0xff]  }
 0x20d   :  { %3733 = vmatprep.subr.bf16.mxu0 %v10130_v63  ;;  %v10210_v63 = vld [vmem:[#allocation7 + $0x880] ss:$8 sps:$4 sm:$0xff]  }
 0x210   :  { %3734 = vmatpush1.bf16.msra.mxu0 %v10128_v0  ;;  %v10215_v0 = vld [vmem:[#allocation7 + $0x894] ss:$8 sps:$4 sm:$0xff]  }
 0x211   :  { %3735 = vmatprep.subr.bf16.mxu0 %v10133_v1  ;;  %v10213_v1 = vld [vmem:[#allocation7 + $0x890] ss:$8 sps:$4 sm:$0xff]  }
 0x214   :  { %3736 = vmatpush1.bf16.msra.mxu0 %v10131_v2  ;;  %v10218_v2 = vld [vmem:[#allocation7 + $0x8a4] ss:$8 sps:$4 sm:$0xff]  }
 0x215   :  { %3737 = vmatprep.subr.bf16.mxu0 %v10136_v3  ;;  %v10216_v3 = vld [vmem:[#allocation7 + $0x8a0] ss:$8 sps:$4 sm:$0xff]  }
 0x218   :  { %3738 = vmatpush1.bf16.msra.mxu0 %v10134_v4  ;;  %v10221_v4 = vld [vmem:[#allocation7 + $0x8b4] ss:$8 sps:$4 sm:$0xff]  }
 0x219   :  { %3748 = vmatprep.subr.bf16.mxu0 %v10140_v5  ;;  %v10219_v5 = vld [vmem:[#allocation7 + $0x8b0] ss:$8 sps:$4 sm:$0xff]  }
 0x21b   :  { %3740 = vmatmul.mubr.bf16.vlgmr.msra.gmra.mrb[0].mxu0 %v11036_v6  ;;  %v10224_v6 = vld [vmem:[#allocation7 + $0x8c4] ss:$8 sps:$4 sm:$0xff]  }
 0x21c   :  { %3749 = vmatpush1.bf16.msra.mxu0 %v10138_v7  ;;  %3780 = vmatprep.mubr.bf16.mxu0 %v770_v8  ;;  %v10222_v7 = vld [vmem:[#allocation7 + $0x8c0] ss:$8 sps:$4 sm:$0xff]   ;;  %v10227_v8 = vld [vmem:[#allocation7 + $0x8d4] ss:$8 sps:$4 sm:$0xff]  }
 0x21d   :  { %3750 = vmatprep.subr.bf16.mxu0 %v10143_v9  ;;  %v10225_v9 = vld [vmem:[#allocation7 + $0x8d0] ss:$8 sps:$4 sm:$0xff]  }
 0x220   :  { %3751 = vmatpush1.bf16.msra.mxu0 %v10141_v10  ;;  %v10230_v10 = vld [vmem:[#allocation7 + $0x8e4] ss:$8 sps:$4 sm:$0xff]  }
 0x221   :  { %3752 = vmatprep.subr.bf16.mxu0 %v10146_v11  ;;  %v10228_v11 = vld [vmem:[#allocation7 + $0x8e0] ss:$8 sps:$4 sm:$0xff]  }
 0x224   :  { %3753 = vmatpush1.bf16.msra.mxu0 %v10144_v13  ;;  %v10233_v13 = vld [vmem:[#allocation7 + $0x8f4] ss:$8 sps:$4 sm:$0xff]  }
 0x225   :  { %3754 = vmatprep.subr.bf16.mxu0 %v10149_v14  ;;  %v10231_v14 = vld [vmem:[#allocation7 + $0x8f0] ss:$8 sps:$4 sm:$0xff]  }
 0x228   :  { %3755 = vmatpush1.bf16.msra.mxu0 %v10147_v15  ;;  %v10236_v15 = vld [vmem:[#allocation7 + $0x904] ss:$8 sps:$4 sm:$0xff]  }
 0x229   :  { %3756 = vmatprep.subr.bf16.mxu0 %v10152_v17  ;;  %v11060_v17 = vrot.slane %v11048_v40, %v10963_v16  ;;  %v10264_v40 = vld [vmem:[#allocation7 + $0x9a0] ss:$8 sps:$4 sm:$0xff]  }
 0x22c   :  { %3757 = vmatpush1.bf16.msra.mxu0 %v10150_v18  ;;  %v10234_v18 = vld [vmem:[#allocation7 + $0x900] ss:$8 sps:$4 sm:$0xff]  }
 0x22d   :  { %3758 = vmatprep.subr.bf16.mxu0 %v10155_v19  ;;  %v818_v19 = vcombine.high %v11055_v47, %v11055_v47 }
 0x230   :  { %3759 = vmatpush1.bf16.msra.mxu0 %v10153_v21  ;;  %v10239_v21 = vld [vmem:[#allocation7 + $0x914] ss:$8 sps:$4 sm:$0xff]  }
 0x231   :  { %3760 = vmatprep.subr.bf16.mxu0 %v10158_v22  ;;  %v10237_v22 = vld [vmem:[#allocation7 + $0x910] ss:$8 sps:$4 sm:$0xff]  }
 0x234   :  { %3761 = vmatpush1.bf16.msra.mxu0 %v10156_v23  ;;  %v10242_v23 = vld [vmem:[#allocation7 + $0x924] ss:$8 sps:$4 sm:$0xff]  }
 0x235   :  { %3762 = vmatprep.subr.bf16.mxu0 %v10161_v24  ;;  %v10240_v24 = vld [vmem:[#allocation7 + $0x920] ss:$8 sps:$4 sm:$0xff]  }
 0x238   :  { %3763 = vmatpush1.bf16.msra.mxu0 %v10159_v25  ;;  %v10245_v25 = vld [vmem:[#allocation7 + $0x934] ss:$8 sps:$4 sm:$0xff]  }
 0x239   :  { %3764 = vmatprep.subr.bf16.mxu0 %v10164_v26  ;;  %v10243_v26 = vld [vmem:[#allocation7 + $0x930] ss:$8 sps:$4 sm:$0xff]  }
 0x23c   :  { %3765 = vmatpush1.bf16.msra.mxu0 %v10162_v27  ;;  %v10248_v27 = vld [vmem:[#allocation7 + $0x944] ss:$8 sps:$4 sm:$0xff]  }
 0x23d   :  { %3766 = vmatprep.subr.bf16.mxu0 %v10167_v28  ;;  %v10246_v28 = vld [vmem:[#allocation7 + $0x940] ss:$8 sps:$4 sm:$0xff]  }
 0x240   :  { %3767 = vmatpush1.bf16.msra.mxu0 %v10165_v29  ;;  %v10251_v29 = vld [vmem:[#allocation7 + $0x954] ss:$8 sps:$4 sm:$0xff]  }
 0x241   :  { %3768 = vmatprep.subr.bf16.mxu0 %v10170_v30  ;;  %v10249_v30 = vld [vmem:[#allocation7 + $0x950] ss:$8 sps:$4 sm:$0xff]  }
 0x244   :  { %3769 = vmatpush1.bf16.msra.mxu0 %v10168_v31  ;;  %v10254_v31 = vld [vmem:[#allocation7 + $0x964] ss:$8 sps:$4 sm:$0xff]  }
 0x245   :  { %3770 = vmatprep.subr.bf16.mxu0 %v10173_v32  ;;  %v10252_v32 = vld [vmem:[#allocation7 + $0x960] ss:$8 sps:$4 sm:$0xff]  }
 0x248   :  { %3771 = vmatpush1.bf16.msra.mxu0 %v10171_v33  ;;  %v10257_v33 = vld [vmem:[#allocation7 + $0x974] ss:$8 sps:$4 sm:$0xff]  }
 0x249   :  { %3772 = vmatprep.subr.bf16.mxu0 %v10176_v34  ;;  %v10255_v34 = vld [vmem:[#allocation7 + $0x970] ss:$8 sps:$4 sm:$0xff]  }
 0x24c   :  { %3773 = vmatpush1.bf16.msra.mxu0 %v10174_v35  ;;  %v10260_v35 = vld [vmem:[#allocation7 + $0x984] ss:$8 sps:$4 sm:$0xff]  }
 0x24d   :  { %3774 = vmatprep.subr.bf16.mxu0 %v10179_v36  ;;  %v10258_v36 = vld [vmem:[#allocation7 + $0x980] ss:$8 sps:$4 sm:$0xff]  }
 0x250   :  { %3775 = vmatpush1.bf16.msra.mxu0 %v10177_v37  ;;  %v10263_v37 = vld [vmem:[#allocation7 + $0x994] ss:$8 sps:$4 sm:$0xff]  }
 0x251   :  { %3776 = vmatprep.subr.bf16.mxu0 %v10182_v20  ;;  %v10261_v20 = vld [vmem:[#allocation7 + $0x990] ss:$8 sps:$4 sm:$0xff]  }
 0x254   :  { %3777 = vmatpush1.bf16.msra.mxu0 %v10180_v39  ;;  %v10266_v39 = vld [vmem:[#allocation7 + $0x9a4] ss:$8 sps:$4 sm:$0xff]  }
 0x255   :  { %3778 = vmatprep.subr.bf16.mxu0 %v10185_v41  ;;  %v10269_v41 = vld [vmem:[#allocation7 + $0x9b4] ss:$8 sps:$4 sm:$0xff]  }
 0x258   :  { %3779 = vmatpush1.bf16.msra.mxu0 %v10183_v42  ;;  %v10267_v42 = vld [vmem:[#allocation7 + $0x9b0] ss:$8 sps:$4 sm:$0xff]  }
 0x259   :  { %3789 = vmatprep.subr.bf16.mxu0 %v10188_v44  ;;  %v10270_v44 = vld [vmem:[#allocation7 + $0x9c0] ss:$8 sps:$4 sm:$0xff]  }
 0x25b   :  { %3781 = vmatmul.mubr.bf16.vlgmr.msra.gmra.mrb[0].mxu0 %v768_v45  ;;  %v10275_v45 = vld [vmem:[#allocation7 + $0x9d4] ss:$8 sps:$4 sm:$0xff]  }
 0x25c   :  { %3790 = vmatpush1.bf16.msra.mxu0 %v10186_v46  ;;  %3821 = vmatprep.mubr.bf16.mxu0 %v11055_v47  ;;  %v10273_v46 = vld [vmem:[#allocation7 + $0x9d0] ss:$8 sps:$4 sm:$0xff]   ;;  %v771_v47 = vcombine.high %v11044_v38, %v11044_v38  ;;  %v10282_v38 = vld [vmem:[#allocation7 + $0xa00] ss:$8 sps:$4 sm:$0xff]  }
 0x25d   :  { %3791 = vmatprep.subr.bf16.mxu0 %v10191_v48  ;;  %v10278_v48 = vld [vmem:[#allocation7 + $0x9e4] ss:$8 sps:$4 sm:$0xff]  }
 0x260   :  { %3792 = vmatpush1.bf16.msra.mxu0 %v10189_v49  ;;  %v10276_v49 = vld [vmem:[#allocation7 + $0x9e0] ss:$8 sps:$4 sm:$0xff]  }
 0x261   :  { %3793 = vmatprep.subr.bf16.mxu0 %v10194_v50  ;;  %v11068_v50 = vrot.slane %v771_v47, %v10963_v16  ;;  %v10358_v47 = vld [vmem:[#allocation7 + $0xb90] ss:$8 sps:$4 sm:$0xff]  }
 0x264   :  { %3794 = vmatpush1.bf16.msra.mxu0 %v10192_v51  ;;  %v10281_v51 = vld [vmem:[#allocation7 + $0x9f4] ss:$8 sps:$4 sm:$0xff]  }
 0x265   :  { %3795 = vmatprep.subr.bf16.mxu0 %v10197_v52  ;;  %v10279_v52 = vld [vmem:[#allocation7 + $0x9f0] ss:$8 sps:$4 sm:$0xff]  }
 0x268   :  { %3796 = vmatpush1.bf16.msra.mxu0 %v10195_v53  ;;  %v787_v53 = vcombine.high %v11068_v50, %v11068_v50 }
 0x269   :  { %3797 = vmatprep.subr.bf16.mxu0 %v10200_v54  ;;  %v10284_v54 = vld [vmem:[#allocation7 + $0xa04] ss:$8 sps:$4 sm:$0xff]  }
 0x26c   :  { %3798 = vmatpush1.bf16.msra.mxu0 %v10198_v55  ;;  %v816_v55 = vcombine.high %v11060_v17, %v11060_v17 }
 0x26d   :  { %3799 = vmatprep.subr.bf16.mxu0 %v10203_v56  ;;  %v11075_v56 = vrot.slane %v787_v53, %v10963_v16  ;;  %v10367_v53 = vld [vmem:[#allocation7 + $0xbc0] ss:$8 sps:$4 sm:$0xff]  }
 0x270   :  { %3800 = vmatpush1.bf16.msra.mxu0 %v10201_v57  ;;  %v10287_v57 = vld [vmem:[#allocation7 + $0xa14] ss:$8 sps:$4 sm:$0xff]  }
 0x271   :  { %3801 = vmatprep.subr.bf16.mxu0 %v10206_v58  ;;  %v10285_v58 = vld [vmem:[#allocation7 + $0xa10] ss:$8 sps:$4 sm:$0xff]  }
 0x274   :  { %3802 = vmatpush1.bf16.msra.mxu0 %v10204_v59  ;;  %v10290_v59 = vld [vmem:[#allocation7 + $0xa24] ss:$8 sps:$4 sm:$0xff]  }
 0x275   :  { %3803 = vmatprep.subr.bf16.mxu0 %v10209_v60  ;;  %v10288_v60 = vld [vmem:[#allocation7 + $0xa20] ss:$8 sps:$4 sm:$0xff]  }
 0x278   :  { %3804 = vmatpush1.bf16.msra.mxu0 %v10207_v61  ;;  %v10293_v61 = vld [vmem:[#allocation7 + $0xa34] ss:$8 sps:$4 sm:$0xff]  }
 0x279   :  { %3805 = vmatprep.subr.bf16.mxu0 %v10212_v62  ;;  %v10291_v62 = vld [vmem:[#allocation7 + $0xa30] ss:$8 sps:$4 sm:$0xff]  }
 0x27c   :  { %3806 = vmatpush1.bf16.msra.mxu0 %v10210_v63  ;;  %v10296_v63 = vld [vmem:[#allocation7 + $0xa44] ss:$8 sps:$4 sm:$0xff]  }
 0x27d   :  { %3807 = vmatprep.subr.bf16.mxu0 %v10215_v0  ;;  %v10294_v0 = vld [vmem:[#allocation7 + $0xa40] ss:$8 sps:$4 sm:$0xff]  }
 0x280   :  { %3808 = vmatpush1.bf16.msra.mxu0 %v10213_v1  ;;  %v10299_v1 = vld [vmem:[#allocation7 + $0xa54] ss:$8 sps:$4 sm:$0xff]  }
 0x281   :  { %3809 = vmatprep.subr.bf16.mxu0 %v10218_v2  ;;  %v10297_v2 = vld [vmem:[#allocation7 + $0xa50] ss:$8 sps:$4 sm:$0xff]  }
 0x284   :  { %3810 = vmatpush1.bf16.msra.mxu0 %v10216_v3  ;;  %v10302_v3 = vld [vmem:[#allocation7 + $0xa64] ss:$8 sps:$4 sm:$0xff]  }
 0x285   :  { %3811 = vmatprep.subr.bf16.mxu0 %v10221_v4  ;;  %v10300_v4 = vld [vmem:[#allocation7 + $0xa60] ss:$8 sps:$4 sm:$0xff]  }
 0x288   :  { %3812 = vmatpush1.bf16.msra.mxu0 %v10219_v5  ;;  %v10305_v5 = vld [vmem:[#allocation7 + $0xa74] ss:$8 sps:$4 sm:$0xff]  }
 0x289   :  { %3813 = vmatprep.subr.bf16.mxu0 %v10224_v6  ;;  %v10303_v6 = vld [vmem:[#allocation7 + $0xa70] ss:$8 sps:$4 sm:$0xff]  }
 0x28c   :  { %3814 = vmatpush1.bf16.msra.mxu0 %v10222_v7  ;;  %v10308_v7 = vld [vmem:[#allocation7 + $0xa84] ss:$8 sps:$4 sm:$0xff]  }
 0x28d   :  { %3815 = vmatprep.subr.bf16.mxu0 %v10227_v8  ;;  %v10306_v8 = vld [vmem:[#allocation7 + $0xa80] ss:$8 sps:$4 sm:$0xff]  }
 0x290   :  { %3816 = vmatpush1.bf16.msra.mxu0 %v10225_v9  ;;  %v10311_v9 = vld [vmem:[#allocation7 + $0xa94] ss:$8 sps:$4 sm:$0xff]  }
 0x291   :  { %3817 = vmatprep.subr.bf16.mxu0 %v10230_v10  ;;  %v10309_v10 = vld [vmem:[#allocation7 + $0xa90] ss:$8 sps:$4 sm:$0xff]  }
 0x294   :  { %3818 = vmatpush1.bf16.msra.mxu0 %v10228_v11  ;;  %v10314_v11 = vld [vmem:[#allocation7 + $0xaa4] ss:$8 sps:$4 sm:$0xff]  }
 0x295   :  { %3819 = vmatprep.subr.bf16.mxu0 %v10233_v13  ;;  %v10312_v13 = vld [vmem:[#allocation7 + $0xaa0] ss:$8 sps:$4 sm:$0xff]  }
 0x298   :  { %3820 = vmatpush1.bf16.msra.mxu0 %v10231_v14  ;;  %v10317_v14 = vld [vmem:[#allocation7 + $0xab4] ss:$8 sps:$4 sm:$0xff]  }
 0x299   :  { %3830 = vmatprep.subr.bf16.mxu0 %v10236_v15  ;;  %v10315_v15 = vld [vmem:[#allocation7 + $0xab0] ss:$8 sps:$4 sm:$0xff]  }
 0x29b   :  { %3822 = vmatmul.mubr.bf16.vlgmr.msra.gmra.mrb[0].mxu0 %v11060_v17  ;;  %v10320_v17 = vld [vmem:[#allocation7 + $0xac4] ss:$8 sps:$4 sm:$0xff]  }
 0x29c   :  { %3831 = vmatpush1.bf16.msra.mxu0 %v10234_v18  ;;  %3862 = vmatprep.mubr.bf16.mxu0 %v818_v19  ;;  %v10318_v18 = vld [vmem:[#allocation7 + $0xac0] ss:$8 sps:$4 sm:$0xff]   ;;  %v10323_v19 = vld [vmem:[#allocation7 + $0xad4] ss:$8 sps:$4 sm:$0xff]  }
 0x29d   :  { %3832 = vmatprep.subr.bf16.mxu0 %v10239_v21  ;;  %v10321_v21 = vld [vmem:[#allocation7 + $0xad0] ss:$8 sps:$4 sm:$0xff]  }
 0x2a0   :  { %3833 = vmatpush1.bf16.msra.mxu0 %v10237_v22  ;;  %v10326_v22 = vld [vmem:[#allocation7 + $0xae4] ss:$8 sps:$4 sm:$0xff]  }
 0x2a1   :  { %3834 = vmatprep.subr.bf16.mxu0 %v10242_v23  ;;  %v10324_v23 = vld [vmem:[#allocation7 + $0xae0] ss:$8 sps:$4 sm:$0xff]  }
 0x2a4   :  { %3835 = vmatpush1.bf16.msra.mxu0 %v10240_v24  ;;  %v10329_v24 = vld [vmem:[#allocation7 + $0xaf4] ss:$8 sps:$4 sm:$0xff]  }
 0x2a5   :  { %3836 = vmatprep.subr.bf16.mxu0 %v10245_v25  ;;  %v10327_v25 = vld [vmem:[#allocation7 + $0xaf0] ss:$8 sps:$4 sm:$0xff]  }
 0x2a8   :  { %3837 = vmatpush1.bf16.msra.mxu0 %v10243_v26  ;;  %v10333_v26 = vld [vmem:[#allocation7 + $0xb04] ss:$8 sps:$4 sm:$0xff]  }
 0x2a9   :  { %3838 = vmatprep.subr.bf16.mxu0 %v10248_v27  ;;  %v11080_v27 = vrot.slane %v11068_v50, %v10963_v16  ;;  %v10366_v50 = vld [vmem:[#allocation7 + $0xbb4] ss:$8 sps:$4 sm:$0xff]  }
 0x2ac   :  { %3839 = vmatpush1.bf16.msra.mxu0 %v10246_v28  ;;  %v10331_v28 = vld [vmem:[#allocation7 + $0xb00] ss:$8 sps:$4 sm:$0xff]  }
 0x2ad   :  { %3840 = vmatprep.subr.bf16.mxu0 %v10251_v29  ;;  %v819_v29 = vcombine.high %v11075_v56, %v11075_v56 }
 0x2b0   :  { %3841 = vmatpush1.bf16.msra.mxu0 %v10249_v30  ;;  %v10336_v30 = vld [vmem:[#allocation7 + $0xb14] ss:$8 sps:$4 sm:$0xff]  }
 0x2b1   :  { %3842 = vmatprep.subr.bf16.mxu0 %v10254_v31  ;;  %v10334_v31 = vld [vmem:[#allocation7 + $0xb10] ss:$8 sps:$4 sm:$0xff]  }
 0x2b4   :  { %3843 = vmatpush1.bf16.msra.mxu0 %v10252_v32  ;;  %v10339_v32 = vld [vmem:[#allocation7 + $0xb24] ss:$8 sps:$4 sm:$0xff]  }
 0x2b5   :  { %3844 = vmatprep.subr.bf16.mxu0 %v10257_v33  ;;  %v10337_v33 = vld [vmem:[#allocation7 + $0xb20] ss:$8 sps:$4 sm:$0xff]  }
 0x2b8   :  { %3845 = vmatpush1.bf16.msra.mxu0 %v10255_v34  ;;  %v10342_v34 = vld [vmem:[#allocation7 + $0xb34] ss:$8 sps:$4 sm:$0xff]  }
 0x2b9   :  { %3846 = vmatprep.subr.bf16.mxu0 %v10260_v35  ;;  %v10340_v35 = vld [vmem:[#allocation7 + $0xb30] ss:$8 sps:$4 sm:$0xff]  }
 0x2bc   :  { %3847 = vmatpush1.bf16.msra.mxu0 %v10258_v36  ;;  %v10345_v36 = vld [vmem:[#allocation7 + $0xb44] ss:$8 sps:$4 sm:$0xff]  }
 0x2bd   :  { %3848 = vmatprep.subr.bf16.mxu0 %v10263_v37  ;;  %v10343_v37 = vld [vmem:[#allocation7 + $0xb40] ss:$8 sps:$4 sm:$0xff]  }
 0x2c0   :  { %3849 = vmatpush1.bf16.msra.mxu0 %v10261_v20  ;;  %v10348_v20 = vld [vmem:[#allocation7 + $0xb54] ss:$8 sps:$4 sm:$0xff]  }
 0x2c1   :  { %3850 = vmatprep.subr.bf16.mxu0 %v10266_v39  ;;  %v10346_v39 = vld [vmem:[#allocation7 + $0xb50] ss:$8 sps:$4 sm:$0xff]  }
 0x2c4   :  { %3851 = vmatpush1.bf16.msra.mxu0 %v10264_v40  ;;  %v10351_v40 = vld [vmem:[#allocation7 + $0xb64] ss:$8 sps:$4 sm:$0xff]  }
 0x2c5   :  { %3852 = vmatprep.subr.bf16.mxu0 %v10269_v41  ;;  %v10349_v41 = vld [vmem:[#allocation7 + $0xb60] ss:$8 sps:$4 sm:$0xff]  }
 0x2c8   :  { %3853 = vmatpush1.bf16.msra.mxu0 %v10267_v42  ;;  %v10354_v42 = vld [vmem:[#allocation7 + $0xb74] ss:$8 sps:$4 sm:$0xff]  }
 0x2c9   :  { %3854 = vmatprep.subr.bf16.mxu0 %v10272_v43  ;;  %v10352_v43 = vld [vmem:[#allocation7 + $0xb70] ss:$8 sps:$4 sm:$0xff]  }
 0x2cc   :  { %3855 = vmatpush1.bf16.msra.mxu0 %v10270_v44  ;;  %v10357_v44 = vld [vmem:[#allocation7 + $0xb84] ss:$8 sps:$4 sm:$0xff]  }
 0x2cd   :  { %3856 = vmatprep.subr.bf16.mxu0 %v10275_v45  ;;  %v10355_v45 = vld [vmem:[#allocation7 + $0xb80] ss:$8 sps:$4 sm:$0xff]  }
 0x2d0   :  { %3857 = vmatpush1.bf16.msra.mxu0 %v10273_v46  ;;  %v10360_v46 = vld [vmem:[#allocation7 + $0xb94] ss:$8 sps:$4 sm:$0xff]  }
 0x2d1   :  { %3858 = vmatprep.subr.bf16.mxu0 %v10278_v48  ;;  %v10363_v48 = vld [vmem:[#allocation7 + $0xba4] ss:$8 sps:$4 sm:$0xff]  }
 0x2d4   :  { %3859 = vmatpush1.bf16.msra.mxu0 %v10276_v49  ;;  %v10361_v49 = vld [vmem:[#allocation7 + $0xba0] ss:$8 sps:$4 sm:$0xff]  }
 0x2d5   :  { %3860 = vmatprep.subr.bf16.mxu0 %v10281_v51  ;;  %v10364_v51 = vld [vmem:[#allocation7 + $0xbb0] ss:$8 sps:$4 sm:$0xff]  }
 0x2d8   :  { %3861 = vmatpush1.bf16.msra.mxu0 %v10279_v52  ;;  %v10369_v52 = vld [vmem:[#allocation7 + $0xbc4] ss:$8 sps:$4 sm:$0xff]  }
 0x2d9   :  { %3871 = vmatprep.subr.bf16.mxu0 %v10284_v54  ;;  %v10372_v54 = vld [vmem:[#allocation7 + $0xbd4] ss:$8 sps:$4 sm:$0xff]  }
 0x2db   :  { %3863 = vmatmul.mubr.bf16.vlgmr.msra.gmra.mrb[0].mxu0 %v816_v55  ;;  %v10370_v55 = vld [vmem:[#allocation7 + $0xbd0] ss:$8 sps:$4 sm:$0xff]  }
 0x2dc   :  { %3872 = vmatpush1.bf16.msra.mxu0 %v10282_v38  ;;  %3903 = vmatprep.mubr.bf16.mxu0 %v11075_v56  ;;  %v10375_v38 = vld [vmem:[#allocation7 + $0xbe4] ss:$8 sps:$4 sm:$0xff]  }
 0x2dd   :  { %3873 = vmatprep.subr.bf16.mxu0 %v10287_v57  ;;  %v11088_v56 = vld [vmem:[%s11355_s0 + $0x18] sm:$0xff] }
 0x2de   :  { %v10373_v57 = vld [vmem:[#allocation7 + $0xbe0] ss:$8 sps:$4 sm:$0xff]  }
 0x2e0   :  { %3874 = vmatpush1.bf16.msra.mxu0 %v10285_v58  ;;  %v11092_v58 = vrot.slane %v11088_v56, %v10963_v16 }
 0x2e1   :  { %3875 = vmatprep.subr.bf16.mxu0 %v10290_v59  ;;  %v10378_v59 = vld [vmem:[#allocation7 + $0xbf4] ss:$8 sps:$4 sm:$0xff]  }
 0x2e4   :  { %3876 = vmatpush1.bf16.msra.mxu0 %v10288_v60  ;;  %v10376_v60 = vld [vmem:[#allocation7 + $0xbf0] ss:$8 sps:$4 sm:$0xff]  }
 0x2e5   :  { %3877 = vmatprep.subr.bf16.mxu0 %v10293_v61  ;;  %v835_v61 = vcombine.high %v11092_v58, %v11092_v58 }
 0x2e8   :  { %3878 = vmatpush1.bf16.msra.mxu0 %v10291_v62  ;;  %v10381_v62 = vld [vmem:[#allocation7 + $0xc04] ss:$8 sps:$4 sm:$0xff]  }
 0x2e9   :  { %3879 = vmatprep.subr.bf16.mxu0 %v10296_v63  ;;  %v817_v63 = vcombine.high %v11080_v27, %v11080_v27 }
 0x2ec   :  { %3880 = vmatpush1.bf16.msra.mxu0 %v10294_v0  ;;  %v10379_v0 = vld [vmem:[#allocation7 + $0xc00] ss:$8 sps:$4 sm:$0xff]  }
 0x2ed   :  { %3881 = vmatprep.subr.bf16.mxu0 %v10299_v1  ;;  %v11099_v1 = vrot.slane %v835_v61, %v10963_v16  ;;  %v10465_v61 = vld [vmem:[#allocation7 + $0xdc4] ss:$8 sps:$4 sm:$0xff]  }
 0x2f0   :  { %3882 = vmatpush1.bf16.msra.mxu0 %v10297_v2  ;;  %v10384_v2 = vld [vmem:[#allocation7 + $0xc14] ss:$8 sps:$4 sm:$0xff]  }
 0x2f1   :  { %3883 = vmatprep.subr.bf16.mxu0 %v10302_v3  ;;  %v10382_v3 = vld [vmem:[#allocation7 + $0xc10] ss:$8 sps:$4 sm:$0xff]  }
 0x2f4   :  { %3884 = vmatpush1.bf16.msra.mxu0 %v10300_v4  ;;  %v10387_v4 = vld [vmem:[#allocation7 + $0xc24] ss:$8 sps:$4 sm:$0xff]  }
 0x2f5   :  { %3885 = vmatprep.subr.bf16.mxu0 %v10305_v5  ;;  %v10385_v5 = vld [vmem:[#allocation7 + $0xc20] ss:$8 sps:$4 sm:$0xff]  }
 0x2f8   :  { %3886 = vmatpush1.bf16.msra.mxu0 %v10303_v6  ;;  %v10390_v6 = vld [vmem:[#allocation7 + $0xc34] ss:$8 sps:$4 sm:$0xff]  }
 0x2f9   :  { %3887 = vmatprep.subr.bf16.mxu0 %v10308_v7  ;;  %v10388_v7 = vld [vmem:[#allocation7 + $0xc30] ss:$8 sps:$4 sm:$0xff]  }
 0x2fc   :  { %3888 = vmatpush1.bf16.msra.mxu0 %v10306_v8  ;;  %v10393_v8 = vld [vmem:[#allocation7 + $0xc44] ss:$8 sps:$4 sm:$0xff]  }
 0x2fd   :  { %3889 = vmatprep.subr.bf16.mxu0 %v10311_v9  ;;  %v10391_v9 = vld [vmem:[#allocation7 + $0xc40] ss:$8 sps:$4 sm:$0xff]  }
 0x300   :  { %3890 = vmatpush1.bf16.msra.mxu0 %v10309_v10  ;;  %v10396_v10 = vld [vmem:[#allocation7 + $0xc54] ss:$8 sps:$4 sm:$0xff]  }
 0x301   :  { %3891 = vmatprep.subr.bf16.mxu0 %v10314_v11  ;;  %v10394_v11 = vld [vmem:[#allocation7 + $0xc50] ss:$8 sps:$4 sm:$0xff]  }
 0x304   :  { %3892 = vmatpush1.bf16.msra.mxu0 %v10312_v13  ;;  %v10399_v13 = vld [vmem:[#allocation7 + $0xc64] ss:$8 sps:$4 sm:$0xff]  }
 0x305   :  { %3893 = vmatprep.subr.bf16.mxu0 %v10317_v14  ;;  %v10397_v14 = vld [vmem:[#allocation7 + $0xc60] ss:$8 sps:$4 sm:$0xff]  }
 0x308   :  { %3894 = vmatpush1.bf16.msra.mxu0 %v10315_v15  ;;  %v10402_v15 = vld [vmem:[#allocation7 + $0xc74] ss:$8 sps:$4 sm:$0xff]  }
 0x309   :  { %3895 = vmatprep.subr.bf16.mxu0 %v10320_v17  ;;  %v10400_v17 = vld [vmem:[#allocation7 + $0xc70] ss:$8 sps:$4 sm:$0xff]  }
 0x30c   :  { %3896 = vmatpush1.bf16.msra.mxu0 %v10318_v18  ;;  %v10405_v18 = vld [vmem:[#allocation7 + $0xc84] ss:$8 sps:$4 sm:$0xff]  }
 0x30d   :  { %3897 = vmatprep.subr.bf16.mxu0 %v10323_v19  ;;  %v10403_v19 = vld [vmem:[#allocation7 + $0xc80] ss:$8 sps:$4 sm:$0xff]  }
 0x310   :  { %3898 = vmatpush1.bf16.msra.mxu0 %v10321_v21  ;;  %v10408_v21 = vld [vmem:[#allocation7 + $0xc94] ss:$8 sps:$4 sm:$0xff]  }
 0x311   :  { %3899 = vmatprep.subr.bf16.mxu0 %v10326_v22  ;;  %v10406_v22 = vld [vmem:[#allocation7 + $0xc90] ss:$8 sps:$4 sm:$0xff]  }
 0x314   :  { %3900 = vmatpush1.bf16.msra.mxu0 %v10324_v23  ;;  %v10411_v23 = vld [vmem:[#allocation7 + $0xca4] ss:$8 sps:$4 sm:$0xff]  }
 0x315   :  { %3901 = vmatprep.subr.bf16.mxu0 %v10329_v24  ;;  %v10409_v24 = vld [vmem:[#allocation7 + $0xca0] ss:$8 sps:$4 sm:$0xff]  }
 0x318   :  { %3902 = vmatpush1.bf16.msra.mxu0 %v10327_v25  ;;  %v10414_v25 = vld [vmem:[#allocation7 + $0xcb4] ss:$8 sps:$4 sm:$0xff]  }
 0x319   :  { %3912 = vmatprep.subr.bf16.mxu0 %v10333_v26  ;;  %v10412_v26 = vld [vmem:[#allocation7 + $0xcb0] ss:$8 sps:$4 sm:$0xff]  }
 0x31b   :  { %3904 = vmatmul.mubr.bf16.vlgmr.msra.gmra.mrb[0].mxu0 %v11080_v27  ;;  %v10417_v27 = vld [vmem:[#allocation7 + $0xcc4] ss:$8 sps:$4 sm:$0xff]  }
 0x31c   :  { %3913 = vmatpush1.bf16.msra.mxu0 %v10331_v28  ;;  %3944 = vmatprep.mubr.bf16.mxu0 %v819_v29  ;;  %v10415_v28 = vld [vmem:[#allocation7 + $0xcc0] ss:$8 sps:$4 sm:$0xff]   ;;  %v10420_v29 = vld [vmem:[#allocation7 + $0xcd4] ss:$8 sps:$4 sm:$0xff]  }
 0x31d   :  { %3914 = vmatprep.subr.bf16.mxu0 %v10336_v30  ;;  %v10418_v30 = vld [vmem:[#allocation7 + $0xcd0] ss:$8 sps:$4 sm:$0xff]  }
 0x320   :  { %3915 = vmatpush1.bf16.msra.mxu0 %v10334_v31  ;;  %v10423_v31 = vld [vmem:[#allocation7 + $0xce4] ss:$8 sps:$4 sm:$0xff]  }
 0x321   :  { %3916 = vmatprep.subr.bf16.mxu0 %v10339_v32  ;;  %v10421_v32 = vld [vmem:[#allocation7 + $0xce0] ss:$8 sps:$4 sm:$0xff]  }
 0x324   :  { %3917 = vmatpush1.bf16.msra.mxu0 %v10337_v33  ;;  %v10426_v33 = vld [vmem:[#allocation7 + $0xcf4] ss:$8 sps:$4 sm:$0xff]  }
 0x325   :  { %3918 = vmatprep.subr.bf16.mxu0 %v10342_v34  ;;  %v10424_v34 = vld [vmem:[#allocation7 + $0xcf0] ss:$8 sps:$4 sm:$0xff]  }
 0x328   :  { %3919 = vmatpush1.bf16.msra.mxu0 %v10340_v35  ;;  %v10429_v35 = vld [vmem:[#allocation7 + $0xd04] ss:$8 sps:$4 sm:$0xff]  }
 0x329   :  { %3920 = vmatprep.subr.bf16.mxu0 %v10345_v36  ;;  %v11104_v36 = vrot.slane %v11092_v58, %v10963_v16  ;;  %v10457_v58 = vld [vmem:[#allocation7 + $0xda0] ss:$8 sps:$4 sm:$0xff]  }
 0x32c   :  { %3921 = vmatpush1.bf16.msra.mxu0 %v10343_v37  ;;  %v10427_v37 = vld [vmem:[#allocation7 + $0xd00] ss:$8 sps:$4 sm:$0xff]  }
 0x32d   :  { %3922 = vmatprep.subr.bf16.mxu0 %v10348_v20  ;;  %v867_v20 = vcombine.high %v11099_v1, %v11099_v1 }
 0x330   :  { %3923 = vmatpush1.bf16.msra.mxu0 %v10346_v39  ;;  %v10432_v39 = vld [vmem:[#allocation7 + $0xd14] ss:$8 sps:$4 sm:$0xff]  }
 0x331   :  { %3924 = vmatprep.subr.bf16.mxu0 %v10351_v40  ;;  %v10430_v40 = vld [vmem:[#allocation7 + $0xd10] ss:$8 sps:$4 sm:$0xff]  }
 0x334   :  { %3925 = vmatpush1.bf16.msra.mxu0 %v10349_v41  ;;  %v10435_v41 = vld [vmem:[#allocation7 + $0xd24] ss:$8 sps:$4 sm:$0xff]  }
 0x335   :  { %3926 = vmatprep.subr.bf16.mxu0 %v10354_v42  ;;  %v10433_v42 = vld [vmem:[#allocation7 + $0xd20] ss:$8 sps:$4 sm:$0xff]  }
 0x338   :  { %3927 = vmatpush1.bf16.msra.mxu0 %v10352_v43  ;;  %v10438_v43 = vld [vmem:[#allocation7 + $0xd34] ss:$8 sps:$4 sm:$0xff]  }
 0x339   :  { %3928 = vmatprep.subr.bf16.mxu0 %v10357_v44  ;;  %v10436_v44 = vld [vmem:[#allocation7 + $0xd30] ss:$8 sps:$4 sm:$0xff]  }
 0x33c   :  { %3929 = vmatpush1.bf16.msra.mxu0 %v10355_v45  ;;  %v10441_v45 = vld [vmem:[#allocation7 + $0xd44] ss:$8 sps:$4 sm:$0xff]  }
 0x33d   :  { %3930 = vmatprep.subr.bf16.mxu0 %v10360_v46  ;;  %v10439_v46 = vld [vmem:[#allocation7 + $0xd40] ss:$8 sps:$4 sm:$0xff]  }
 0x340   :  { %3931 = vmatpush1.bf16.msra.mxu0 %v10358_v47  ;;  %v10444_v47 = vld [vmem:[#allocation7 + $0xd54] ss:$8 sps:$4 sm:$0xff]  }
 0x341   :  { %3932 = vmatprep.subr.bf16.mxu0 %v10363_v48  ;;  %v10442_v48 = vld [vmem:[#allocation7 + $0xd50] ss:$8 sps:$4 sm:$0xff]  }
 0x344   :  { %3933 = vmatpush1.bf16.msra.mxu0 %v10361_v49  ;;  %v10447_v49 = vld [vmem:[#allocation7 + $0xd64] ss:$8 sps:$4 sm:$0xff]  }
 0x345   :  { %3934 = vmatprep.subr.bf16.mxu0 %v10366_v50  ;;  %v10445_v50 = vld [vmem:[#allocation7 + $0xd60] ss:$8 sps:$4 sm:$0xff]  }
 0x348   :  { %3935 = vmatpush1.bf16.msra.mxu0 %v10364_v51  ;;  %v10450_v51 = vld [vmem:[#allocation7 + $0xd74] ss:$8 sps:$4 sm:$0xff]  }
 0x349   :  { %3936 = vmatprep.subr.bf16.mxu0 %v10369_v52  ;;  %v10448_v52 = vld [vmem:[#allocation7 + $0xd70] ss:$8 sps:$4 sm:$0xff]  }
 0x34c   :  { %3937 = vmatpush1.bf16.msra.mxu0 %v10367_v53  ;;  %v10453_v53 = vld [vmem:[#allocation7 + $0xd84] ss:$8 sps:$4 sm:$0xff]  }
 0x34d   :  { %3938 = vmatprep.subr.bf16.mxu0 %v10372_v54  ;;  %v10451_v54 = vld [vmem:[#allocation7 + $0xd80] ss:$8 sps:$4 sm:$0xff]  }
 0x350   :  { %3939 = vmatpush1.bf16.msra.mxu0 %v10370_v55  ;;  %v10456_v55 = vld [vmem:[#allocation7 + $0xd94] ss:$8 sps:$4 sm:$0xff]  }
 0x351   :  { %3940 = vmatprep.subr.bf16.mxu0 %v10375_v38  ;;  %v10454_v38 = vld [vmem:[#allocation7 + $0xd90] ss:$8 sps:$4 sm:$0xff]  }
 0x354   :  { %3941 = vmatpush1.bf16.msra.mxu0 %v10373_v57  ;;  %v10459_v57 = vld [vmem:[#allocation7 + $0xda4] ss:$8 sps:$4 sm:$0xff]  }
 0x355   :  { %3942 = vmatprep.subr.bf16.mxu0 %v10378_v59  ;;  %v10462_v59 = vld [vmem:[#allocation7 + $0xdb4] ss:$8 sps:$4 sm:$0xff]  }
 0x358   :  { %3943 = vmatpush1.bf16.msra.mxu0 %v10376_v60  ;;  %v10460_v60 = vld [vmem:[#allocation7 + $0xdb0] ss:$8 sps:$4 sm:$0xff]  }
 0x359   :  { %3953 = vmatprep.subr.bf16.mxu0 %v10381_v62  ;;  %v10463_v62 = vld [vmem:[#allocation7 + $0xdc0] ss:$8 sps:$4 sm:$0xff]  }
 0x35b   :  { %3945 = vmatmul.mubr.bf16.vlgmr.msra.gmra.mrb[0].mxu0 %v817_v63  ;;  %v10468_v63 = vld [vmem:[#allocation7 + $0xdd4] ss:$8 sps:$4 sm:$0xff]  }
 0x35c   :  { %3954 = vmatpush1.bf16.msra.mxu0 %v10379_v0  ;;  %3985 = vmatprep.mubr.bf16.mxu0 %v11099_v1  ;;  %v10466_v0 = vld [vmem:[#allocation7 + $0xdd0] ss:$8 sps:$4 sm:$0xff]   ;;  %v820_v1 = vcombine.high %v11088_v56, %v11088_v56  ;;  %v10475_v56 = vld [vmem:[#allocation7 + $0xe00] ss:$8 sps:$4 sm:$0xff]  }
 0x35d   :  { %3955 = vmatprep.subr.bf16.mxu0 %v10384_v2  ;;  %v10471_v2 = vld [vmem:[#allocation7 + $0xde4] ss:$8 sps:$4 sm:$0xff]  }
 0x360   :  { %3956 = vmatpush1.bf16.msra.mxu0 %v10382_v3  ;;  %v10469_v3 = vld [vmem:[#allocation7 + $0xde0] ss:$8 sps:$4 sm:$0xff]  }
 0x361   :  { %3957 = vmatprep.subr.bf16.mxu0 %v10387_v4  ;;  %v11112_v4 = vrot.slane %v820_v1, %v10963_v16  ;;  %v10556_v1 = vld [vmem:[#allocation7 + $0xfa4] ss:$8 sps:$4 sm:$0xff]  }
 0x364   :  { %3958 = vmatpush1.bf16.msra.mxu0 %v10385_v5  ;;  %v10474_v5 = vld [vmem:[#allocation7 + $0xdf4] ss:$8 sps:$4 sm:$0xff]  }
 0x365   :  { %3959 = vmatprep.subr.bf16.mxu0 %v10390_v6  ;;  %v10472_v6 = vld [vmem:[#allocation7 + $0xdf0] ss:$8 sps:$4 sm:$0xff]  }
 0x368   :  { %3960 = vmatpush1.bf16.msra.mxu0 %v10388_v7  ;;  %v836_v7 = vcombine.high %v11112_v4, %v11112_v4 }
 0x369   :  { %3961 = vmatprep.subr.bf16.mxu0 %v10393_v8  ;;  %v10477_v8 = vld [vmem:[#allocation7 + $0xe04] ss:$8 sps:$4 sm:$0xff]  }
 0x36c   :  { %3962 = vmatpush1.bf16.msra.mxu0 %v10391_v9  ;;  %v865_v9 = vcombine.high %v11104_v36, %v11104_v36 }
 0x36d   :  { %3963 = vmatprep.subr.bf16.mxu0 %v10396_v10  ;;  %v11119_v10 = vrot.slane %v836_v7, %v10963_v16  ;;  %v10565_v7 = vld [vmem:[#allocation7 + $0xfd4] ss:$8 sps:$4 sm:$0xff]  }
 0x370   :  { %3964 = vmatpush1.bf16.msra.mxu0 %v10394_v11  ;;  %v10480_v11 = vld [vmem:[#allocation7 + $0xe14] ss:$8 sps:$4 sm:$0xff]  }
 0x371   :  { %3965 = vmatprep.subr.bf16.mxu0 %v10399_v13  ;;  %v10478_v13 = vld [vmem:[#allocation7 + $0xe10] ss:$8 sps:$4 sm:$0xff]  }
 0x374   :  { %3966 = vmatpush1.bf16.msra.mxu0 %v10397_v14  ;;  %v10483_v14 = vld [vmem:[#allocation7 + $0xe24] ss:$8 sps:$4 sm:$0xff]  }
 0x375   :  { %3967 = vmatprep.subr.bf16.mxu0 %v10402_v15  ;;  %v10481_v15 = vld [vmem:[#allocation7 + $0xe20] ss:$8 sps:$4 sm:$0xff]  }
 0x378   :  { %3968 = vmatpush1.bf16.msra.mxu0 %v10400_v17  ;;  %v10486_v17 = vld [vmem:[#allocation7 + $0xe34] ss:$8 sps:$4 sm:$0xff]  }
 0x379   :  { %3969 = vmatprep.subr.bf16.mxu0 %v10405_v18  ;;  %v10484_v18 = vld [vmem:[#allocation7 + $0xe30] ss:$8 sps:$4 sm:$0xff]  }
 0x37c   :  { %3970 = vmatpush1.bf16.msra.mxu0 %v10403_v19  ;;  %v10489_v19 = vld [vmem:[#allocation7 + $0xe44] ss:$8 sps:$4 sm:$0xff]  }
 0x37d   :  { %3971 = vmatprep.subr.bf16.mxu0 %v10408_v21  ;;  %v10487_v21 = vld [vmem:[#allocation7 + $0xe40] ss:$8 sps:$4 sm:$0xff]  }
 0x380   :  { %3972 = vmatpush1.bf16.msra.mxu0 %v10406_v22  ;;  %v10492_v22 = vld [vmem:[#allocation7 + $0xe54] ss:$8 sps:$4 sm:$0xff]  }
 0x381   :  { %3973 = vmatprep.subr.bf16.mxu0 %v10411_v23  ;;  %v10490_v23 = vld [vmem:[#allocation7 + $0xe50] ss:$8 sps:$4 sm:$0xff]  }
 0x384   :  { %3974 = vmatpush1.bf16.msra.mxu0 %v10409_v24  ;;  %v10495_v24 = vld [vmem:[#allocation7 + $0xe64] ss:$8 sps:$4 sm:$0xff]  }
 0x385   :  { %3975 = vmatprep.subr.bf16.mxu0 %v10414_v25  ;;  %v10493_v25 = vld [vmem:[#allocation7 + $0xe60] ss:$8 sps:$4 sm:$0xff]  }
 0x388   :  { %3976 = vmatpush1.bf16.msra.mxu0 %v10412_v26  ;;  %v10498_v26 = vld [vmem:[#allocation7 + $0xe74] ss:$8 sps:$4 sm:$0xff]  }
 0x389   :  { %3977 = vmatprep.subr.bf16.mxu0 %v10417_v27  ;;  %v10496_v27 = vld [vmem:[#allocation7 + $0xe70] ss:$8 sps:$4 sm:$0xff]  }
 0x38c   :  { %3978 = vmatpush1.bf16.msra.mxu0 %v10415_v28  ;;  %v10501_v28 = vld [vmem:[#allocation7 + $0xe84] ss:$8 sps:$4 sm:$0xff]  }
 0x38d   :  { %3979 = vmatprep.subr.bf16.mxu0 %v10420_v29  ;;  %v10499_v29 = vld [vmem:[#allocation7 + $0xe80] ss:$8 sps:$4 sm:$0xff]  }
 0x390   :  { %3980 = vmatpush1.bf16.msra.mxu0 %v10418_v30  ;;  %v10504_v30 = vld [vmem:[#allocation7 + $0xe94] ss:$8 sps:$4 sm:$0xff]  }
 0x391   :  { %3981 = vmatprep.subr.bf16.mxu0 %v10423_v31  ;;  %v10502_v31 = vld [vmem:[#allocation7 + $0xe90] ss:$8 sps:$4 sm:$0xff]  }
 0x394   :  { %3982 = vmatpush1.bf16.msra.mxu0 %v10421_v32  ;;  %v10507_v32 = vld [vmem:[#allocation7 + $0xea4] ss:$8 sps:$4 sm:$0xff]  }
 0x395   :  { %3983 = vmatprep.subr.bf16.mxu0 %v10426_v33  ;;  %v10505_v33 = vld [vmem:[#allocation7 + $0xea0] ss:$8 sps:$4 sm:$0xff]  }
 0x398   :  { %3984 = vmatpush1.bf16.msra.mxu0 %v10424_v34  ;;  %v10510_v34 = vld [vmem:[#allocation7 + $0xeb4] ss:$8 sps:$4 sm:$0xff]  }
 0x399   :  { %3994 = vmatprep.subr.bf16.mxu0 %v10429_v35  ;;  %v10508_v35 = vld [vmem:[#allocation7 + $0xeb0] ss:$8 sps:$4 sm:$0xff]  }
 0x39b   :  { %3986 = vmatmul.mubr.bf16.vlgmr.msra.gmra.mrb[0].mxu0 %v11104_v36  ;;  %v10513_v36 = vld [vmem:[#allocation7 + $0xec4] ss:$8 sps:$4 sm:$0xff]  }
 0x39c   :  { %3995 = vmatpush1.bf16.msra.mxu0 %v10427_v37  ;;  %4026 = vmatprep.mubr.bf16.mxu0 %v867_v20  ;;  %v10511_v37 = vld [vmem:[#allocation7 + $0xec0] ss:$8 sps:$4 sm:$0xff]   ;;  %v10516_v20 = vld [vmem:[#allocation7 + $0xed4] ss:$8 sps:$4 sm:$0xff]  }
 0x39d   :  { %3996 = vmatprep.subr.bf16.mxu0 %v10432_v39  ;;  %v10514_v39 = vld [vmem:[#allocation7 + $0xed0] ss:$8 sps:$4 sm:$0xff]  }
 0x3a0   :  { %3997 = vmatpush1.bf16.msra.mxu0 %v10430_v40  ;;  %v10519_v40 = vld [vmem:[#allocation7 + $0xee4] ss:$8 sps:$4 sm:$0xff]  }
 0x3a1   :  { %3998 = vmatprep.subr.bf16.mxu0 %v10435_v41  ;;  %v10517_v41 = vld [vmem:[#allocation7 + $0xee0] ss:$8 sps:$4 sm:$0xff]  }
 0x3a4   :  { %3999 = vmatpush1.bf16.msra.mxu0 %v10433_v42  ;;  %v10522_v42 = vld [vmem:[#allocation7 + $0xef4] ss:$8 sps:$4 sm:$0xff]  }
 0x3a5   :  { %4000 = vmatprep.subr.bf16.mxu0 %v10438_v43  ;;  %v10520_v43 = vld [vmem:[#allocation7 + $0xef0] ss:$8 sps:$4 sm:$0xff]  }
 0x3a8   :  { %4001 = vmatpush1.bf16.msra.mxu0 %v10436_v44  ;;  %v10526_v44 = vld [vmem:[#allocation7 + $0xf04] ss:$8 sps:$4 sm:$0xff]  }
 0x3a9   :  { %4002 = vmatprep.subr.bf16.mxu0 %v10441_v45  ;;  %v11124_v45 = vrot.slane %v11112_v4, %v10963_v16  ;;  %v10533_v16 = vld [vmem:[#allocation7 + $0xf30] ss:$8 sps:$4 sm:$0xff]  }
 0x3aa   :  { %v10557_v4 = vld [vmem:[#allocation7 + $0xfb0] ss:$8 sps:$4 sm:$0xff]  }
 0x3ac   :  { %4003 = vmatpush1.bf16.msra.mxu0 %v10439_v46  ;;  %v10524_v46 = vld [vmem:[#allocation7 + $0xf00] ss:$8 sps:$4 sm:$0xff]  }
 0x3ad   :  { %4004 = vmatprep.subr.bf16.mxu0 %v10444_v47  ;;  %v868_v47 = vcombine.high %v11119_v10, %v11119_v10 }
 0x3b0   :  { %4005 = vmatpush1.bf16.msra.mxu0 %v10442_v48  ;;  %v10529_v48 = vld [vmem:[#allocation7 + $0xf14] ss:$8 sps:$4 sm:$0xff]  }
 0x3b1   :  { %4006 = vmatprep.subr.bf16.mxu0 %v10447_v49  ;;  %v10527_v49 = vld [vmem:[#allocation7 + $0xf10] ss:$8 sps:$4 sm:$0xff]  }
 0x3b4   :  { %4007 = vmatpush1.bf16.msra.mxu0 %v10445_v50  ;;  %v10532_v50 = vld [vmem:[#allocation7 + $0xf24] ss:$8 sps:$4 sm:$0xff]  }
 0x3b5   :  { %4008 = vmatprep.subr.bf16.mxu0 %v10450_v51  ;;  %v10530_v51 = vld [vmem:[#allocation7 + $0xf20] ss:$8 sps:$4 sm:$0xff]  }
 0x3b8   :  { %4009 = vmatpush1.bf16.msra.mxu0 %v10448_v52  ;;  %v10535_v52 = vld [vmem:[#allocation7 + $0xf34] ss:$8 sps:$4 sm:$0xff]  }
 0x3b9   :  { %4010 = vmatprep.subr.bf16.mxu0 %v10453_v53  ;;  %v10538_v53 = vld [vmem:[#allocation7 + $0xf44] ss:$8 sps:$4 sm:$0xff]  }
 0x3bc   :  { %4011 = vmatpush1.bf16.msra.mxu0 %v10451_v54  ;;  %v10536_v54 = vld [vmem:[#allocation7 + $0xf40] ss:$8 sps:$4 sm:$0xff]  }
 0x3bd   :  { %4012 = vmatprep.subr.bf16.mxu0 %v10456_v55  ;;  %v10541_v55 = vld [vmem:[#allocation7 + $0xf54] ss:$8 sps:$4 sm:$0xff]  }
 0x3c0   :  { %4013 = vmatpush1.bf16.msra.mxu0 %v10454_v38  ;;  %v10539_v38 = vld [vmem:[#allocation7 + $0xf50] ss:$8 sps:$4 sm:$0xff]  }
 0x3c1   :  { %4014 = vmatprep.subr.bf16.mxu0 %v10459_v57  ;;  %v10544_v57 = vld [vmem:[#allocation7 + $0xf64] ss:$8 sps:$4 sm:$0xff]  }
 0x3c4   :  { %4015 = vmatpush1.bf16.msra.mxu0 %v10457_v58  ;;  %v10542_v58 = vld [vmem:[#allocation7 + $0xf60] ss:$8 sps:$4 sm:$0xff]  }
 0x3c5   :  { %4016 = vmatprep.subr.bf16.mxu0 %v10462_v59  ;;  %v10547_v59 = vld [vmem:[#allocation7 + $0xf74] ss:$8 sps:$4 sm:$0xff]  }
 0x3c8   :  { %4017 = vmatpush1.bf16.msra.mxu0 %v10460_v60  ;;  %v10545_v60 = vld [vmem:[#allocation7 + $0xf70] ss:$8 sps:$4 sm:$0xff]  }
 0x3c9   :  { %4018 = vmatprep.subr.bf16.mxu0 %v10465_v61  ;;  %v10550_v61 = vld [vmem:[#allocation7 + $0xf84] ss:$8 sps:$4 sm:$0xff]  }
 0x3cc   :  { %4019 = vmatpush1.bf16.msra.mxu0 %v10463_v62  ;;  %v10548_v62 = vld [vmem:[#allocation7 + $0xf80] ss:$8 sps:$4 sm:$0xff]  }
 0x3cd   :  { %4020 = vmatprep.subr.bf16.mxu0 %v10468_v63  ;;  %v10553_v63 = vld [vmem:[#allocation7 + $0xf94] ss:$8 sps:$4 sm:$0xff]  }
 0x3d0   :  { %4021 = vmatpush1.bf16.msra.mxu0 %v10466_v0  ;;  %v10551_v0 = vld [vmem:[#allocation7 + $0xf90] ss:$8 sps:$4 sm:$0xff]  }
 0x3d1   :  { %4022 = vmatprep.subr.bf16.mxu0 %v10471_v2  ;;  %v10554_v2 = vld [vmem:[#allocation7 + $0xfa0] ss:$8 sps:$4 sm:$0xff]  }
 0x3d4   :  { %4023 = vmatpush1.bf16.msra.mxu0 %v10469_v3  ;;  %v10559_v3 = vld [vmem:[#allocation7 + $0xfb4] ss:$8 sps:$4 sm:$0xff]  }
 0x3d5   :  { %4024 = vmatprep.subr.bf16.mxu0 %v10474_v5  ;;  %v10562_v5 = vld [vmem:[#allocation7 + $0xfc4] ss:$8 sps:$4 sm:$0xff]  }
 0x3d8   :  { %4025 = vmatpush1.bf16.msra.mxu0 %v10472_v6  ;;  %v10560_v6 = vld [vmem:[#allocation7 + $0xfc0] ss:$8 sps:$4 sm:$0xff]  }
 0x3d9   :  { %4035 = vmatprep.subr.bf16.mxu0 %v10477_v8  ;;  %v10563_v8 = vld [vmem:[#allocation7 + $0xfd0] ss:$8 sps:$4 sm:$0xff]  }
 0x3db   :  { %4027 = vmatmul.mubr.bf16.vlgmr.msra.gmra.mrb[0].mxu0 %v865_v9  ;;  %v10568_v9 = vld [vmem:[#allocation7 + $0xfe4] ss:$8 sps:$4 sm:$0xff]  }
 0x3dc   :  { %4036 = vmatpush1.bf16.msra.mxu0 %v10475_v56  ;;  %4067 = vmatprep.mubr.bf16.mxu0 %v11119_v10  ;;  %v10566_v56 = vld [vmem:[#allocation7 + $0xfe0] ss:$8 sps:$4 sm:$0xff]   ;;  %v10571_v10 = vld [vmem:[#allocation7 + $0xff4] ss:$8 sps:$4 sm:$0xff]  }
 0x3dd   :  { %4037 = vmatprep.subr.bf16.mxu0 %v10480_v11  ;;  %v110_v11 = vld [vmem:[#allocation5 + $0x110] sm:$0xff] }
 0x3e0   :  { %4038 = vmatpush1.bf16.msra.mxu0 %v10478_v13  ;;  %v111_v13 = vld [vmem:[#allocation5 + $0x120] sm:$0xff] }
 0x3e1   :  { %4039 = vmatprep.subr.bf16.mxu0 %v10483_v14  ;;  %v10569_v14 = vld [vmem:[#allocation7 + $0xff0] ss:$8 sps:$4 sm:$0xff]  }
 0x3e4   :  { %4040 = vmatpush1.bf16.msra.mxu0 %v10481_v15  ;;  %v9675_v15 = vpack.c.bf16 %v111_v13, %v110_v11  ;;  %v127_v11 = vld [vmem:[#allocation5 + $0x218] sm:$0xff]  ;;  %v129_v13 = vld [vmem:[#allocation5 + $0x228] sm:$0xff] }
 0x3e5   :  { %4041 = vmatprep.subr.bf16.mxu0 %v10486_v17  ;;  %v94_v17 = vld [vmem:[#allocation5 + $0x10] sm:$0xff] }
 0x3e8   :  { %4042 = vmatpush1.bf16.msra.mxu0 %v10484_v18  ;;  %v95_v18 = vld [vmem:[#allocation5 + $0x20] sm:$0xff] }
 0x3e9   :  { %4043 = vmatprep.subr.bf16.mxu0 %v10489_v19  ;;  %v112_v19 = vld [vmem:[#allocation5 + $0x130] sm:$0xff] }
 0x3ec   :  { %4044 = vmatpush1.bf16.msra.mxu0 %v10487_v21  ;;  %v113_v21 = vld [vmem:[#allocation5 + $0x140] sm:$0xff] }
 0x3ed   :  { %4045 = vmatprep.subr.bf16.mxu0 %v10492_v22  ;;  %v866_v22 = vcombine.high %v11124_v45, %v11124_v45 }
 0x3f0   :  { %4046 = vmatpush1.bf16.msra.mxu0 %v10490_v23  ;;  %v9677_v23 = vpack.c.bf16 %v95_v18, %v94_v17  ;;  %v128_v17 = vld [vmem:[#allocation5 + $0x220] sm:$0xff]  ;;  %v131_v18 = vld [vmem:[#allocation5 + $0x238] sm:$0xff] }
 0x3f1   :  { %4047 = vmatprep.subr.bf16.mxu0 %v10495_v24  ;;  %v9679_v24 = vpack.c.bf16 %v113_v21, %v112_v19  ;;  %v133_v19 = vld [vmem:[#allocation5 + $0x248] sm:$0xff] }
 0x3f4   :  { %4048 = vmatpush1.bf16.msra.mxu0 %v10493_v25  ;;  %v96_v25 = vld [vmem:[#allocation5 + $0x30] sm:$0xff] }
 0x3f5   :  { %4049 = vmatprep.subr.bf16.mxu0 %v10498_v26  ;;  %v97_v26 = vld [vmem:[#allocation5 + $0x40] sm:$0xff] }
 0x3f8   :  { %4050 = vmatpush1.bf16.msra.mxu0 %v10496_v27  ;;  %v114_v27 = vld [vmem:[#allocation5 + $0x150] sm:$0xff] }
 0x3f9   :  { %4051 = vmatprep.subr.bf16.mxu0 %v10501_v28  ;;  %v115_v28 = vld [vmem:[#allocation5 + $0x160] sm:$0xff] }
 0x3fc   :  { %4052 = vmatpush1.bf16.msra.mxu0 %v10499_v29  ;;  %v9681_v29 = vpack.c.bf16 %v97_v26, %v96_v25  ;;  %v135_v25 = vld [vmem:[#allocation5 + $0x258] sm:$0xff]  ;;  %v137_v26 = vld [vmem:[#allocation5 + $0x268] sm:$0xff] }
 0x3fd   :  { %4053 = vmatprep.subr.bf16.mxu0 %v10504_v30  ;;  %v9683_v30 = vpack.c.bf16 %v115_v28, %v114_v27  ;;  %v9715_v28 = vpack.c.bf16 %v137_v26, %v135_v25  ;;  %v4578_v25 = vld [vmem:[#allocation8 + $0x900] sm:$0xff] }
 0x3fe   :  { %v4594_v26 = vld [vmem:[#allocation8 + $0x980] sm:$0xff] }
 0x400   :  { %4054 = vmatpush1.bf16.msra.mxu0 %v10502_v31  ;;  %v98_v31 = vld [vmem:[#allocation5 + $0x50] sm:$0xff] }
 0x401   :  { %4055 = vmatprep.subr.bf16.mxu0 %v10507_v32  ;;  %v99_v32 = vld [vmem:[#allocation5 + $0x60] sm:$0xff] }
 0x404   :  { %4056 = vmatpush1.bf16.msra.mxu0 %v10505_v33  ;;  %v116_v33 = vld [vmem:[#allocation5 + $0x170] sm:$0xff] }
 0x405   :  { %4057 = vmatprep.subr.bf16.mxu0 %v10510_v34  ;;  %v117_v34 = vld [vmem:[#allocation5 + $0x180] sm:$0xff] }
 0x408   :  { %4058 = vmatpush1.bf16.msra.mxu0 %v10508_v35  ;;  %v9685_v35 = vpack.c.bf16 %v99_v32, %v98_v31 }
 0x409   :  { %4059 = vmatprep.subr.bf16.mxu0 %v10513_v36  ;;  %v9687_v36 = vpack.c.bf16 %v117_v34, %v116_v33  ;;  %v93_v33 = vld [vmem:[#allocation5 + $0x2] ss:$0 sm:$0xff] }
 0x40c   :  { %4060 = vmatpush1.bf16.msra.mxu0 %v10511_v37  ;;  %v100_v37 = vld [vmem:[#allocation5 + $0x70] sm:$0xff] }
 0x40d   :  { %4061 = vmatprep.subr.bf16.mxu0 %v10516_v20  ;;  %v101_v20 = vld [vmem:[#allocation5 + $0x80] sm:$0xff] }
 0x410   :  { %4062 = vmatpush1.bf16.msra.mxu0 %v10514_v39  ;;  %v118_v39 = vld [vmem:[#allocation5 + $0x190] sm:$0xff] }
 0x411   :  { %4063 = vmatprep.subr.bf16.mxu0 %v10519_v40  ;;  %v119_v40 = vld [vmem:[#allocation5 + $0x1a0] sm:$0xff] }
 0x414   :  { %4064 = vmatpush1.bf16.msra.mxu0 %v10517_v41  ;;  %v9689_v41 = vpack.c.bf16 %v101_v20, %v100_v37  ;;  %v139_v37 = vld [vmem:[#allocation5 + $0x278] sm:$0xff]  ;;  %v141_v20 = vld [vmem:[#allocation5 + $0x288] sm:$0xff] }
 0x415   :  { %4065 = vmatprep.subr.bf16.mxu0 %v10522_v42  ;;  %v9691_v42 = vpack.c.bf16 %v119_v40, %v118_v39  ;;  %v9719_v40 = vpack.c.bf16 %v141_v20, %v139_v37  ;;  %v4674_v37 = vld [vmem:[#allocation8 + $0xc00] sm:$0xff] }
 0x416   :  { %v4690_v20 = vld [vmem:[#allocation8 + $0xc80] sm:$0xff] }
 0x418   :  { %4066 = vmatpush1.bf16.msra.mxu0 %v10520_v43  ;;  %v102_v43 = vld [vmem:[#allocation5 + $0x90] sm:$0xff] }
 0x419   :  { %4076 = vmatprep.subr.bf16.mxu0 %v10526_v44  ;;  %v103_v44 = vld [vmem:[#allocation5 + $0xa0] sm:$0xff] }
 0x41b   :  { %4068 = vmatmul.mubr.bf16.vlgmr.msra.gmra.mrb[0].mxu0 %v11124_v45  ;;  %v120_v45 = vld [vmem:[#allocation5 + $0x1b0] sm:$0xff] }
 0x41c   :  { %4077 = vmatpush1.bf16.msra.mxu0 %v10524_v46  ;;  %4108 = vmatprep.mubr.bf16.mxu0 %v868_v47  ;;  %v121_v46 = vld [vmem:[#allocation5 + $0x1c0] sm:$0xff]  ;;  %v9693_v47 = vpack.c.bf16 %v103_v44, %v102_v43 }
 0x41d   :  { %4078 = vmatprep.subr.bf16.mxu0 %v10529_v48  ;;  %v9695_v48 = vpack.c.bf16 %v121_v46, %v120_v45  ;;  %v10853_v45 = vmov 0.0   ;;  %v4290_v46 = vld [vmem:[#allocation8] sm:$0xff] }
 0x41e   :  { %4279 = vmatprep.mubr.f32.mxu1 %v10853_v45 }
 0x420   :  { %4079 = vmatpush1.bf16.msra.mxu0 %v10527_v49  ;;  %v104_v49 = vld [vmem:[#allocation5 + $0xb0] sm:$0xff] }
 0x421   :  { %4080 = vmatprep.subr.bf16.mxu0 %v10532_v50  ;;  %v105_v50 = vld [vmem:[#allocation5 + $0xc0] sm:$0xff] }
 0x424   :  { %4081 = vmatpush1.bf16.msra.mxu0 %v10530_v51  ;;  %v122_v51 = vld [vmem:[#allocation5 + $0x1d0] sm:$0xff] }
 0x425   :  { %4082 = vmatprep.subr.bf16.mxu0 %v10535_v52  ;;  %v123_v52 = vld [vmem:[#allocation5 + $0x1e0] sm:$0xff] }
 0x428   :  { %4083 = vmatpush1.bf16.msra.mxu0 %v10533_v16  ;;  %v9697_v16 = vpack.c.bf16 %v105_v50, %v104_v49 }
 0x429   :  { %4084 = vmatprep.subr.bf16.mxu0 %v10538_v53  ;;  %v9699_v53 = vpack.c.bf16 %v123_v52, %v122_v51  ;;  %v4190_v51 = vld [vmem:[#allocation2] sm:$0x3] }
 0x42c   :  { %4085 = vmatpush1.bf16.msra.mxu0 %v10536_v54  ;;  %v106_v54 = vld [vmem:[#allocation5 + $0xd0] sm:$0xff] }
 0x42d   :  { %4086 = vmatprep.subr.bf16.mxu0 %v10541_v55  ;;  %v107_v55 = vld [vmem:[#allocation5 + $0xe0] sm:$0xff] }
 0x430   :  { %4087 = vmatpush1.bf16.msra.mxu0 %v10539_v38  ;;  %v9701_v38 = vpack.c.bf16 %v107_v55, %v106_v54 }
 0x431   :  { %4088 = vmatprep.subr.bf16.mxu0 %v10544_v57  ;;  %v124_v57 = vld [vmem:[#allocation5 + $0x1f0] sm:$0xff] }
 0x434   :  { %4089 = vmatpush1.bf16.msra.mxu0 %v10542_v58  ;;  %v125_v58 = vld [vmem:[#allocation5 + $0x200] sm:$0xff] }
 0x435   :  { %4090 = vmatprep.subr.bf16.mxu0 %v10547_v59  ;;  %v9703_v59 = vpack.c.bf16 %v125_v58, %v124_v57  ;;  %v4354_v57 = vld [vmem:[#allocation8 + $0x200] sm:$0xff] }
 0x436   :  { %v4370_v58 = vld [vmem:[#allocation8 + $0x280] sm:$0xff] }
 0x438   :  { %4091 = vmatpush1.bf16.msra.mxu0 %v10545_v60  ;;  %v108_v60 = vld [vmem:[#allocation5 + $0xf0] sm:$0xff] }
 0x439   :  { %4092 = vmatprep.subr.bf16.mxu0 %v10550_v61  ;;  %v109_v61 = vld [vmem:[#allocation5 + $0x100] sm:$0xff] }
 0x43c   :  { %4093 = vmatpush1.bf16.msra.mxu0 %v10548_v62  ;;  %v9705_v62 = vpack.c.bf16 %v109_v61, %v108_v60  ;;  %v9161_v60 = vcombine.high %v4354_v57, %v4370_v58  ;;  %v4386_v61 = vld [vmem:[#allocation8 + $0x300] sm:$0xff] }
 0x43d   :  { %4094 = vmatprep.subr.bf16.mxu0 %v10553_v63  ;;  %v11132_v63 = vsub.s32 0, %v10960_v12 }
 0x440   :  { %4095 = vmatpush1.bf16.msra.mxu0 %v10551_v0  ;;  %v90_v0 = vld [vmem:[#allocation5] ss:$8 sm:$0x3] }
 0x441   :  { %4096 = vmatprep.subr.bf16.mxu0 %v10556_v1  ;;  %v11135_v1 = vsub.s32 1, %v10960_v12 }
 0x444   :  { %4097 = vmatpush1.bf16.msra.mxu0 %v10554_v2  ;;  %v662_v2 = vrot.slane %v90_v0, %v11132_v63 }
 0x445   :  { %4098 = vmatprep.subr.bf16.mxu0 %v10559_v3  ;;  %v666_v3 = vrot.slane %v90_v0, %v11135_v1  ;;  %v9160_v0 = vcombine.low %v4354_v57, %v4370_v58  ;;  %v92_v57 = vld [vmem:[#allocation5 + $0x1] ss:$8 sm:$0x3] }
 0x446   :  { %v4204_v58 = vrot.slane %v92_v57, %v11132_v63 }
 0x448   :  { %4099 = vmatpush1.bf16.msra.mxu0 %v10557_v4 }
 0x449   :  { %4100 = vmatprep.subr.bf16.mxu0 %v10562_v5 }
 0x44c   :  { %4101 = vmatpush1.bf16.msra.mxu0 %v10560_v6 }
 0x44d   :  { %4102 = vmatprep.subr.bf16.mxu0 %v10565_v7 }
 0x450   :  { %4103 = vmatpush1.bf16.msra.mxu0 %v10563_v8 }
 0x451   :  { %4104 = vmatprep.subr.bf16.mxu0 %v10568_v9 }
 0x454   :  { %4105 = vmatpush1.bf16.msra.mxu0 %v10566_v56 }
 0x455   :  { %4106 = vmatprep.subr.bf16.mxu0 %v10571_v10 }
 0x458   :  { %4107 = vmatpush1.bf16.msra.mxu0 %v10569_v14  ;;  %v126_v14 = vld [vmem:[#allocation5 + $0x210] sm:$0xff] }
 0x459   :  { %9676 = vmatprep.subr.bf16.mxu0 %v9675_v15  ;;  %v9707_v15 = vpack.c.bf16 %v129_v13, %v127_v11  ;;  %v9709_v21 = vpack.c.bf16 %v128_v17, %v126_v14  ;;  %v4498_v11 = vld [vmem:[#allocation8 + $0x680] sm:$0xff] }
 0x45a   :  { %v4530_v17 = vld [vmem:[#allocation8 + $0x780] sm:$0xff] }
 0x45b   :  { %4109 = vmatmul.mubr.bf16.vlgmr.msra.gmra.mrb[0].mxu0 %v866_v22  ;;  %v9711_v22 = vpack.c.bf16 %v133_v19, %v131_v18  ;;  %9708 = vmatprep.subr.bf16.mxu1 %v9707_v15  ;;  %v4514_v15 = vld [vmem:[#allocation8 + $0x700] sm:$0xff] }
 0x45c   :  { %9678 = vmatpush3.bf16.msra.mxu0 %v9677_v23  ;;  %v130_v23 = vld [vmem:[#allocation5 + $0x230] sm:$0xff]  ;;  %9710 = vmatpush1.bf16.msra.mxu1 %v9709_v21  ;;  %v9321_v19 = vcombine.high %v4514_v15, %v4530_v17 }
 0x45d   :  { %9680 = vmatprep.subr.bf16.mxu0 %v9679_v24  ;;  %v132_v24 = vld [vmem:[#allocation5 + $0x240] sm:$0xff]  ;;  %9712 = vmatprep.subr.bf16.mxu1 %v9711_v22  ;;  %v4546_v21 = vld [vmem:[#allocation8 + $0x800] sm:$0xff] }
 0x45e   :  { %v9713_v27 = vpack.c.bf16 %v132_v24, %v130_v23  ;;  %v4562_v22 = vld [vmem:[#allocation8 + $0x880] sm:$0xff]  ;;  %v9320_v23 = vcombine.low %v4514_v15, %v4530_v17 }
 0x45f   :  { %v9353_v24 = vcombine.high %v4546_v21, %v4562_v22 }
 0x460   :  { %9682 = vmatpush3.bf16.msra.mxu0 %v9681_v29  ;;  %v134_v29 = vld [vmem:[#allocation5 + $0x250] sm:$0xff]  ;;  %9714 = vmatpush1.bf16.msra.mxu1 %v9713_v27  ;;  %v9352_v27 = vcombine.low %v4546_v21, %v4562_v22 }
 0x461   :  { %9684 = vmatprep.subr.bf16.mxu0 %v9683_v30  ;;  %v136_v30 = vld [vmem:[#allocation5 + $0x260] sm:$0xff]  ;;  %9716 = vmatprep.subr.bf16.mxu1 %v9715_v28  ;;  %v9385_v28 = vcombine.high %v4578_v25, %v4594_v26 }
 0x462   :  { %v9717_v31 = vpack.c.bf16 %v136_v30, %v134_v29  ;;  %v4610_v29 = vld [vmem:[#allocation8 + $0xa00] sm:$0xff] }
 0x463   :  { %v4626_v30 = vld [vmem:[#allocation8 + $0xa80] sm:$0xff] }
 0x464   :  { %9686 = vmatpush3.bf16.msra.mxu0 %v9685_v35  ;;  %9718 = vmatpush1.bf16.msra.mxu1 %v9717_v31  ;;  %v9384_v31 = vcombine.low %v4578_v25, %v4594_v26 }
 0x465   :  { %9688 = vmatprep.subr.bf16.mxu0 %v9687_v36  ;;  %9720 = vmatprep.subr.bf16.mxu1 %v9719_v40  ;;  %v9481_v40 = vcombine.high %v4674_v37, %v4690_v20 }
 0x468   :  { %9690 = vmatpush3.bf16.msra.mxu0 %v9689_v41  ;;  %v138_v41 = vld [vmem:[#allocation5 + $0x270] sm:$0xff] }
 0x469   :  { %9692 = vmatprep.subr.bf16.mxu0 %v9691_v42  ;;  %v140_v42 = vld [vmem:[#allocation5 + $0x280] sm:$0xff] }
 0x46a   :  { %v9721_v43 = vpack.c.bf16 %v140_v42, %v138_v41  ;;  %v4706_v41 = vld [vmem:[#allocation8 + $0xd00] sm:$0xff] }
 0x46b   :  { %v4722_v42 = vld [vmem:[#allocation8 + $0xd80] sm:$0xff] }
 0x46c   :  { %9694 = vmatpush3.bf16.msra.mxu0 %v9693_v47  ;;  %9722 = vmatpush1.bf16.msra.mxu1 %v9721_v43  ;;  %v4306_v47 = vld [vmem:[#allocation8 + $0x80] sm:$0xff]  ;;  %v9480_v43 = vcombine.low %v4674_v37, %v4690_v20  ;;  %v9512_v45 = vcombine.low %v4706_v41, %v4722_v42 }
 0x46d   :  { %9696 = vmatprep.subr.bf16.mxu0 %v9695_v48  ;;  %v9096_v48 = vcombine.low %v4290_v46, %v4306_v47  ;;  %v9097_v49 = vcombine.high %v4290_v46, %v4306_v47  ;;  %v4738_v46 = vld [vmem:[#allocation8 + $0xe00] sm:$0xff] }
 0x46e   :  { %v4754_v47 = vld [vmem:[#allocation8 + $0xe80] sm:$0xff] }
 0x46f   :  { %7530 = vmatprep.subr.bf16.mxu1 %v9097_v49  ;;  %v9544_v49 = vcombine.low %v4738_v46, %v4754_v47 }
 0x470   :  { %9698 = vmatpush3.bf16.msra.mxu0 %v9697_v16  ;;  %v4322_v16 = vld [vmem:[#allocation8 + $0x100] sm:$0xff] }
 0x471   :  { %9700 = vmatprep.subr.bf16.mxu0 %v9699_v53  ;;  %v4338_v53 = vld [vmem:[#allocation8 + $0x180] sm:$0xff] }
 0x474   :  { %9702 = vmatpush3.bf16.msra.mxu0 %v9701_v38  ;;  %v9129_v38 = vcombine.high %v4322_v16, %v4338_v53 }
 0x475   :  { %9704 = vmatprep.subr.bf16.mxu0 %v9703_v59  ;;  %v9128_v59 = vcombine.low %v4322_v16, %v4338_v53  ;;  %v4291_v53 = vld [vmem:[#allocation8 + $0x8] sm:$0xff] }
 0x478   :  { %9706 = vmatpush3.bf16.msra.mxu0 %v9705_v62  ;;  %v4402_v62 = vld [vmem:[#allocation8 + $0x380] sm:$0xff] }
 0x52e   :  { %v4110_v4 = vpop.f32.mrb[0].mxu0 }
 0x52f   :  { %v9723_v5 = vadd.f32 %v4110_v4, %v662_v2  ;;  %v4112_v6 = vpop.f32.mrb[1].mxu0  ;;  %v9193_v2 = vcombine.high %v4386_v61, %v4402_v62  ;;  %v4434_v4 = vld [vmem:[#allocation8 + $0x480] sm:$0xff] }
 0x530   :  { %v9724_v7 = vadd.f32 %v4112_v6, %v666_v3  ;;  %v4114_v8 = vpop.f32.mrb[2].mxu0  ;;  %v4418_v3 = vld [vmem:[#allocation8 + $0x400] sm:$0xff] }
 0x531   :  { %v4115_v9 = vpop.f32.mrb[3].mxu0  ;;  %v4117_v10 = vmax.f32 %v9723_v5, 0.0  ;;  %v9192_v5 = vcombine.low %v4386_v61, %v4402_v62  ;;  %v9225_v6 = vcombine.high %v4418_v3, %v4434_v4  ;;  %v4466_v8 = vld [vmem:[#allocation8 + $0x580] sm:$0xff] }
 0x532   :  { %v4118_v56 = vmax.f32 %v9724_v7, 0.0  ;;  %v4450_v7 = vld [vmem:[#allocation8 + $0x500] sm:$0xff]  ;;  %v9224_v9 = vcombine.low %v4418_v3, %v4434_v4  ;;  %v4323_v4 = vld [vmem:[#allocation8 + $0x108] sm:$0xff] }
 0x533   :  { %v9256_v13 = vcombine.low %v4450_v7, %v4466_v8 }
 0x534   :  { %4183 = vmatprep.mubr.f32.mxu0 %v4118_v56  ;;  %v9257_v56 = vcombine.high %v4450_v7, %v4466_v8 }
 0x535   :  { %4184 = vmatmul.mubr.f32.vlgmr.msra.gmra.mrb[4].mxu0 %v4117_v10  ;;  %v4482_v10 = vld [vmem:[#allocation8 + $0x600] sm:$0xff] }
 0x536   :  { %v9289_v14 = vcombine.high %v4482_v10, %v4498_v11  ;;  %v9288_v18 = vcombine.low %v4482_v10, %v4498_v11 }
 0x608   :  { %v9672_v32 = vpop.f32.mrb[4].mxu0 }
 0x609   :  { %v9673_v34 = vpop.f32.mrb[5].mxu0 }
 0x60a   :  { %v9674_v35 = vadd.f32 %v9673_v34, %v9672_v32  ;;  %v9417_v32 = vcombine.high %v4610_v29, %v4626_v30  ;;  %v4658_v34 = vld [vmem:[#allocation8 + $0xb80] sm:$0xff] }
 0x60c   :  { %v4186_v36 = vadd.f32 %v9674_v35, %v93_v33  ;;  %v4642_v33 = vld [vmem:[#allocation8 + $0xb00] sm:$0xff]  ;;  %v9416_v35 = vcombine.low %v4610_v29, %v4626_v30 }
 0x60e   :  { %4189 = vst [vmem:[%s11362_s7] sm:$0x3] %v4186_v36  ;;  %v4191_v39 = vmul.f32 0.5, %v4186_v36  ;;  %s10856_s7 = smov [#allocation11]  }
 0x60f   :  { %s8568_s24 = sshll.u32 %s10856_s7, 4  ;;  %s8569_s24 = int_to_ptr.vmem [resolvable:$true] %s8568_s24 }
 0x610   :  { %v4192_v44 = vmul.f32 1.442695, %v4191_v39  ;;  %v9448_v39 = vcombine.low %v4642_v33, %v4658_v34  ;;  %s10812_s26 = scalar_lea.vmem %s8569_s24, 1024  ;;  %p10817_p13 = scmp.lt.s32.totalorder %s8569_s24, %s8569_s24 }
 0x611   :  { %p10813_p12 = scmp.ne.s32.totalorder %s8569_s24, %s10812_s26  ;;  %p10818_p0 = scmp.lt.s32.totalorder %s10812_s26, %s10812_s26 }
 0x612   :  { %10572 = vpow2.f32 %v4192_v44  ;;  %v9513_v44 = vcombine.high %v4706_v41, %v4722_v42 }
 0x613   :  { %p10819_p1 = por %p10818_p0, %p10817_p13 }
 0x615   :  { %p10820_p2 = pnand %p10819_p1, %p10813_p12 }
 0x61c   :  { %v10573_v50 = vpop.eup %10572 }
 0x61d   :  { %4195 = vrot.lane.b32.xlu0 %v10573_v50, %s10854_s23  ;;  %v4770_v50 = vld [vmem:[#allocation8 + $0xf00] sm:$0xff] }
 0x68f   :  { %v4196_v52 = vpop.permute.xlu0 %4195 }
 0x690   :  { %v4198_v54 = vmul.f32 %v4196_v52, %v4190_v51  ;;  %v4786_v51 = vld [vmem:[#allocation8 + $0xf80] sm:$0xff] }
 0x691   :  { %v9577_v52 = vcombine.high %v4770_v50, %v4786_v51  ;;  %v9576_v16 = vcombine.low %v4770_v50, %v4786_v51  ;;  %v4675_v51 = vld [vmem:[#allocation8 + $0xc08] sm:$0xff] }
 0x692   :  { %v4199_v55 = vadd.f32 %v4198_v54, %v4186_v36  ;;  %v9449_v36 = vcombine.high %v4642_v33, %v4658_v34  ;;  %v4307_v54 = vld [vmem:[#allocation8 + $0x88] sm:$0xff] }
 0x694   :  { %9095 = vmatmul.mubr.msk.f32.vlgmr.msra.gmra.mrb[0].mxu1 %vm4211_vm0, %v4199_v55  ;;  %v9099_v55 = vcombine.high %v4291_v53, %v4307_v54 }
 0x695   :  { %7531 = vmatpush1.bf16.msra.mxu1 %v9096_v48  ;;  %v9545_v48 = vcombine.high %v4738_v46, %v4754_v47  ;;  %v4643_v47 = vld [vmem:[#allocation8 + $0xb08] sm:$0xff] }
 0x696   :  { %7532 = vmatprep.subr.bf16.mxu1 %v9129_v38  ;;  %v9098_v38 = vcombine.low %v4291_v53, %v4307_v54  ;;  %v4707_v54 = vld [vmem:[#allocation8 + $0xd08] sm:$0xff] }
 0x699   :  { %7533 = vmatpush1.bf16.msra.mxu1 %v9128_v59  ;;  %v4208_v59 = vrot.slane %v92_v57, %v11135_v1 }
 0x69a   :  { %7534 = vmatprep.subr.bf16.mxu1 %v9161_v60 }
 0x69d   :  { %7535 = vmatpush1.bf16.msra.mxu1 %v9160_v0 }
 0x69e   :  { %7536 = vmatprep.subr.bf16.mxu1 %v9193_v2 }
 0x6a1   :  { %7537 = vmatpush1.bf16.msra.mxu1 %v9192_v5  ;;  %v4339_v5 = vld [vmem:[#allocation8 + $0x188] sm:$0xff] }
 0x6a2   :  { %7538 = vmatprep.subr.bf16.mxu1 %v9225_v6  ;;  %v9131_v8 = vcombine.high %v4323_v4, %v4339_v5  ;;  %v9130_v10 = vcombine.low %v4323_v4, %v4339_v5  ;;  %v4292_v4 = vld [vmem:[#allocation8 + $0x10] sm:$0xff] }
 0x6a3   :  { %v4308_v5 = vld [vmem:[#allocation8 + $0x90] sm:$0xff] }
 0x6a5   :  { %7539 = vmatpush1.bf16.msra.mxu1 %v9224_v9  ;;  %v4355_v9 = vld [vmem:[#allocation8 + $0x208] sm:$0xff] }
 0x6a6   :  { %7540 = vmatprep.subr.bf16.mxu1 %v9257_v56  ;;  %v4371_v56 = vld [vmem:[#allocation8 + $0x288] sm:$0xff] }
 0x6a7   :  { %v9163_v11 = vcombine.high %v4355_v9, %v4371_v56  ;;  %v9162_v15 = vcombine.low %v4355_v9, %v4371_v56  ;;  %v9101_v9 = vcombine.high %v4292_v4, %v4308_v5  ;;  %v4324_v56 = vld [vmem:[#allocation8 + $0x110] sm:$0xff] }
 0x6a9   :  { %7541 = vmatpush1.bf16.msra.mxu1 %v9256_v13  ;;  %v4387_v13 = vld [vmem:[#allocation8 + $0x308] sm:$0xff] }
 0x6aa   :  { %7542 = vmatprep.subr.bf16.mxu1 %v9289_v14  ;;  %v4403_v14 = vld [vmem:[#allocation8 + $0x388] sm:$0xff] }
 0x6ab   :  { %v9195_v17 = vcombine.high %v4387_v13, %v4403_v14  ;;  %v9194_v21 = vcombine.low %v4387_v13, %v4403_v14  ;;  %v4356_v14 = vld [vmem:[#allocation8 + $0x210] sm:$0xff] }
 0x6ad   :  { %7543 = vmatpush1.bf16.msra.mxu1 %v9288_v18  ;;  %v4419_v18 = vld [vmem:[#allocation8 + $0x408] sm:$0xff] }
 0x6ae   :  { %7544 = vmatprep.subr.bf16.mxu1 %v9321_v19  ;;  %v4435_v19 = vld [vmem:[#allocation8 + $0x488] sm:$0xff] }
 0x6af   :  { %v9227_v22 = vcombine.high %v4419_v18, %v4435_v19  ;;  %v9226_v25 = vcombine.low %v4419_v18, %v4435_v19  ;;  %v4388_v19 = vld [vmem:[#allocation8 + $0x310] sm:$0xff] }
 0x6b1   :  { %7545 = vmatpush1.bf16.msra.mxu1 %v9320_v23  ;;  %v4451_v23 = vld [vmem:[#allocation8 + $0x508] sm:$0xff] }
 0x6b2   :  { %7546 = vmatprep.subr.bf16.mxu1 %v9353_v24  ;;  %v4467_v24 = vld [vmem:[#allocation8 + $0x588] sm:$0xff] }
 0x6b3   :  { %v9259_v26 = vcombine.high %v4451_v23, %v4467_v24  ;;  %v9258_v29 = vcombine.low %v4451_v23, %v4467_v24  ;;  %v4420_v24 = vld [vmem:[#allocation8 + $0x410] sm:$0xff] }
 0x6b5   :  { %7547 = vmatpush1.bf16.msra.mxu1 %v9352_v27  ;;  %v4483_v27 = vld [vmem:[#allocation8 + $0x608] sm:$0xff] }
 0x6b6   :  { %7548 = vmatprep.subr.bf16.mxu1 %v9385_v28  ;;  %v4499_v28 = vld [vmem:[#allocation8 + $0x688] sm:$0xff] }
 0x6b7   :  { %v9291_v30 = vcombine.high %v4483_v27, %v4499_v28  ;;  %v9290_v33 = vcombine.low %v4483_v27, %v4499_v28  ;;  %v4452_v28 = vld [vmem:[#allocation8 + $0x510] sm:$0xff] }
 0x6b9   :  { %7549 = vmatpush1.bf16.msra.mxu1 %v9384_v31  ;;  %v4515_v31 = vld [vmem:[#allocation8 + $0x708] sm:$0xff] }
 0x6ba   :  { %7550 = vmatprep.subr.bf16.mxu1 %v9417_v32  ;;  %v4531_v32 = vld [vmem:[#allocation8 + $0x788] sm:$0xff] }
 0x6bb   :  { %v9323_v34 = vcombine.high %v4515_v31, %v4531_v32  ;;  %v9322_v37 = vcombine.low %v4515_v31, %v4531_v32  ;;  %v4484_v32 = vld [vmem:[#allocation8 + $0x610] sm:$0xff] }
 0x6bd   :  { %7551 = vmatpush1.bf16.msra.mxu1 %v9416_v35  ;;  %v4547_v35 = vld [vmem:[#allocation8 + $0x808] sm:$0xff] }
 0x6be   :  { %7552 = vmatprep.subr.bf16.mxu1 %v9449_v36  ;;  %v4563_v36 = vld [vmem:[#allocation8 + $0x888] sm:$0xff] }
 0x6bf   :  { %v9355_v20 = vcombine.high %v4547_v35, %v4563_v36  ;;  %v9354_v41 = vcombine.low %v4547_v35, %v4563_v36  ;;  %v4516_v36 = vld [vmem:[#allocation8 + $0x710] sm:$0xff] }
 0x6c1   :  { %7553 = vmatpush1.bf16.msra.mxu1 %v9448_v39  ;;  %v4579_v39 = vld [vmem:[#allocation8 + $0x908] sm:$0xff] }
 0x6c2   :  { %7554 = vmatprep.subr.bf16.mxu1 %v9481_v40  ;;  %v4595_v40 = vld [vmem:[#allocation8 + $0x988] sm:$0xff] }
 0x6c3   :  { %v9387_v42 = vcombine.high %v4579_v39, %v4595_v40 }
 0x6c5   :  { %7555 = vmatpush1.bf16.msra.mxu1 %v9480_v43  ;;  %v4611_v43 = vld [vmem:[#allocation8 + $0xa08] sm:$0xff] }
 0x6c6   :  { %7556 = vmatprep.subr.bf16.mxu1 %v9513_v44  ;;  %v4627_v44 = vld [vmem:[#allocation8 + $0xa88] sm:$0xff] }
 0x6c7   :  { %v9419_v46 = vcombine.high %v4611_v43, %v4627_v44 }
 0x6c9   :  { %7557 = vmatpush1.bf16.msra.mxu1 %v9512_v45  ;;  %v9386_v45 = vcombine.low %v4579_v39, %v4595_v40  ;;  %v4548_v40 = vld [vmem:[#allocation8 + $0x810] sm:$0xff] }
 0x6ca   :  { %7558 = vmatprep.subr.bf16.mxu1 %v9545_v48  ;;  %v4659_v48 = vld [vmem:[#allocation8 + $0xb88] sm:$0xff] }
 0x6cb   :  { %v9451_v50 = vcombine.high %v4643_v47, %v4659_v48 }
 0x6cd   :  { %7559 = vmatpush1.bf16.msra.mxu1 %v9544_v49  ;;  %v9418_v49 = vcombine.low %v4611_v43, %v4627_v44  ;;  %v4580_v44 = vld [vmem:[#allocation8 + $0x910] sm:$0xff] }
 0x6ce   :  { %7560 = vmatprep.subr.bf16.mxu1 %v9577_v52  ;;  %v4691_v52 = vld [vmem:[#allocation8 + $0xc88] sm:$0xff] }
 0x6cf   :  { %v9483_v53 = vcombine.high %v4675_v51, %v4691_v52 }
 0x6d1   :  { %7561 = vmatpush1.bf16.msra.mxu1 %v9576_v16  ;;  %v9450_v16 = vcombine.low %v4643_v47, %v4659_v48  ;;  %v4612_v48 = vld [vmem:[#allocation8 + $0xa10] sm:$0xff] }
 0x6d2   :  { %7571 = vmatprep.subr.bf16.mxu1 %v9099_v55  ;;  %v4723_v55 = vld [vmem:[#allocation8 + $0xd88] sm:$0xff] }
 0x6d3   :  { %v9515_v57 = vcombine.high %v4707_v54, %v4723_v55 }
 0x767   :  { %v4281_v60 = vpop.f32.mrb[0].mxu1 }
 0x768   :  { %v4282_v61 = vadd.f32 %v4281_v60, %v4204_v58  ;;  %v4283_v62 = vpop.f32.mrb[1].mxu1  ;;  %v4739_v58 = vld [vmem:[#allocation8 + $0xe08] sm:$0xff]  ;;  %v9514_v60 = vcombine.low %v4707_v54, %v4723_v55  ;;  %v4676_v55 = vld [vmem:[#allocation8 + $0xc10] sm:$0xff] }
 0x769   :  { %v4284_v0 = vadd.f32 %v4283_v62, %v4208_v59  ;;  %v4755_v59 = vld [vmem:[#allocation8 + $0xe88] sm:$0xff] }
 0x76a   :  { %v4286_v2 = vmax.f32 %v4282_v61, 0.0  ;;  %v9547_v61 = vcombine.high %v4739_v58, %v4755_v59  ;;  %v4771_v62 = vld [vmem:[#allocation8 + $0xf08] sm:$0xff] }
 0x76b   :  { %v4287_v3 = vmax.f32 %v4284_v0, 0.0  ;;  %v4787_v0 = vld [vmem:[#allocation8 + $0xf88] sm:$0xff] }
 0x76c   :  { %v11146_v7 = vpack.c.bf16 %v4286_v2, %v4286_v2  ;;  %v9546_v2 = vcombine.low %v4739_v58, %v4755_v59  ;;  %v4708_v59 = vld [vmem:[#allocation8 + $0xd10] sm:$0xff] }
 0x76d   :  { %v11144_v6 = vpack.c.bf16 %v4287_v3, %v4287_v3  ;;  %v9579_v3 = vcombine.high %v4771_v62, %v4787_v0 }
 0x76f   :  { %7562 = vmatprep.mubr.bf16.mxu1 %v11144_v6 }
 0x770   :  { %7563 = vmatmul.mubr.bf16.vlgmr.msra.gmra.mrb[4].mxu1 %v11146_v7 }
 0x771   :  { %7572 = vmatpush1.bf16.msra.mxu1 %v9098_v38  ;;  %7603 = vmatprep.mubr.bf16.mxu1 %v11144_v6  ;;  %v9482_v38 = vcombine.low %v4675_v51, %v4691_v52  ;;  %v4644_v52 = vld [vmem:[#allocation8 + $0xb10] sm:$0xff] }
 0x772   :  { %7573 = vmatprep.subr.bf16.mxu1 %v9131_v8  ;;  %v9578_v8 = vcombine.low %v4771_v62, %v4787_v0  ;;  %v4740_v0 = vld [vmem:[#allocation8 + $0xe10] sm:$0xff] }
 0x775   :  { %7574 = vmatpush1.bf16.msra.mxu1 %v9130_v10  ;;  %v4340_v10 = vld [vmem:[#allocation8 + $0x190] sm:$0xff] }
 0x776   :  { %7575 = vmatprep.subr.bf16.mxu1 %v9163_v11  ;;  %v9100_v11 = vcombine.low %v4292_v4, %v4308_v5  ;;  %v9133_v13 = vcombine.high %v4324_v56, %v4340_v10  ;;  %v4772_v5 = vld [vmem:[#allocation8 + $0xf10] sm:$0xff] }
 0x779   :  { %7576 = vmatpush1.bf16.msra.mxu1 %v9162_v15  ;;  %v4372_v15 = vld [vmem:[#allocation8 + $0x290] sm:$0xff] }
 0x77a   :  { %7577 = vmatprep.subr.bf16.mxu1 %v9195_v17  ;;  %v9132_v17 = vcombine.low %v4324_v56, %v4340_v10  ;;  %v9165_v18 = vcombine.high %v4356_v14, %v4372_v15  ;;  %v4293_v10 = vld [vmem:[#allocation8 + $0x18] sm:$0xff] }
 0x77d   :  { %7578 = vmatpush1.bf16.msra.mxu1 %v9194_v21  ;;  %v4404_v21 = vld [vmem:[#allocation8 + $0x390] sm:$0xff] }
 0x77e   :  { %7579 = vmatprep.subr.bf16.mxu1 %v9227_v22  ;;  %v9164_v22 = vcombine.low %v4356_v14, %v4372_v15  ;;  %v9197_v23 = vcombine.high %v4388_v19, %v4404_v21  ;;  %v4325_v15 = vld [vmem:[#allocation8 + $0x118] sm:$0xff] }
 0x781   :  { %7580 = vmatpush1.bf16.msra.mxu1 %v9226_v25  ;;  %v4436_v25 = vld [vmem:[#allocation8 + $0x490] sm:$0xff] }
 0x782   :  { %7581 = vmatprep.subr.bf16.mxu1 %v9259_v26  ;;  %v9196_v26 = vcombine.low %v4388_v19, %v4404_v21  ;;  %v9229_v27 = vcombine.high %v4420_v24, %v4436_v25  ;;  %v4357_v21 = vld [vmem:[#allocation8 + $0x218] sm:$0xff] }
 0x785   :  { %7582 = vmatpush1.bf16.msra.mxu1 %v9258_v29  ;;  %v4468_v29 = vld [vmem:[#allocation8 + $0x590] sm:$0xff] }
 0x786   :  { %7583 = vmatprep.subr.bf16.mxu1 %v9291_v30  ;;  %v9228_v30 = vcombine.low %v4420_v24, %v4436_v25  ;;  %v9261_v31 = vcombine.high %v4452_v28, %v4468_v29  ;;  %v4389_v25 = vld [vmem:[#allocation8 + $0x318] sm:$0xff] }
 0x789   :  { %7584 = vmatpush1.bf16.msra.mxu1 %v9290_v33  ;;  %v4500_v33 = vld [vmem:[#allocation8 + $0x690] sm:$0xff] }
 0x78a   :  { %7585 = vmatprep.subr.bf16.mxu1 %v9323_v34  ;;  %v9260_v34 = vcombine.low %v4452_v28, %v4468_v29  ;;  %v9293_v35 = vcombine.high %v4484_v32, %v4500_v33  ;;  %v4421_v29 = vld [vmem:[#allocation8 + $0x418] sm:$0xff] }
 0x78d   :  { %7586 = vmatpush1.bf16.msra.mxu1 %v9322_v37  ;;  %v4532_v37 = vld [vmem:[#allocation8 + $0x790] sm:$0xff] }
 0x78e   :  { %7587 = vmatprep.subr.bf16.mxu1 %v9355_v20  ;;  %v9292_v20 = vcombine.low %v4484_v32, %v4500_v33  ;;  %v9325_v39 = vcombine.high %v4516_v36, %v4532_v37  ;;  %v4453_v33 = vld [vmem:[#allocation8 + $0x518] sm:$0xff] }
 0x791   :  { %7588 = vmatpush1.bf16.msra.mxu1 %v9354_v41  ;;  %v4564_v41 = vld [vmem:[#allocation8 + $0x890] sm:$0xff] }
 0x792   :  { %7589 = vmatprep.subr.bf16.mxu1 %v9387_v42  ;;  %v9324_v42 = vcombine.low %v4516_v36, %v4532_v37  ;;  %v9357_v43 = vcombine.high %v4548_v40, %v4564_v41  ;;  %v4485_v37 = vld [vmem:[#allocation8 + $0x618] sm:$0xff] }
 0x795   :  { %7590 = vmatpush1.bf16.msra.mxu1 %v9386_v45  ;;  %v4596_v45 = vld [vmem:[#allocation8 + $0x990] sm:$0xff] }
 0x796   :  { %7591 = vmatprep.subr.bf16.mxu1 %v9419_v46  ;;  %v9356_v46 = vcombine.low %v4548_v40, %v4564_v41  ;;  %v9389_v47 = vcombine.high %v4580_v44, %v4596_v45  ;;  %v4517_v41 = vld [vmem:[#allocation8 + $0x718] sm:$0xff] }
 0x799   :  { %7592 = vmatpush1.bf16.msra.mxu1 %v9418_v49  ;;  %v4628_v49 = vld [vmem:[#allocation8 + $0xa90] sm:$0xff] }
 0x79a   :  { %7593 = vmatprep.subr.bf16.mxu1 %v9451_v50  ;;  %v9388_v50 = vcombine.low %v4580_v44, %v4596_v45  ;;  %v9421_v51 = vcombine.high %v4612_v48, %v4628_v49  ;;  %v4549_v45 = vld [vmem:[#allocation8 + $0x818] sm:$0xff] }
 0x79d   :  { %7594 = vmatpush1.bf16.msra.mxu1 %v9450_v16  ;;  %v4660_v16 = vld [vmem:[#allocation8 + $0xb90] sm:$0xff] }
 0x79e   :  { %7595 = vmatprep.subr.bf16.mxu1 %v9483_v53  ;;  %v9420_v53 = vcombine.low %v4612_v48, %v4628_v49  ;;  %v9453_v54 = vcombine.high %v4644_v52, %v4660_v16  ;;  %v4581_v49 = vld [vmem:[#allocation8 + $0x918] sm:$0xff] }
 0x7a1   :  { %7596 = vmatpush1.bf16.msra.mxu1 %v9482_v38  ;;  %v4692_v38 = vld [vmem:[#allocation8 + $0xc90] sm:$0xff] }
 0x7a2   :  { %7597 = vmatprep.subr.bf16.mxu1 %v9515_v57  ;;  %v9452_v57 = vcombine.low %v4644_v52, %v4660_v16  ;;  %v9485_v58 = vcombine.high %v4676_v55, %v4692_v38  ;;  %v4613_v16 = vld [vmem:[#allocation8 + $0xa18] sm:$0xff] }
 0x7a5   :  { %7598 = vmatpush1.bf16.msra.mxu1 %v9514_v60  ;;  %v4724_v60 = vld [vmem:[#allocation8 + $0xd90] sm:$0xff] }
 0x7a6   :  { %7599 = vmatprep.subr.bf16.mxu1 %v9547_v61  ;;  %v9484_v61 = vcombine.low %v4676_v55, %v4692_v38  ;;  %v9517_v62 = vcombine.high %v4708_v59, %v4724_v60  ;;  %v4645_v38 = vld [vmem:[#allocation8 + $0xb18] sm:$0xff] }
 0x7a9   :  { %7600 = vmatpush1.bf16.msra.mxu1 %v9546_v2  ;;  %v4756_v2 = vld [vmem:[#allocation8 + $0xe90] sm:$0xff] }
 0x7aa   :  { %7601 = vmatprep.subr.bf16.mxu1 %v9579_v3  ;;  %v9516_v3 = vcombine.low %v4708_v59, %v4724_v60  ;;  %v9549_v4 = vcombine.high %v4740_v0, %v4756_v2  ;;  %v4677_v60 = vld [vmem:[#allocation8 + $0xc18] sm:$0xff] }
 0x7ad   :  { %7602 = vmatpush1.bf16.msra.mxu1 %v9578_v8  ;;  %v4788_v8 = vld [vmem:[#allocation8 + $0xf90] sm:$0xff] }
 0x7ae   :  { %7612 = vmatprep.subr.bf16.mxu1 %v9101_v9  ;;  %v9548_v9 = vcombine.low %v4740_v0, %v4756_v2  ;;  %v9581_v56 = vcombine.high %v4772_v5, %v4788_v8  ;;  %v4709_v2 = vld [vmem:[#allocation8 + $0xd18] sm:$0xff] }
 0x7b0   :  { %7604 = vmatmul.mubr.bf16.vlgmr.msra.gmra.mrb[8].mxu1 %v11146_v7 }
 0x7b1   :  { %7613 = vmatpush1.bf16.msra.mxu1 %v9100_v11  ;;  %7644 = vmatprep.mubr.bf16.mxu1 %v11144_v6  ;;  %v4309_v11 = vld [vmem:[#allocation8 + $0x98] sm:$0xff] }
 0x7b2   :  { %7614 = vmatprep.subr.bf16.mxu1 %v9133_v13  ;;  %v9580_v13 = vcombine.low %v4772_v5, %v4788_v8  ;;  %v9103_v14 = vcombine.high %v4293_v10, %v4309_v11  ;;  %v4741_v8 = vld [vmem:[#allocation8 + $0xe18] sm:$0xff] }
 0x7b5   :  { %7615 = vmatpush1.bf16.msra.mxu1 %v9132_v17  ;;  %v4341_v17 = vld [vmem:[#allocation8 + $0x198] sm:$0xff] }
 0x7b6   :  { %7616 = vmatprep.subr.bf16.mxu1 %v9165_v18  ;;  %v9102_v18 = vcombine.low %v4293_v10, %v4309_v11  ;;  %v9135_v19 = vcombine.high %v4325_v15, %v4341_v17  ;;  %v4773_v11 = vld [vmem:[#allocation8 + $0xf18] sm:$0xff] }
 0x7b9   :  { %7617 = vmatpush1.bf16.msra.mxu1 %v9164_v22  ;;  %v4373_v22 = vld [vmem:[#allocation8 + $0x298] sm:$0xff] }
 0x7ba   :  { %7618 = vmatprep.subr.bf16.mxu1 %v9197_v23  ;;  %v9134_v23 = vcombine.low %v4325_v15, %v4341_v17  ;;  %v9167_v24 = vcombine.high %v4357_v21, %v4373_v22  ;;  %v4294_v17 = vld [vmem:[#allocation8 + $0x20] sm:$0xff] }
 0x7bd   :  { %7619 = vmatpush1.bf16.msra.mxu1 %v9196_v26  ;;  %v4405_v26 = vld [vmem:[#allocation8 + $0x398] sm:$0xff] }
 0x7be   :  { %7620 = vmatprep.subr.bf16.mxu1 %v9229_v27  ;;  %v9166_v27 = vcombine.low %v4357_v21, %v4373_v22  ;;  %v9199_v28 = vcombine.high %v4389_v25, %v4405_v26  ;;  %v4326_v22 = vld [vmem:[#allocation8 + $0x120] sm:$0xff] }
 0x7c1   :  { %7621 = vmatpush1.bf16.msra.mxu1 %v9228_v30  ;;  %v4437_v30 = vld [vmem:[#allocation8 + $0x498] sm:$0xff] }
 0x7c2   :  { %7622 = vmatprep.subr.bf16.mxu1 %v9261_v31  ;;  %v9198_v31 = vcombine.low %v4389_v25, %v4405_v26  ;;  %v9231_v32 = vcombine.high %v4421_v29, %v4437_v30  ;;  %v4358_v26 = vld [vmem:[#allocation8 + $0x220] sm:$0xff] }
 0x7c5   :  { %7623 = vmatpush1.bf16.msra.mxu1 %v9260_v34  ;;  %v4469_v34 = vld [vmem:[#allocation8 + $0x598] sm:$0xff] }
 0x7c6   :  { %7624 = vmatprep.subr.bf16.mxu1 %v9293_v35  ;;  %v9230_v35 = vcombine.low %v4421_v29, %v4437_v30  ;;  %v9263_v36 = vcombine.high %v4453_v33, %v4469_v34  ;;  %v4390_v30 = vld [vmem:[#allocation8 + $0x320] sm:$0xff] }
 0x7c9   :  { %7625 = vmatpush1.bf16.msra.mxu1 %v9292_v20  ;;  %v4501_v20 = vld [vmem:[#allocation8 + $0x698] sm:$0xff] }
 0x7ca   :  { %7626 = vmatprep.subr.bf16.mxu1 %v9325_v39  ;;  %v9262_v39 = vcombine.low %v4453_v33, %v4469_v34  ;;  %v9295_v40 = vcombine.high %v4485_v37, %v4501_v20  ;;  %v4422_v34 = vld [vmem:[#allocation8 + $0x420] sm:$0xff] }
 0x7cd   :  { %7627 = vmatpush1.bf16.msra.mxu1 %v9324_v42  ;;  %v4533_v42 = vld [vmem:[#allocation8 + $0x798] sm:$0xff] }
 0x7ce   :  { %7628 = vmatprep.subr.bf16.mxu1 %v9357_v43  ;;  %v9294_v43 = vcombine.low %v4485_v37, %v4501_v20  ;;  %v9327_v44 = vcombine.high %v4517_v41, %v4533_v42  ;;  %v4454_v20 = vld [vmem:[#allocation8 + $0x520] sm:$0xff] }
 0x7d1   :  { %7629 = vmatpush1.bf16.msra.mxu1 %v9356_v46  ;;  %v4565_v46 = vld [vmem:[#allocation8 + $0x898] sm:$0xff] }
 0x7d2   :  { %7630 = vmatprep.subr.bf16.mxu1 %v9389_v47  ;;  %v9326_v47 = vcombine.low %v4517_v41, %v4533_v42  ;;  %v9359_v48 = vcombine.high %v4549_v45, %v4565_v46  ;;  %v11157_v41 = vld [vmem:[#allocation10] sm:$0xff] }
 0x7d5   :  { %7631 = vmatpush1.bf16.msra.mxu1 %v9388_v50  ;;  %v4597_v50 = vld [vmem:[#allocation8 + $0x998] sm:$0xff] }
 0x7d6   :  { %7632 = vmatprep.subr.bf16.mxu1 %v9421_v51  ;;  %v9358_v51 = vcombine.low %v4549_v45, %v4565_v46  ;;  %v9391_v52 = vcombine.high %v4581_v49, %v4597_v50  ;;  %v4813_v45 = vrot.slane %v11157_v41, %v11132_v63 }
 0x7d9   :  { %7633 = vmatpush1.bf16.msra.mxu1 %v9420_v53  ;;  %v4629_v53 = vld [vmem:[#allocation8 + $0xa98] sm:$0xff] }
 0x7da   :  { %7634 = vmatprep.subr.bf16.mxu1 %v9453_v54  ;;  %v9390_v54 = vcombine.low %v4581_v49, %v4597_v50  ;;  %v9423_v55 = vcombine.high %v4613_v16, %v4629_v53  ;;  %v4518_v50 = vld [vmem:[#allocation8 + $0x720] sm:$0xff] }
 0x7dd   :  { %7635 = vmatpush1.bf16.msra.mxu1 %v9452_v57  ;;  %v4661_v57 = vld [vmem:[#allocation8 + $0xb98] sm:$0xff] }
 0x7de   :  { %7636 = vmatprep.subr.bf16.mxu1 %v9485_v58  ;;  %v9422_v58 = vcombine.low %v4613_v16, %v4629_v53  ;;  %v9455_v59 = vcombine.high %v4645_v38, %v4661_v57 }
 0x7e1   :  { %7637 = vmatpush1.bf16.msra.mxu1 %v9484_v61  ;;  %v4693_v61 = vld [vmem:[#allocation8 + $0xc98] sm:$0xff] }
 0x7e2   :  { %7638 = vmatprep.subr.bf16.mxu1 %v9517_v62  ;;  %v9454_v62 = vcombine.low %v4645_v38, %v4661_v57  ;;  %v9487_v0 = vcombine.high %v4677_v60, %v4693_v61 }
 0x7e5   :  { %7639 = vmatpush1.bf16.msra.mxu1 %v9516_v3  ;;  %v4725_v3 = vld [vmem:[#allocation8 + $0xd98] sm:$0xff] }
 0x7e6   :  { %7640 = vmatprep.subr.bf16.mxu1 %v9549_v4  ;;  %v9486_v4 = vcombine.low %v4677_v60, %v4693_v61  ;;  %v9519_v5 = vcombine.high %v4709_v2, %v4725_v3  ;;  %v4550_v60 = vld [vmem:[#allocation8 + $0x820] sm:$0xff] }
 0x7e7   :  { %v4566_v61 = vld [vmem:[#allocation8 + $0x8a0] sm:$0xff] }
 0x7e9   :  { %7641 = vmatpush1.bf16.msra.mxu1 %v9548_v9  ;;  %v4757_v9 = vld [vmem:[#allocation8 + $0xe98] sm:$0xff] }
 0x7ea   :  { %7642 = vmatprep.subr.bf16.mxu1 %v9581_v56  ;;  %v9518_v56 = vcombine.low %v4709_v2, %v4725_v3  ;;  %v9551_v10 = vcombine.high %v4741_v8, %v4757_v9  ;;  %v4582_v2 = vld [vmem:[#allocation8 + $0x920] sm:$0xff] }
 0x7eb   :  { %v4598_v3 = vld [vmem:[#allocation8 + $0x9a0] sm:$0xff] }
 0x7ed   :  { %7643 = vmatpush1.bf16.msra.mxu1 %v9580_v13  ;;  %v4789_v13 = vld [vmem:[#allocation8 + $0xf98] sm:$0xff] }
 0x7ee   :  { %7653 = vmatprep.subr.bf16.mxu1 %v9103_v14  ;;  %v9550_v14 = vcombine.low %v4741_v8, %v4757_v9  ;;  %v9583_v15 = vcombine.high %v4773_v11, %v4789_v13  ;;  %v4614_v8 = vld [vmem:[#allocation8 + $0xa20] sm:$0xff] }
 0x7ef   :  { %v4630_v9 = vld [vmem:[#allocation8 + $0xaa0] sm:$0xff] }
 0x7f0   :  { %7645 = vmatmul.mubr.bf16.vlgmr.msra.gmra.mrb[12].mxu1 %v11146_v7 }
 0x7f1   :  { %7654 = vmatpush1.bf16.msra.mxu1 %v9102_v18  ;;  %7685 = vmatprep.mubr.bf16.mxu1 %v11144_v6  ;;  %v4310_v18 = vld [vmem:[#allocation8 + $0xa0] sm:$0xff] }
 0x7f2   :  { %7655 = vmatprep.subr.bf16.mxu1 %v9135_v19  ;;  %v9582_v19 = vcombine.low %v4773_v11, %v4789_v13  ;;  %v9105_v21 = vcombine.high %v4294_v17, %v4310_v18  ;;  %v9425_v11 = vcombine.high %v4614_v8, %v4630_v9 }
 0x7f5   :  { %7656 = vmatpush1.bf16.msra.mxu1 %v9134_v23  ;;  %v4342_v23 = vld [vmem:[#allocation8 + $0x1a0] sm:$0xff] }
 0x7f6   :  { %7657 = vmatprep.subr.bf16.mxu1 %v9167_v24  ;;  %v9104_v24 = vcombine.low %v4294_v17, %v4310_v18  ;;  %v9137_v25 = vcombine.high %v4326_v22, %v4342_v23  ;;  %v4662_v17 = vld [vmem:[#allocation8 + $0xba0] sm:$0xff] }
 0x7f9   :  { %7658 = vmatpush1.bf16.msra.mxu1 %v9166_v27  ;;  %v4374_v27 = vld [vmem:[#allocation8 + $0x2a0] sm:$0xff] }
 0x7fa   :  { %7659 = vmatprep.subr.bf16.mxu1 %v9199_v28  ;;  %v9136_v28 = vcombine.low %v4326_v22, %v4342_v23  ;;  %v9169_v29 = vcombine.high %v4358_v26, %v4374_v27  ;;  %v4678_v22 = vld [vmem:[#allocation8 + $0xc20] sm:$0xff] }
 0x7fb   :  { %v4694_v23 = vld [vmem:[#allocation8 + $0xca0] sm:$0xff] }
 0x7fd   :  { %7660 = vmatpush1.bf16.msra.mxu1 %v9198_v31  ;;  %v4406_v31 = vld [vmem:[#allocation8 + $0x3a0] sm:$0xff] }
 0x7fe   :  { %7661 = vmatprep.subr.bf16.mxu1 %v9231_v32  ;;  %v9168_v32 = vcombine.low %v4358_v26, %v4374_v27  ;;  %v9201_v33 = vcombine.high %v4390_v30, %v4406_v31  ;;  %v4710_v26 = vld [vmem:[#allocation8 + $0xd20] sm:$0xff] }
 0x7ff   :  { %v4726_v27 = vld [vmem:[#allocation8 + $0xda0] sm:$0xff] }
 0x801   :  { %7662 = vmatpush1.bf16.msra.mxu1 %v9230_v35  ;;  %v4438_v35 = vld [vmem:[#allocation8 + $0x4a0] sm:$0xff] }
 0x802   :  { %7663 = vmatprep.subr.bf16.mxu1 %v9263_v36  ;;  %v9200_v36 = vcombine.low %v4390_v30, %v4406_v31  ;;  %v9233_v37 = vcombine.high %v4422_v34, %v4438_v35  ;;  %v4742_v31 = vld [vmem:[#allocation8 + $0xe20] sm:$0xff] }
 0x805   :  { %7664 = vmatpush1.bf16.msra.mxu1 %v9262_v39  ;;  %v4470_v39 = vld [vmem:[#allocation8 + $0x5a0] sm:$0xff] }
 0x806   :  { %7665 = vmatprep.subr.bf16.mxu1 %v9295_v40  ;;  %v9232_v40 = vcombine.low %v4422_v34, %v4438_v35  ;;  %v9265_v42 = vcombine.high %v4454_v20, %v4470_v39  ;;  %v9264_v46 = vcombine.low %v4454_v20, %v4470_v39  ;;  %v9520_v35 = vcombine.low %v4710_v26, %v4726_v27  ;;  %v4790_v20 = vld [vmem:[#allocation8 + $0xfa0] sm:$0xff] }
 0x809   :  { %7666 = vmatpush1.bf16.msra.mxu1 %v9294_v43  ;;  %v4486_v43 = vld [vmem:[#allocation8 + $0x620] sm:$0xff] }
 0x80a   :  { %7667 = vmatprep.subr.bf16.mxu1 %v9327_v44  ;;  %v4502_v44 = vld [vmem:[#allocation8 + $0x6a0] sm:$0xff] }
 0x80d   :  { %7668 = vmatpush1.bf16.msra.mxu1 %v9326_v47  ;;  %v4817_v47 = vrot.slane %v11157_v41, %v11135_v1 }
 0x80e   :  { %7669 = vmatprep.subr.bf16.mxu1 %v9359_v48  ;;  %v9297_v48 = vcombine.high %v4486_v43, %v4502_v44 }
 0x811   :  { %7670 = vmatpush1.bf16.msra.mxu1 %v9358_v51  ;;  %v4534_v51 = vld [vmem:[#allocation8 + $0x7a0] sm:$0xff] }
 0x812   :  { %7671 = vmatprep.subr.bf16.mxu1 %v9391_v52 }
 0x815   :  { %7672 = vmatpush1.bf16.msra.mxu1 %v9390_v54 }
 0x816   :  { %7673 = vmatprep.subr.bf16.mxu1 %v9423_v55  ;;  %v9296_v55 = vcombine.low %v4486_v43, %v4502_v44  ;;  %v4311_v43 = vld [vmem:[#allocation8 + $0xa8] sm:$0xff] }
 0x819   :  { %7674 = vmatpush1.bf16.msra.mxu1 %v9422_v58  ;;  %v9329_v58 = vcombine.high %v4518_v50, %v4534_v51 }
 0x81a   :  { %7675 = vmatprep.subr.bf16.mxu1 %v9455_v59 }
 0x81d   :  { %7676 = vmatpush1.bf16.msra.mxu1 %v9454_v62  ;;  %v9328_v62 = vcombine.low %v4518_v50, %v4534_v51  ;;  %v4359_v50 = vld [vmem:[#allocation8 + $0x228] sm:$0xff] }
 0x81e   :  { %7677 = vmatprep.subr.bf16.mxu1 %v9487_v0  ;;  %v9361_v0 = vcombine.high %v4550_v60, %v4566_v61  ;;  %v4375_v51 = vld [vmem:[#allocation8 + $0x2a8] sm:$0xff] }
 0x821   :  { %7678 = vmatpush1.bf16.msra.mxu1 %v9486_v4  ;;  %v9360_v4 = vcombine.low %v4550_v60, %v4566_v61  ;;  %v4455_v61 = vld [vmem:[#allocation8 + $0x528] sm:$0xff] }
 0x822   :  { %7679 = vmatprep.subr.bf16.mxu1 %v9519_v5  ;;  %v9393_v5 = vcombine.high %v4582_v2, %v4598_v3 }
 0x825   :  { %7680 = vmatpush1.bf16.msra.mxu1 %v9518_v56  ;;  %v9392_v56 = vcombine.low %v4582_v2, %v4598_v3  ;;  %v11175_v3 = vsub.s32 3, %v10960_v12 }
 0x826   :  { %7681 = vmatprep.subr.bf16.mxu1 %v9551_v10 }
 0x829   :  { %7682 = vmatpush1.bf16.msra.mxu1 %v9550_v14 }
 0x82a   :  { %7683 = vmatprep.subr.bf16.mxu1 %v9583_v15  ;;  %v4646_v15 = vld [vmem:[#allocation8 + $0xb20] sm:$0xff] }
 0x82d   :  { %7684 = vmatpush1.bf16.msra.mxu1 %v9582_v19  ;;  %v9424_v19 = vcombine.low %v4614_v8, %v4630_v9  ;;  %v4503_v8 = vld [vmem:[#allocation8 + $0x6a8] sm:$0xff] }
 0x82e   :  { %7694 = vmatprep.subr.bf16.mxu1 %v9105_v21  ;;  %v9457_v21 = vcombine.high %v4646_v15, %v4662_v17 }
 0x830   :  { %7686 = vmatmul.mubr.bf16.vlgmr.msra.gmra.mrb[16].mxu1 %v11146_v7 }
 0x831   :  { %7695 = vmatpush1.bf16.msra.mxu1 %v9104_v24  ;;  %7726 = vmatprep.mubr.bf16.mxu1 %v11144_v6  ;;  %v9456_v24 = vcombine.low %v4646_v15, %v4662_v17  ;;  %v4535_v15 = vld [vmem:[#allocation8 + $0x7a8] sm:$0xff] }
 0x832   :  { %7696 = vmatprep.subr.bf16.mxu1 %v9137_v25  ;;  %v9489_v25 = vcombine.high %v4678_v22, %v4694_v23 }
 0x835   :  { %7697 = vmatpush1.bf16.msra.mxu1 %v9136_v28  ;;  %v9488_v28 = vcombine.low %v4678_v22, %v4694_v23 }
 0x836   :  { %7698 = vmatprep.subr.bf16.mxu1 %v9169_v29  ;;  %v9521_v29 = vcombine.high %v4710_v26, %v4726_v27  ;;  %v4551_v27 = vld [vmem:[#allocation8 + $0x828] sm:$0xff] }
 0x839   :  { %7699 = vmatpush1.bf16.msra.mxu1 %v9168_v32  ;;  %v4758_v32 = vld [vmem:[#allocation8 + $0xea0] sm:$0xff] }
 0x83a   :  { %7700 = vmatprep.subr.bf16.mxu1 %v9201_v33  ;;  %v9552_v39 = vcombine.low %v4742_v31, %v4758_v32 }
 0x83d   :  { %7701 = vmatpush1.bf16.msra.mxu1 %v9200_v36  ;;  %v9553_v36 = vcombine.high %v4742_v31, %v4758_v32  ;;  %v4583_v32 = vld [vmem:[#allocation8 + $0x928] sm:$0xff] }
 0x83e   :  { %7702 = vmatprep.subr.bf16.mxu1 %v9233_v37  ;;  %v4774_v37 = vld [vmem:[#allocation8 + $0xf20] sm:$0xff] }
 0x83f   :  { %v9584_v44 = vcombine.low %v4774_v37, %v4790_v20 }
 0x841   :  { %7703 = vmatpush1.bf16.msra.mxu1 %v9232_v40  ;;  %v9585_v40 = vcombine.high %v4774_v37, %v4790_v20  ;;  %v4615_v20 = vld [vmem:[#allocation8 + $0xa28] sm:$0xff] }
 0x842   :  { %7704 = vmatprep.subr.bf16.mxu1 %v9265_v42  ;;  %v4295_v42 = vld [vmem:[#allocation8 + $0x28] sm:$0xff] }
 0x843   :  { %v7564_v49 = vpop.f32.mrb[4].mxu1 }
 0x844   :  { %v7565_v52 = vadd.f32 %v7564_v49, %v4813_v45  ;;  %v7566_v16 = vpop.f32.mrb[5].mxu1  ;;  %v9107_v45 = vcombine.high %v4295_v42, %v4311_v43 }
 0x845   :  { %v7567_v53 = vadd.f32 %v7566_v16, %v4817_v47  ;;  %7705 = vmatpush1.bf16.msra.mxu1 %v9264_v46  ;;  %v7568_v54 = vpop.f32.mrb[6].mxu1  ;;  %v4327_v46 = vld [vmem:[#allocation8 + $0x128] sm:$0xff]  ;;  %v9171_v16 = vcombine.high %v4359_v50, %v4375_v51 }
 0x846   :  { %v9608_v38 = vmul.f32 -1.442695, %v7565_v52  ;;  %v7569_v57 = vpop.f32.mrb[7].mxu1  ;;  %7706 = vmatprep.subr.bf16.mxu1 %v9297_v48  ;;  %v4343_v47 = vld [vmem:[#allocation8 + $0x1a8] sm:$0xff]  ;;  %v9106_v48 = vcombine.low %v4295_v42, %v4311_v43 }
 0x847   :  { %v9609_v59 = vmul.f32 -1.442695, %v7567_v53  ;;  %v9139_v49 = vcombine.high %v4327_v46, %v4343_v47  ;;  %v9138_v52 = vcombine.low %v4327_v46, %v4343_v47  ;;  %v4391_v53 = vld [vmem:[#allocation8 + $0x328] sm:$0xff] }
 0x848   :  { %10574 = vpow2.f32 %v9608_v38  ;;  %v4407_v54 = vld [vmem:[#allocation8 + $0x3a8] sm:$0xff] }
 0x849   :  { %10576 = vpow2.f32 %v9609_v59  ;;  %7707 = vmatpush1.bf16.msra.mxu1 %v9296_v55  ;;  %v9170_v55 = vcombine.low %v4359_v50, %v4375_v51  ;;  %v9203_v38 = vcombine.high %v4391_v53, %v4407_v54  ;;  %v4423_v57 = vld [vmem:[#allocation8 + $0x428] sm:$0xff]  ;;  %v9202_v59 = vcombine.low %v4391_v53, %v4407_v54 }
 0x84a   :  { %7708 = vmatprep.subr.bf16.mxu1 %v9329_v58  ;;  %v4439_v58 = vld [vmem:[#allocation8 + $0x4a8] sm:$0xff]  ;;  %v10855_v51 = vmov 1983009808  }
 0x84b   :  { %v9235_v60 = vcombine.high %v4423_v57, %v4439_v58  ;;  %v9234_v2 = vcombine.low %v4423_v57, %v4439_v58  ;;  %v4647_v46 = vld [vmem:[#allocation8 + $0xb28] sm:$0xff] }
 0x84c   :  { %v4663_v47 = vld [vmem:[#allocation8 + $0xba8] sm:$0xff] }
 0x84d   :  { %7709 = vmatpush1.bf16.msra.mxu1 %v9328_v62  ;;  %v4471_v62 = vld [vmem:[#allocation8 + $0x5a8] sm:$0xff]  ;;  %v9459_v50 = vcombine.high %v4647_v46, %v4663_v47  ;;  %v9458_v54 = vcombine.low %v4647_v46, %v4663_v47  ;;  %v4488_v47 = vld [vmem:[#allocation8 + $0x630] sm:$0xff] }
 0x84e   :  { %7710 = vmatprep.subr.bf16.mxu1 %v9361_v0  ;;  %v11172_v0 = vsub.s32 2, %v10960_v12  ;;  %v4695_v53 = vld [vmem:[#allocation8 + $0xca8] sm:$0xff] }
 0x84f   :  { %v4711_v57 = vld [vmem:[#allocation8 + $0xd28] sm:$0xff] }
 0x850   :  { %v4821_v9 = vrot.slane %v11157_v41, %v11172_v0  ;;  %v4727_v58 = vld [vmem:[#allocation8 + $0xda8] sm:$0xff] }
 0x851   :  { %7711 = vmatpush1.bf16.msra.mxu1 %v9360_v4  ;;  %v9267_v4 = vcombine.high %v4455_v61, %v4471_v62 }
 0x852   :  { %v10575_v10 = vpop.eup %10574  ;;  %7712 = vmatprep.subr.bf16.mxu1 %v9393_v5  ;;  %v4487_v5 = vld [vmem:[#allocation8 + $0x628] sm:$0xff] }
 0x853   :  { %v10577_v13 = vpop.eup %10576  ;;  %v8282_v14 = vadd.f32 1.0, %v10575_v10  ;;  %v9266_v10 = vcombine.low %v4455_v61, %v4471_v62  ;;  %v9298_v22 = vcombine.low %v4487_v5, %v4503_v8 }
 0x854   :  { %v8283_v18 = vadd.f32 1.0, %v10577_v13 }
 0x855   :  { %10578 = vrcp.f32 %v8282_v14  ;;  %7713 = vmatpush1.bf16.msra.mxu1 %v9392_v56  ;;  %v4825_v56 = vrot.slane %v11157_v41, %v11175_v3  ;;  %v4519_v14 = vld [vmem:[#allocation8 + $0x728] sm:$0xff] }
 0x856   :  { %10580 = vrcp.f32 %v8283_v18  ;;  %7714 = vmatprep.subr.bf16.mxu1 %v9425_v11  ;;  %v9299_v11 = vcombine.high %v4487_v5, %v4503_v8 }
 0x859   :  { %7715 = vmatpush1.bf16.msra.mxu1 %v9424_v19 }
 0x85a   :  { %7716 = vmatprep.subr.bf16.mxu1 %v9457_v21 }
 0x85d   :  { %7717 = vmatpush1.bf16.msra.mxu1 %v9456_v24 }
 0x85e   :  { %7718 = vmatprep.subr.bf16.mxu1 %v9489_v25  ;;  %v9331_v25 = vcombine.high %v4519_v14, %v4535_v15 }
 0x85f   :  { %v11163_v30 = vpop.eup %10578 }
 0x860   :  { %v11165_v33 = vpop.eup %10580 }
 0x861   :  { %v8410_v34 = vcombine.low %v11163_v30, %v11165_v33  ;;  %7719 = vmatpush1.bf16.msra.mxu1 %v9488_v28  ;;  %v4567_v28 = vld [vmem:[#allocation8 + $0x8a8] sm:$0xff] }
 0x862   :  { %7720 = vmatprep.subr.bf16.mxu1 %v9521_v29  ;;  %v9330_v29 = vcombine.low %v4519_v14, %v4535_v15  ;;  %v9363_v31 = vcombine.high %v4551_v27, %v4567_v28  ;;  %v4791_v14 = vld [vmem:[#allocation8 + $0xfa8] sm:$0xff] }
 0x865   :  { %7721 = vmatpush1.bf16.msra.mxu1 %v9520_v35  ;;  %v4599_v35 = vld [vmem:[#allocation8 + $0x9a8] sm:$0xff] }
 0x866   :  { %7722 = vmatprep.subr.bf16.mxu1 %v9553_v36  ;;  %v9362_v36 = vcombine.low %v4551_v27, %v4567_v28  ;;  %v9395_v37 = vcombine.high %v4583_v32, %v4599_v35 }
 0x869   :  { %7723 = vmatpush1.bf16.msra.mxu1 %v9552_v39  ;;  %v4631_v39 = vld [vmem:[#allocation8 + $0xaa8] sm:$0xff] }
 0x86a   :  { %7724 = vmatprep.subr.bf16.mxu1 %v9585_v40  ;;  %v9394_v40 = vcombine.low %v4583_v32, %v4599_v35  ;;  %v9427_v43 = vcombine.high %v4615_v20, %v4631_v39 }
 0x86d   :  { %7725 = vmatpush1.bf16.msra.mxu1 %v9584_v44 }
 0x86e   :  { %7735 = vmatprep.subr.bf16.mxu1 %v9107_v45 }
 0x870   :  { %7727 = vmatmul.mubr.bf16.vlgmr.msra.gmra.mrb[20].mxu1 %v11146_v7 }
 0x871   :  { %7736 = vmatpush1.bf16.msra.mxu1 %v9106_v48  ;;  %7767 = vmatprep.mubr.bf16.mxu1 %v11144_v6 }
 0x872   :  { %7737 = vmatprep.subr.bf16.mxu1 %v9139_v49  ;;  %v9426_v49 = vcombine.low %v4615_v20, %v4631_v39 }
 0x875   :  { %7738 = vmatpush1.bf16.msra.mxu1 %v9138_v52  ;;  %v8413_v52 = vunpack.c.l.s4 %v10855_v51 }
 0x876   :  { %7739 = vmatprep.subr.bf16.mxu1 %v9171_v16  ;;  %v4679_v16 = vld [vmem:[#allocation8 + $0xc28] sm:$0xff] }
 0x879   :  { %7740 = vmatpush1.bf16.msra.mxu1 %v9170_v55  ;;  %v9491_v55 = vcombine.high %v4679_v16, %v4695_v53 }
 0x87a   :  { %7741 = vmatprep.subr.bf16.mxu1 %v9203_v38  ;;  %v8414_v38 = vunpack.c.0.s8 %v8413_v52 }
 0x87c   :  { %v11182_v62 = vsub.s32 %v8414_v38, %v10960_v12 }
 0x87d   :  { %7742 = vmatpush1.bf16.msra.mxu1 %v9202_v59  ;;  %v9490_v59 = vcombine.low %v4679_v16, %v4695_v53  ;;  %v4520_v53 = vld [vmem:[#allocation8 + $0x730] sm:$0xff] }
 0x87e   :  { %7743 = vmatprep.subr.bf16.mxu1 %v9235_v60  ;;  %v9523_v60 = vcombine.high %v4711_v57, %v4727_v58 }
 0x881   :  { %7744 = vmatpush1.bf16.msra.mxu1 %v9234_v2  ;;  %v4743_v2 = vld [vmem:[#allocation8 + $0xe28] sm:$0xff] }
 0x882   :  { %7745 = vmatprep.subr.bf16.mxu1 %v9267_v4  ;;  %v4759_v4 = vld [vmem:[#allocation8 + $0xea8] sm:$0xff] }
 0x883   :  { %v7605_v13 = vpop.f32.mrb[8].mxu1 }
 0x884   :  { %v7606_v17 = vadd.f32 %v7605_v13, %v4821_v9  ;;  %v7607_v18 = vpop.f32.mrb[9].mxu1  ;;  %v9522_v9 = vcombine.low %v4711_v57, %v4727_v58  ;;  %v4775_v13 = vld [vmem:[#allocation8 + $0xf28] sm:$0xff] }
 0x885   :  { %v7608_v19 = vadd.f32 %v7607_v18, %v4825_v56  ;;  %v7609_v21 = vpop.f32.mrb[10].mxu1  ;;  %7746 = vmatpush1.bf16.msra.mxu1 %v9266_v10  ;;  %v9555_v56 = vcombine.high %v4743_v2, %v4759_v4  ;;  %v8418_v10 = vrot.slane %v8410_v34, %v11182_v62  ;;  %v9587_v18 = vcombine.high %v4775_v13, %v4791_v14  ;;  %v4360_v34 = vld [vmem:[#allocation8 + $0x230] sm:$0xff] }
 0x886   :  { %v9610_v23 = vmul.f32 -1.442695, %v7606_v17  ;;  %v7610_v24 = vpop.f32.mrb[11].mxu1  ;;  %7747 = vmatprep.subr.bf16.mxu1 %v9299_v11  ;;  %v9554_v17 = vcombine.low %v4743_v2, %v4759_v4  ;;  %v4312_v21 = vld [vmem:[#allocation8 + $0xb0] sm:$0xff] }
 0x887   :  { %v9611_v26 = vmul.f32 -1.442695, %v7608_v19  ;;  %v4296_v19 = vld [vmem:[#allocation8 + $0x30] sm:$0xff] }
 0x888   :  { %10582 = vpow2.f32 %v9610_v23  ;;  %v9109_v23 = vcombine.high %v4296_v19, %v4312_v21  ;;  %v4328_v24 = vld [vmem:[#allocation8 + $0x130] sm:$0xff]  ;;  %v9108_v30 = vcombine.low %v4296_v19, %v4312_v21 }
 0x889   :  { %10584 = vpow2.f32 %v9611_v26  ;;  %7748 = vmatpush1.bf16.msra.mxu1 %v9298_v22  ;;  %v9586_v22 = vcombine.low %v4775_v13, %v4791_v14  ;;  %v4376_v26 = vld [vmem:[#allocation8 + $0x2b0] sm:$0xff] }
 0x88a   :  { %7749 = vmatprep.subr.bf16.mxu1 %v9331_v25  ;;  %v4344_v25 = vld [vmem:[#allocation8 + $0x1b0] sm:$0xff]  ;;  %v9173_v28 = vcombine.high %v4360_v34, %v4376_v26  ;;  %v9172_v32 = vcombine.low %v4360_v34, %v4376_v26 }
 0x88b   :  { %v9141_v33 = vcombine.high %v4328_v24, %v4344_v25  ;;  %v9140_v27 = vcombine.low %v4328_v24, %v4344_v25  ;;  %v4648_v24 = vld [vmem:[#allocation8 + $0xb30] sm:$0xff] }
 0x88c   :  { %v4664_v25 = vld [vmem:[#allocation8 + $0xbb0] sm:$0xff] }
 0x88d   :  { %7750 = vmatpush1.bf16.msra.mxu1 %v9330_v29  ;;  %v4392_v29 = vld [vmem:[#allocation8 + $0x330] sm:$0xff]  ;;  %v9461_v34 = vcombine.high %v4648_v24, %v4664_v25 }
 0x88e   :  { %7751 = vmatprep.subr.bf16.mxu1 %v9363_v31  ;;  %v4408_v31 = vld [vmem:[#allocation8 + $0x3b0] sm:$0xff] }
 0x88f   :  { %v9205_v35 = vcombine.high %v4392_v29, %v4408_v31  ;;  %v9204_v20 = vcombine.low %v4392_v29, %v4408_v31  ;;  %v4680_v26 = vld [vmem:[#allocation8 + $0xc30] sm:$0xff] }
 0x890   :  { %v4712_v31 = vld [vmem:[#allocation8 + $0xd30] sm:$0xff] }
 0x891   :  { %7752 = vmatpush1.bf16.msra.mxu1 %v9362_v36  ;;  %v4424_v36 = vld [vmem:[#allocation8 + $0x430] sm:$0xff] }
 0x892   :  { %v10583_v42 = vpop.eup %10582  ;;  %7753 = vmatprep.subr.bf16.mxu1 %v9395_v37  ;;  %v4440_v37 = vld [vmem:[#allocation8 + $0x4b0] sm:$0xff] }
 0x893   :  { %v10585_v44 = vpop.eup %10584  ;;  %v8284_v45 = vadd.f32 1.0, %v10583_v42  ;;  %v9237_v39 = vcombine.high %v4424_v36, %v4440_v37  ;;  %v4472_v42 = vld [vmem:[#allocation8 + $0x5b0] sm:$0xff] }
 0x894   :  { %v8285_v48 = vadd.f32 1.0, %v10585_v44  ;;  %v9236_v44 = vcombine.low %v4424_v36, %v4440_v37 }
 0x895   :  { %10586 = vrcp.f32 %v8284_v45  ;;  %7754 = vmatpush1.bf16.msra.mxu1 %v9394_v40  ;;  %v4456_v40 = vld [vmem:[#allocation8 + $0x530] sm:$0xff]  ;;  %v11195_v45 = vsub.s32 5, %v10960_v12 }
 0x896   :  { %10588 = vrcp.f32 %v8285_v48  ;;  %7755 = vmatprep.subr.bf16.mxu1 %v9427_v43  ;;  %v11192_v43 = vsub.s32 4, %v10960_v12  ;;  %v9269_v46 = vcombine.high %v4456_v40, %v4472_v42  ;;  %v4504_v48 = vld [vmem:[#allocation8 + $0x6b0] sm:$0xff]  ;;  %v9268_v51 = vcombine.low %v4456_v40, %v4472_v42 }
 0x897   :  { %v9301_v52 = vcombine.high %v4488_v47, %v4504_v48 }
 0x899   :  { %7756 = vmatpush1.bf16.msra.mxu1 %v9426_v49  ;;  %v4829_v49 = vrot.slane %v11157_v41, %v11192_v43 }
 0x89a   :  { %7757 = vmatprep.subr.bf16.mxu1 %v9459_v50  ;;  %v4833_v50 = vrot.slane %v11157_v41, %v11195_v45 }
 0x89d   :  { %7758 = vmatpush1.bf16.msra.mxu1 %v9458_v54  ;;  %v4536_v54 = vld [vmem:[#allocation8 + $0x7b0] sm:$0xff] }
 0x89e   :  { %7759 = vmatprep.subr.bf16.mxu1 %v9491_v55  ;;  %v9333_v2 = vcombine.high %v4520_v53, %v4536_v54 }
 0x89f   :  { %v10587_v61 = vpop.eup %10586 }
 0x8a0   :  { %v10589_v5 = vpop.eup %10588 }
 0x8a1   :  { %v8411_v8 = vcombine.low %v10587_v61, %v10589_v5  ;;  %7760 = vmatpush1.bf16.msra.mxu1 %v9490_v59  ;;  %v9300_v59 = vcombine.low %v4488_v47, %v4504_v48  ;;  %v4552_v5 = vld [vmem:[#allocation8 + $0x830] sm:$0xff] }
 0x8a2   :  { %7761 = vmatprep.subr.bf16.mxu1 %v9523_v60  ;;  %v4776_v47 = vld [vmem:[#allocation8 + $0xf30] sm:$0xff] }
 0x8a3   :  { %v8425_v11 = vrot.slane %v8411_v8, %v11182_v62  ;;  %v4568_v8 = vld [vmem:[#allocation8 + $0x8b0] sm:$0xff] }
 0x8a4   :  { %v9364_v13 = vcombine.low %v4552_v5, %v4568_v8  ;;  %v4792_v48 = vld [vmem:[#allocation8 + $0xfb0] sm:$0xff] }
 0x8a5   :  { %v8426_v15 = vcombine.low %v8418_v10, %v8425_v11  ;;  %7762 = vmatpush1.bf16.msra.mxu1 %v9522_v9  ;;  %v9332_v9 = vcombine.low %v4520_v53, %v4536_v54  ;;  %v4584_v10 = vld [vmem:[#allocation8 + $0x930] sm:$0xff]  ;;  %v4329_v54 = vld [vmem:[#allocation8 + $0x138] sm:$0xff] }
 0x8a6   :  { %7763 = vmatprep.subr.bf16.mxu1 %v9555_v56  ;;  %v9365_v56 = vcombine.high %v4552_v5, %v4568_v8  ;;  %v4600_v11 = vld [vmem:[#allocation8 + $0x9b0] sm:$0xff] }
 0x8a7   :  { %8554 = vst [vmem:[#allocation11] sm:$0xff] %v8426_v15  ;;  %v9397_v14 = vcombine.high %v4584_v10, %v4600_v11  ;;  %v4616_v15 = vld [vmem:[#allocation8 + $0xa30] sm:$0xff] }
 0x8a9   :  { %7764 = vmatpush1.bf16.msra.mxu1 %v9554_v17  ;;  %v4632_v17 = vld [vmem:[#allocation8 + $0xab0] sm:$0xff] }
 0x8aa   :  { %7765 = vmatprep.subr.bf16.mxu1 %v9587_v18  ;;  %v9396_v18 = vcombine.low %v4584_v10, %v4600_v11  ;;  %v9429_v21 = vcombine.high %v4616_v15, %v4632_v17 }
 0x8ad   :  { %7766 = vmatpush1.bf16.msra.mxu1 %v9586_v22 }
 0x8ae   :  { %7776 = vmatprep.subr.bf16.mxu1 %v9109_v23 }
 0x8b0   :  { %7768 = vmatmul.mubr.bf16.vlgmr.msra.gmra.mrb[24].mxu1 %v11146_v7 }
 0x8b1   :  { %7777 = vmatpush1.bf16.msra.mxu1 %v9108_v30  ;;  %7808 = vmatprep.mubr.bf16.mxu1 %v11144_v6 }
 0x8b2   :  { %7778 = vmatprep.subr.bf16.mxu1 %v9141_v33  ;;  %v9428_v33 = vcombine.low %v4616_v15, %v4632_v17  ;;  %v11210_v15 = vsub.s32 6, %v10960_v12 }
 0x8b5   :  { %7779 = vmatpush1.bf16.msra.mxu1 %v9140_v27  ;;  %v4696_v27 = vld [vmem:[#allocation8 + $0xcb0] sm:$0xff] }
 0x8b6   :  { %7780 = vmatprep.subr.bf16.mxu1 %v9173_v28  ;;  %v9460_v28 = vcombine.low %v4648_v24, %v4664_v25  ;;  %v9493_v29 = vcombine.high %v4680_v26, %v4696_v27 }
 0x8b9   :  { %7781 = vmatpush1.bf16.msra.mxu1 %v9172_v32  ;;  %v4728_v32 = vld [vmem:[#allocation8 + $0xdb0] sm:$0xff] }
 0x8ba   :  { %7782 = vmatprep.subr.bf16.mxu1 %v9205_v35  ;;  %v9492_v35 = vcombine.low %v4680_v26, %v4696_v27  ;;  %v9525_v36 = vcombine.high %v4712_v31, %v4728_v32  ;;  %v4537_v26 = vld [vmem:[#allocation8 + $0x7b8] sm:$0xff] }
 0x8bd   :  { %7783 = vmatpush1.bf16.msra.mxu1 %v9204_v20  ;;  %v4744_v20 = vld [vmem:[#allocation8 + $0xe30] sm:$0xff] }
 0x8be   :  { %7784 = vmatprep.subr.bf16.mxu1 %v9237_v39  ;;  %v4760_v39 = vld [vmem:[#allocation8 + $0xeb0] sm:$0xff] }
 0x8c1   :  { %7785 = vmatpush1.bf16.msra.mxu1 %v9236_v44  ;;  %v9524_v44 = vcombine.low %v4712_v31, %v4728_v32 }
 0x8c2   :  { %7786 = vmatprep.subr.bf16.mxu1 %v9269_v46  ;;  %v9557_v46 = vcombine.high %v4744_v20, %v4760_v39 }
 0x8c3   :  { %v7646_v16 = vpop.f32.mrb[12].mxu1 }
 0x8c4   :  { %v7647_v55 = vadd.f32 %v7646_v16, %v4829_v49  ;;  %v7648_v38 = vpop.f32.mrb[13].mxu1  ;;  %v9556_v49 = vcombine.low %v4744_v20, %v4760_v39  ;;  %v9588_v16 = vcombine.low %v4776_v47, %v4792_v48  ;;  %v4553_v39 = vld [vmem:[#allocation8 + $0x838] sm:$0xff] }
 0x8c5   :  { %v7649_v57 = vadd.f32 %v7648_v38, %v4833_v50  ;;  %v7650_v58 = vpop.f32.mrb[14].mxu1  ;;  %7787 = vmatpush1.bf16.msra.mxu1 %v9268_v51  ;;  %v9589_v50 = vcombine.high %v4776_v47, %v4792_v48  ;;  %v4297_v51 = vld [vmem:[#allocation8 + $0x38] sm:$0xff] }
 0x8c6   :  { %v9612_v60 = vmul.f32 -1.442695, %v7647_v55  ;;  %v7651_v61 = vpop.f32.mrb[15].mxu1  ;;  %7788 = vmatprep.subr.bf16.mxu1 %v9301_v52  ;;  %v4313_v52 = vld [vmem:[#allocation8 + $0xb8] sm:$0xff] }
 0x8c7   :  { %v9613_v4 = vmul.f32 -1.442695, %v7649_v57  ;;  %v9111_v53 = vcombine.high %v4297_v51, %v4313_v52  ;;  %v4345_v55 = vld [vmem:[#allocation8 + $0x1b8] sm:$0xff]  ;;  %v9110_v38 = vcombine.low %v4297_v51, %v4313_v52 }
 0x8c8   :  { %10590 = vpow2.f32 %v9612_v60  ;;  %v9143_v57 = vcombine.high %v4329_v54, %v4345_v55  ;;  %v4361_v58 = vld [vmem:[#allocation8 + $0x238] sm:$0xff]  ;;  %v9142_v60 = vcombine.low %v4329_v54, %v4345_v55 }
 0x8c9   :  { %10592 = vpow2.f32 %v9613_v4  ;;  %7789 = vmatpush1.bf16.msra.mxu1 %v9300_v59  ;;  %v4377_v59 = vld [vmem:[#allocation8 + $0x2b8] sm:$0xff] }
 0x8ca   :  { %7790 = vmatprep.subr.bf16.mxu1 %v9333_v2  ;;  %v9175_v61 = vcombine.high %v4361_v58, %v4377_v59  ;;  %v4393_v2 = vld [vmem:[#allocation8 + $0x338] sm:$0xff]  ;;  %v9174_v5 = vcombine.low %v4361_v58, %v4377_v59 }
 0x8cb   :  { %v4409_v4 = vld [vmem:[#allocation8 + $0x3b8] sm:$0xff] }
 0x8cc   :  { %v9207_v8 = vcombine.high %v4393_v2, %v4409_v4  ;;  %v9206_v10 = vcombine.low %v4393_v2, %v4409_v4  ;;  %v4585_v47 = vld [vmem:[#allocation8 + $0x938] sm:$0xff] }
 0x8cd   :  { %7791 = vmatpush1.bf16.msra.mxu1 %v9332_v9  ;;  %v4425_v9 = vld [vmem:[#allocation8 + $0x438] sm:$0xff] }
 0x8ce   :  { %7792 = vmatprep.subr.bf16.mxu1 %v9365_v56  ;;  %v4441_v56 = vld [vmem:[#allocation8 + $0x4b8] sm:$0xff] }
 0x8cf   :  { %v9239_v11 = vcombine.high %v4425_v9, %v4441_v56  ;;  %v9238_v17 = vcombine.low %v4425_v9, %v4441_v56  ;;  %v4601_v48 = vld [vmem:[#allocation8 + $0x9b8] sm:$0xff] }
 0x8d0   :  { %v4617_v51 = vld [vmem:[#allocation8 + $0xa38] sm:$0xff] }
 0x8d1   :  { %7793 = vmatpush1.bf16.msra.mxu1 %v9364_v13  ;;  %v4457_v13 = vld [vmem:[#allocation8 + $0x538] sm:$0xff] }
 0x8d2   :  { %v10591_v19 = vpop.eup %10590  ;;  %7794 = vmatprep.subr.bf16.mxu1 %v9397_v14  ;;  %v4473_v14 = vld [vmem:[#allocation8 + $0x5b8] sm:$0xff] }
 0x8d3   :  { %v10593_v22 = vpop.eup %10592  ;;  %v8286_v23 = vadd.f32 1.0, %v10591_v19  ;;  %v9271_v19 = vcombine.high %v4457_v13, %v4473_v14  ;;  %v9270_v25 = vcombine.low %v4457_v13, %v4473_v14  ;;  %v4633_v52 = vld [vmem:[#allocation8 + $0xab8] sm:$0xff] }
 0x8d4   :  { %v8287_v30 = vadd.f32 1.0, %v10593_v22  ;;  %v4505_v22 = vld [vmem:[#allocation8 + $0x6b8] sm:$0xff]  ;;  %v9431_v54 = vcombine.high %v4617_v51, %v4633_v52 }
 0x8d5   :  { %10594 = vrcp.f32 %v8286_v23  ;;  %7795 = vmatpush1.bf16.msra.mxu1 %v9396_v18  ;;  %v11213_v18 = vsub.s32 7, %v10960_v12  ;;  %v4837_v23 = vrot.slane %v11157_v41, %v11210_v15  ;;  %v4665_v58 = vld [vmem:[#allocation8 + $0xbb8] sm:$0xff] }
 0x8d6   :  { %10596 = vrcp.f32 %v8287_v30  ;;  %7796 = vmatprep.subr.bf16.mxu1 %v9429_v21  ;;  %v4489_v21 = vld [vmem:[#allocation8 + $0x638] sm:$0xff] }
 0x8d7   :  { %v4841_v24 = vrot.slane %v11157_v41, %v11213_v18  ;;  %v9303_v30 = vcombine.high %v4489_v21, %v4505_v22  ;;  %v9302_v31 = vcombine.low %v4489_v21, %v4505_v22  ;;  %v4681_v2 = vld [vmem:[#allocation8 + $0xc38] sm:$0xff] }
 0x8d8   :  { %v4697_v4 = vld [vmem:[#allocation8 + $0xcb8] sm:$0xff] }
 0x8d9   :  { %7797 = vmatpush1.bf16.msra.mxu1 %v9428_v33  ;;  %v4713_v9 = vld [vmem:[#allocation8 + $0xd38] sm:$0xff] }
 0x8da   :  { %7798 = vmatprep.subr.bf16.mxu1 %v9461_v34  ;;  %v4521_v34 = vld [vmem:[#allocation8 + $0x738] sm:$0xff] }
 0x8db   :  { %v9334_v41 = vcombine.low %v4521_v34, %v4537_v26  ;;  %v4729_v56 = vld [vmem:[#allocation8 + $0xdb8] sm:$0xff] }
 0x8dc   :  { %v4745_v14 = vld [vmem:[#allocation8 + $0xe38] sm:$0xff]  ;;  %v9526_v22 = vcombine.low %v4713_v9, %v4729_v56 }
 0x8dd   :  { %7799 = vmatpush1.bf16.msra.mxu1 %v9460_v28 }
 0x8de   :  { %7800 = vmatprep.subr.bf16.mxu1 %v9493_v29 }
 0x8df   :  { %v11201_v37 = vpop.eup %10594 }
 0x8e0   :  { %v11203_v40 = vpop.eup %10596 }
 0x8e1   :  { %v8427_v42 = vcombine.low %v11201_v37, %v11203_v40  ;;  %7801 = vmatpush1.bf16.msra.mxu1 %v9492_v35 }
 0x8e2   :  { %7802 = vmatprep.subr.bf16.mxu1 %v9525_v36  ;;  %v9335_v36 = vcombine.high %v4521_v34, %v4537_v26 }
 0x8e5   :  { %7803 = vmatpush1.bf16.msra.mxu1 %v9524_v44  ;;  %v4569_v44 = vld [vmem:[#allocation8 + $0x8b8] sm:$0xff] }
 0x8e6   :  { %7804 = vmatprep.subr.bf16.mxu1 %v9557_v46  ;;  %v9367_v46 = vcombine.high %v4553_v39, %v4569_v44 }
 0x8e9   :  { %7805 = vmatpush1.bf16.msra.mxu1 %v9556_v49  ;;  %v9366_v49 = vcombine.low %v4553_v39, %v4569_v44  ;;  %v4394_v44 = vld [vmem:[#allocation8 + $0x340] sm:$0xff] }
 0x8ea   :  { %7806 = vmatprep.subr.bf16.mxu1 %v9589_v50  ;;  %v9399_v50 = vcombine.high %v4585_v47, %v4601_v48 }
 0x8ed   :  { %7807 = vmatpush1.bf16.msra.mxu1 %v9588_v16  ;;  %v9398_v16 = vcombine.low %v4585_v47, %v4601_v48  ;;  %v4426_v48 = vld [vmem:[#allocation8 + $0x440] sm:$0xff] }
 0x8ee   :  { %7817 = vmatprep.subr.bf16.mxu1 %v9111_v53 }
 0x8f0   :  { %7809 = vmatmul.mubr.bf16.vlgmr.msra.gmra.mrb[28].mxu1 %v11146_v7 }
 0x8f1   :  { %7818 = vmatpush1.bf16.msra.mxu1 %v9110_v38  ;;  %7849 = vmatprep.mubr.bf16.mxu1 %v11144_v6 }
 0x8f2   :  { %7819 = vmatprep.subr.bf16.mxu1 %v9143_v57  ;;  %v4649_v57 = vld [vmem:[#allocation8 + $0xb38] sm:$0xff] }
 0x8f5   :  { %7820 = vmatpush1.bf16.msra.mxu1 %v9142_v60  ;;  %v9430_v60 = vcombine.low %v4617_v51, %v4633_v52  ;;  %v4458_v52 = vld [vmem:[#allocation8 + $0x540] sm:$0xff] }
 0x8f6   :  { %7821 = vmatprep.subr.bf16.mxu1 %v9175_v61  ;;  %v9463_v61 = vcombine.high %v4649_v57, %v4665_v58 }
 0x8f9   :  { %7822 = vmatpush1.bf16.msra.mxu1 %v9174_v5  ;;  %v9462_v5 = vcombine.low %v4649_v57, %v4665_v58  ;;  %v4506_v57 = vld [vmem:[#allocation8 + $0x6c0] sm:$0xff] }
 0x8fa   :  { %7823 = vmatprep.subr.bf16.mxu1 %v9207_v8  ;;  %v9495_v8 = vcombine.high %v4681_v2, %v4697_v4 }
 0x8fd   :  { %7824 = vmatpush1.bf16.msra.mxu1 %v9206_v10  ;;  %v9494_v10 = vcombine.low %v4681_v2, %v4697_v4  ;;  %v4522_v4 = vld [vmem:[#allocation8 + $0x740] sm:$0xff] }
 0x8fe   :  { %7825 = vmatprep.subr.bf16.mxu1 %v9239_v11  ;;  %v9527_v11 = vcombine.high %v4713_v9, %v4729_v56 }
 0x901   :  { %7826 = vmatpush1.bf16.msra.mxu1 %v9238_v17  ;;  %v4761_v17 = vld [vmem:[#allocation8 + $0xeb8] sm:$0xff] }
 0x902   :  { %7827 = vmatprep.subr.bf16.mxu1 %v9271_v19  ;;  %v9558_v26 = vcombine.low %v4745_v14, %v4761_v17 }
 0x903   :  { %v7687_v33 = vpop.f32.mrb[16].mxu1 }
 0x904   :  { %v7688_v27 = vadd.f32 %v7687_v33, %v4837_v23  ;;  %v7689_v12 = vpop.f32.mrb[17].mxu1  ;;  %v9559_v23 = vcombine.high %v4745_v14, %v4761_v17  ;;  %v4793_v33 = vld [vmem:[#allocation8 + $0xfb8] sm:$0xff] }
 0x905   :  { %v7690_v28 = vadd.f32 %v7689_v12, %v4841_v24  ;;  %v7691_v29 = vpop.f32.mrb[18].mxu1  ;;  %7828 = vmatpush1.bf16.msra.mxu1 %v9270_v25  ;;  %v8435_v24 = vrot.slane %v8427_v42, %v11182_v62  ;;  %v4298_v12 = vld [vmem:[#allocation8 + $0x40] sm:$0xff] }
 0x906   :  { %v9614_v32 = vmul.f32 -1.442695, %v7688_v27  ;;  %v7692_v35 = vpop.f32.mrb[19].mxu1  ;;  %7829 = vmatprep.subr.bf16.mxu1 %v9303_v30  ;;  %v4777_v30 = vld [vmem:[#allocation8 + $0xf38] sm:$0xff]  ;;  %v4362_v42 = vld [vmem:[#allocation8 + $0x240] sm:$0xff] }
 0x907   :  { %v9615_v20 = vmul.f32 -1.442695, %v7690_v28  ;;  %v9591_v27 = vcombine.high %v4777_v30, %v4793_v33  ;;  %v4314_v28 = vld [vmem:[#allocation8 + $0xc0] sm:$0xff]  ;;  %v9590_v29 = vcombine.low %v4777_v30, %v4793_v33 }
 0x908   :  { %10598 = vpow2.f32 %v9614_v32  ;;  %v4330_v32 = vld [vmem:[#allocation8 + $0x140] sm:$0xff]  ;;  %v9112_v37 = vcombine.low %v4298_v12, %v4314_v28 }
 0x909   :  { %10600 = vpow2.f32 %v9615_v20  ;;  %7830 = vmatpush1.bf16.msra.mxu1 %v9302_v31  ;;  %v9113_v31 = vcombine.high %v4298_v12, %v4314_v28  ;;  %v4346_v35 = vld [vmem:[#allocation8 + $0x1c0] sm:$0xff] }
 0x90a   :  { %7831 = vmatprep.subr.bf16.mxu1 %v9335_v36  ;;  %v9145_v40 = vcombine.high %v4330_v32, %v4346_v35  ;;  %v4378_v36 = vld [vmem:[#allocation8 + $0x2c0] sm:$0xff]  ;;  %v9144_v20 = vcombine.low %v4330_v32, %v4346_v35 }
 0x90b   :  { %v9177_v39 = vcombine.high %v4362_v42, %v4378_v36  ;;  %v4602_v30 = vld [vmem:[#allocation8 + $0x9c0] sm:$0xff] }
 0x90c   :  { %v4650_v35 = vld [vmem:[#allocation8 + $0xb40] sm:$0xff] }
 0x90d   :  { %7832 = vmatpush1.bf16.msra.mxu1 %v9334_v41  ;;  %v4410_v41 = vld [vmem:[#allocation8 + $0x3c0] sm:$0xff] }
 0x90e   :  { %7833 = vmatprep.subr.bf16.mxu1 %v9367_v46  ;;  %v9176_v46 = vcombine.low %v4362_v42, %v4378_v36  ;;  %v9209_v47 = vcombine.high %v4394_v44, %v4410_v41 }
 0x911   :  { %7834 = vmatpush1.bf16.msra.mxu1 %v9366_v49  ;;  %v4442_v49 = vld [vmem:[#allocation8 + $0x4c0] sm:$0xff] }
 0x912   :  { %v10599_v53 = vpop.eup %10598  ;;  %7835 = vmatprep.subr.bf16.mxu1 %v9399_v50  ;;  %v9208_v50 = vcombine.low %v4394_v44, %v4410_v41  ;;  %v9241_v51 = vcombine.high %v4426_v48, %v4442_v49 }
 0x913   :  { %v10601_v55 = vpop.eup %10600  ;;  %v8288_v38 = vadd.f32 1.0, %v10599_v53  ;;  %v9240_v53 = vcombine.low %v4426_v48, %v4442_v49 }
 0x914   :  { %v8289_v59 = vadd.f32 1.0, %v10601_v55 }
 0x915   :  { %10602 = vrcp.f32 %v8288_v38  ;;  %7836 = vmatpush1.bf16.msra.mxu1 %v9398_v16  ;;  %v4474_v16 = vld [vmem:[#allocation8 + $0x5c0] sm:$0xff] }
 0x916   :  { %10604 = vrcp.f32 %v8289_v59  ;;  %7837 = vmatprep.subr.bf16.mxu1 %v9431_v54  ;;  %v11226_v54 = vld [vmem:[#allocation10 + $0x8] sm:$0xff]  ;;  %v9273_v55 = vcombine.high %v4458_v52, %v4474_v16  ;;  %v4490_v38 = vld [vmem:[#allocation8 + $0x640] sm:$0xff] }
 0x917   :  { %v4845_v58 = vrot.slane %v11226_v54, %v11132_v63  ;;  %v4849_v59 = vrot.slane %v11226_v54, %v11135_v1 }
 0x919   :  { %7838 = vmatpush1.bf16.msra.mxu1 %v9430_v60  ;;  %v9272_v60 = vcombine.low %v4458_v52, %v4474_v16  ;;  %v4762_v52 = vld [vmem:[#allocation8 + $0xec0] sm:$0xff] }
 0x91a   :  { %7839 = vmatprep.subr.bf16.mxu1 %v9463_v61  ;;  %v9305_v61 = vcombine.high %v4490_v38, %v4506_v57 }
 0x91d   :  { %7840 = vmatpush1.bf16.msra.mxu1 %v9462_v5  ;;  %v4538_v5 = vld [vmem:[#allocation8 + $0x7c0] sm:$0xff] }
 0x91e   :  { %7841 = vmatprep.subr.bf16.mxu1 %v9495_v8  ;;  %v9337_v17 = vcombine.high %v4522_v4, %v4538_v5 }
 0x91f   :  { %v10603_v13 = vpop.eup %10602 }
 0x920   :  { %v10605_v19 = vpop.eup %10604 }
 0x921   :  { %v8428_v21 = vcombine.low %v10603_v13, %v10605_v19  ;;  %7842 = vmatpush1.bf16.msra.mxu1 %v9494_v10 }
 0x922   :  { %7843 = vmatprep.subr.bf16.mxu1 %v9527_v11  ;;  %v9304_v11 = vcombine.low %v4490_v38, %v4506_v57  ;;  %v4778_v57 = vld [vmem:[#allocation8 + $0xf40] sm:$0xff] }
 0x923   :  { %v8442_v25 = vrot.slane %v8428_v21, %v11182_v62  ;;  %v4554_v21 = vld [vmem:[#allocation8 + $0x840] sm:$0xff] }
 0x925   :  { %v8443_v34 = vcombine.low %v8435_v24, %v8442_v25  ;;  %7844 = vmatpush1.bf16.msra.mxu1 %v9526_v22  ;;  %v4570_v22 = vld [vmem:[#allocation8 + $0x8c0] sm:$0xff] }
 0x926   :  { %7845 = vmatprep.subr.bf16.mxu1 %v9559_v23  ;;  %v9336_v23 = vcombine.low %v4522_v4, %v4538_v5  ;;  %v9369_v24 = vcombine.high %v4554_v21, %v4570_v22  ;;  %v4586_v25 = vld [vmem:[#allocation8 + $0x940] sm:$0xff]  ;;  %v9368_v33 = vcombine.low %v4554_v21, %v4570_v22  ;;  %v4411_v21 = vld [vmem:[#allocation8 + $0x3c8] sm:$0xff] }
 0x927   :  { %8555 = vst [vmem:[#allocation11 + $0x8] sm:$0xff] %v8443_v34  ;;  %v9401_v34 = vcombine.high %v4586_v25, %v4602_v30  ;;  %v9400_v12 = vcombine.low %v4586_v25, %v4602_v30  ;;  %v4443_v25 = vld [vmem:[#allocation8 + $0x4c8] sm:$0xff] }
 0x929   :  { %7846 = vmatpush1.bf16.msra.mxu1 %v9558_v26  ;;  %v4618_v26 = vld [vmem:[#allocation8 + $0xa40] sm:$0xff] }
 0x92a   :  { %7847 = vmatprep.subr.bf16.mxu1 %v9591_v27  ;;  %v4634_v27 = vld [vmem:[#allocation8 + $0xac0] sm:$0xff] }
 0x92b   :  { %v9432_v42 = vcombine.low %v4618_v26, %v4634_v27 }
 0x92d   :  { %7848 = vmatpush1.bf16.msra.mxu1 %v9590_v29  ;;  %v9433_v29 = vcombine.high %v4618_v26, %v4634_v27  ;;  %v4475_v26 = vld [vmem:[#allocation8 + $0x5c8] sm:$0xff] }
 0x92e   :  { %7858 = vmatprep.subr.bf16.mxu1 %v9113_v31 }
 0x930   :  { %7850 = vmatmul.mubr.bf16.vlgmr.msra.gmra.mrb[32].mxu1 %v11146_v7 }
 0x931   :  { %7859 = vmatpush1.bf16.msra.mxu1 %v9112_v37  ;;  %7890 = vmatprep.mubr.bf16.mxu1 %v11144_v6  ;;  %v4666_v37 = vld [vmem:[#allocation8 + $0xbc0] sm:$0xff] }
 0x932   :  { %7860 = vmatprep.subr.bf16.mxu1 %v9145_v40  ;;  %v9465_v36 = vcombine.high %v4650_v35, %v4666_v37  ;;  %v9464_v44 = vcombine.low %v4650_v35, %v4666_v37 }
 0x935   :  { %7861 = vmatpush1.bf16.msra.mxu1 %v9144_v20  ;;  %v4682_v20 = vld [vmem:[#allocation8 + $0xc40] sm:$0xff] }
 0x936   :  { %7862 = vmatprep.subr.bf16.mxu1 %v9177_v39  ;;  %v4698_v39 = vld [vmem:[#allocation8 + $0xcc0] sm:$0xff] }
 0x937   :  { %v9497_v41 = vcombine.high %v4682_v20, %v4698_v39  ;;  %v9496_v48 = vcombine.low %v4682_v20, %v4698_v39 }
 0x939   :  { %7863 = vmatpush1.bf16.msra.mxu1 %v9176_v46  ;;  %v4714_v46 = vld [vmem:[#allocation8 + $0xd40] sm:$0xff] }
 0x93a   :  { %7864 = vmatprep.subr.bf16.mxu1 %v9209_v47  ;;  %v4730_v47 = vld [vmem:[#allocation8 + $0xdc0] sm:$0xff] }
 0x93b   :  { %v9529_v49 = vcombine.high %v4714_v46, %v4730_v47 }
 0x93d   :  { %7865 = vmatpush1.bf16.msra.mxu1 %v9208_v50 }
 0x93e   :  { %7866 = vmatprep.subr.bf16.mxu1 %v9241_v51  ;;  %v4746_v51 = vld [vmem:[#allocation8 + $0xe40] sm:$0xff] }
 0x93f   :  { %v9561_v38 = vcombine.high %v4746_v51, %v4762_v52 }
 0x941   :  { %7867 = vmatpush1.bf16.msra.mxu1 %v9240_v53 }
 0x942   :  { %7868 = vmatprep.subr.bf16.mxu1 %v9273_v55  ;;  %v9528_v55 = vcombine.low %v4714_v46, %v4730_v47 }
 0x943   :  { %v7728_v2 = vpop.f32.mrb[20].mxu1 }
 0x944   :  { %v7729_v8 = vadd.f32 %v7728_v2, %v4845_v58  ;;  %v7730_v9 = vpop.f32.mrb[21].mxu1  ;;  %v4794_v58 = vld [vmem:[#allocation8 + $0xfc0] sm:$0xff]  ;;  %v4315_v2 = vld [vmem:[#allocation8 + $0xc8] sm:$0xff] }
 0x945   :  { %v7731_v56 = vadd.f32 %v7730_v9, %v4849_v59  ;;  %v7732_v10 = vpop.f32.mrb[22].mxu1  ;;  %7869 = vmatpush1.bf16.msra.mxu1 %v9272_v60  ;;  %v9560_v59 = vcombine.low %v4746_v51, %v4762_v52  ;;  %v9593_v60 = vcombine.high %v4778_v57, %v4794_v58  ;;  %v9592_v4 = vcombine.low %v4778_v57, %v4794_v58  ;;  %v4347_v9 = vld [vmem:[#allocation8 + $0x1c8] sm:$0xff] }
 0x946   :  { %v9616_v13 = vmul.f32 -1.442695, %v7729_v8  ;;  %v7733_v14 = vpop.f32.mrb[23].mxu1  ;;  %7870 = vmatprep.subr.bf16.mxu1 %v9305_v61  ;;  %v4299_v61 = vld [vmem:[#allocation8 + $0x48] sm:$0xff] }
 0x947   :  { %v9617_v19 = vmul.f32 -1.442695, %v7731_v56  ;;  %v9115_v5 = vcombine.high %v4299_v61, %v4315_v2  ;;  %v4331_v8 = vld [vmem:[#allocation8 + $0x148] sm:$0xff]  ;;  %v9114_v56 = vcombine.low %v4299_v61, %v4315_v2 }
 0x948   :  { %10606 = vpow2.f32 %v9616_v13  ;;  %v9147_v10 = vcombine.high %v4331_v8, %v4347_v9  ;;  %v4379_v13 = vld [vmem:[#allocation8 + $0x2c8] sm:$0xff]  ;;  %v9146_v14 = vcombine.low %v4331_v8, %v4347_v9 }
 0x949   :  { %10608 = vpow2.f32 %v9617_v19  ;;  %7871 = vmatpush1.bf16.msra.mxu1 %v9304_v11  ;;  %v4363_v11 = vld [vmem:[#allocation8 + $0x248] sm:$0xff] }
 0x94a   :  { %7872 = vmatprep.subr.bf16.mxu1 %v9337_v17  ;;  %v9179_v17 = vcombine.high %v4363_v11, %v4379_v13  ;;  %v4395_v19 = vld [vmem:[#allocation8 + $0x348] sm:$0xff]  ;;  %v9178_v22 = vcombine.low %v4363_v11, %v4379_v13 }
 0x94b   :  { %v9210_v30 = vcombine.low %v4395_v19, %v4411_v21  ;;  %v4555_v52 = vld [vmem:[#allocation8 + $0x848] sm:$0xff] }
 0x94c   :  { %v4587_v58 = vld [vmem:[#allocation8 + $0x948] sm:$0xff] }
 0x94d   :  { %7873 = vmatpush1.bf16.msra.mxu1 %v9336_v23  ;;  %v9211_v23 = vcombine.high %v4395_v19, %v4411_v21  ;;  %v4619_v2 = vld [vmem:[#allocation8 + $0xa48] sm:$0xff] }
 0x94e   :  { %7874 = vmatprep.subr.bf16.mxu1 %v9369_v24  ;;  %v4427_v24 = vld [vmem:[#allocation8 + $0x448] sm:$0xff] }
 0x94f   :  { %v9242_v27 = vcombine.low %v4427_v24, %v4443_v25  ;;  %v4651_v11 = vld [vmem:[#allocation8 + $0xb48] sm:$0xff] }
 0x950   :  { %v4667_v13 = vld [vmem:[#allocation8 + $0xbc8] sm:$0xff] }
 0x951   :  { %7875 = vmatpush1.bf16.msra.mxu1 %v9368_v33  ;;  %v9243_v33 = vcombine.high %v4427_v24, %v4443_v25  ;;  %v9467_v19 = vcombine.high %v4651_v11, %v4667_v13  ;;  %v4683_v21 = vld [vmem:[#allocation8 + $0xc48] sm:$0xff] }
 0x952   :  { %v10607_v28 = vpop.eup %10606  ;;  %7876 = vmatprep.subr.bf16.mxu1 %v9401_v34  ;;  %v4459_v34 = vld [vmem:[#allocation8 + $0x548] sm:$0xff] }
 0x953   :  { %v10609_v31 = vpop.eup %10608  ;;  %v8290_v32 = vadd.f32 1.0, %v10607_v28  ;;  %v4491_v28 = vld [vmem:[#allocation8 + $0x648] sm:$0xff]  ;;  %v9274_v35 = vcombine.low %v4459_v34, %v4475_v26 }
 0x954   :  { %v8291_v40 = vadd.f32 1.0, %v10609_v31  ;;  %v4853_v31 = vrot.slane %v11226_v54, %v11172_v0  ;;  %v4715_v25 = vld [vmem:[#allocation8 + $0xd48] sm:$0xff] }
 0x955   :  { %10610 = vrcp.f32 %v8290_v32  ;;  %7877 = vmatpush1.bf16.msra.mxu1 %v9400_v12  ;;  %v9275_v12 = vcombine.high %v4459_v34, %v4475_v26  ;;  %v4857_v32 = vrot.slane %v11226_v54, %v11175_v3 }
 0x956   :  { %10612 = vrcp.f32 %v8291_v40  ;;  %7878 = vmatprep.subr.bf16.mxu1 %v9433_v29  ;;  %v4507_v29 = vld [vmem:[#allocation8 + $0x6c8] sm:$0xff] }
 0x957   :  { %v9307_v37 = vcombine.high %v4491_v28, %v4507_v29  ;;  %v9306_v46 = vcombine.low %v4491_v28, %v4507_v29 }
 0x959   :  { %7879 = vmatpush1.bf16.msra.mxu1 %v9432_v42  ;;  %v4523_v42 = vld [vmem:[#allocation8 + $0x748] sm:$0xff] }
 0x95a   :  { %7880 = vmatprep.subr.bf16.mxu1 %v9465_v36  ;;  %v4539_v36 = vld [vmem:[#allocation8 + $0x7c8] sm:$0xff] }
 0x95d   :  { %7881 = vmatpush1.bf16.msra.mxu1 %v9464_v44 }
 0x95e   :  { %7882 = vmatprep.subr.bf16.mxu1 %v9497_v41 }
 0x95f   :  { %v11232_v50 = vpop.eup %10610 }
 0x960   :  { %v11234_v16 = vpop.eup %10612 }
 0x961   :  { %v8444_v53 = vcombine.low %v11232_v50, %v11234_v16  ;;  %7883 = vmatpush1.bf16.msra.mxu1 %v9496_v48 }
 0x962   :  { %7884 = vmatprep.subr.bf16.mxu1 %v9529_v49  ;;  %v9339_v49 = vcombine.high %v4523_v42, %v4539_v36 }
 0x965   :  { %7885 = vmatpush1.bf16.msra.mxu1 %v9528_v55  ;;  %v4571_v55 = vld [vmem:[#allocation8 + $0x8c8] sm:$0xff] }
 0x966   :  { %7886 = vmatprep.subr.bf16.mxu1 %v9561_v38  ;;  %v9338_v38 = vcombine.low %v4523_v42, %v4539_v36  ;;  %v9371_v57 = vcombine.high %v4555_v52, %v4571_v55  ;;  %v4795_v42 = vld [vmem:[#allocation8 + $0xfc8] sm:$0xff] }
 0x969   :  { %7887 = vmatpush1.bf16.msra.mxu1 %v9560_v59  ;;  %v4603_v59 = vld [vmem:[#allocation8 + $0x9c8] sm:$0xff] }
 0x96a   :  { %7888 = vmatprep.subr.bf16.mxu1 %v9593_v60  ;;  %v9370_v60 = vcombine.low %v4555_v52, %v4571_v55  ;;  %v9403_v61 = vcombine.high %v4587_v58, %v4603_v59 }
 0x96d   :  { %7889 = vmatpush1.bf16.msra.mxu1 %v9592_v4  ;;  %v4635_v4 = vld [vmem:[#allocation8 + $0xac8] sm:$0xff] }
 0x96e   :  { %7899 = vmatprep.subr.bf16.mxu1 %v9115_v5  ;;  %v9402_v5 = vcombine.low %v4587_v58, %v4603_v59  ;;  %v9435_v9 = vcombine.high %v4619_v2, %v4635_v4 }
 0x970   :  { %7891 = vmatmul.mubr.bf16.vlgmr.msra.gmra.mrb[36].mxu1 %v11146_v7 }
 0x971   :  { %7900 = vmatpush1.bf16.msra.mxu1 %v9114_v56  ;;  %7931 = vmatprep.mubr.bf16.mxu1 %v11144_v6 }
 0x972   :  { %7901 = vmatprep.subr.bf16.mxu1 %v9147_v10 }
 0x975   :  { %7902 = vmatpush1.bf16.msra.mxu1 %v9146_v14 }
 0x976   :  { %7903 = vmatprep.subr.bf16.mxu1 %v9179_v17  ;;  %v9434_v17 = vcombine.low %v4619_v2, %v4635_v4 }
 0x979   :  { %7904 = vmatpush1.bf16.msra.mxu1 %v9178_v22  ;;  %v4699_v22 = vld [vmem:[#allocation8 + $0xcc8] sm:$0xff] }
 0x97a   :  { %7905 = vmatprep.subr.bf16.mxu1 %v9211_v23  ;;  %v9466_v23 = vcombine.low %v4651_v11, %v4667_v13  ;;  %v9499_v24 = vcombine.high %v4683_v21, %v4699_v22  ;;  %v4508_v11 = vld [vmem:[#allocation8 + $0x6d0] sm:$0xff]  ;;  %v4861_v13 = vrot.slane %v11226_v54, %v11192_v43 }
 0x97d   :  { %7906 = vmatpush1.bf16.msra.mxu1 %v9210_v30  ;;  %v4731_v30 = vld [vmem:[#allocation8 + $0xdc8] sm:$0xff] }
 0x97e   :  { %7907 = vmatprep.subr.bf16.mxu1 %v9243_v33  ;;  %v9498_v33 = vcombine.low %v4683_v21, %v4699_v22  ;;  %v9531_v34 = vcombine.high %v4715_v25, %v4731_v30  ;;  %v4524_v22 = vld [vmem:[#allocation8 + $0x750] sm:$0xff] }
 0x981   :  { %7908 = vmatpush1.bf16.msra.mxu1 %v9242_v27  ;;  %v4747_v27 = vld [vmem:[#allocation8 + $0xe48] sm:$0xff] }
 0x982   :  { %7909 = vmatprep.subr.bf16.mxu1 %v9275_v12  ;;  %v4763_v12 = vld [vmem:[#allocation8 + $0xec8] sm:$0xff] }
 0x983   :  { %v7769_v40 = vpop.f32.mrb[24].mxu1 }
 0x984   :  { %v7770_v20 = vadd.f32 %v7769_v40, %v4853_v31  ;;  %v7771_v39 = vpop.f32.mrb[25].mxu1  ;;  %v9530_v31 = vcombine.low %v4715_v25, %v4731_v30  ;;  %v4779_v40 = vld [vmem:[#allocation8 + $0xf48] sm:$0xff] }
 0x985   :  { %v7772_v44 = vadd.f32 %v7771_v39, %v4857_v32  ;;  %v7773_v41 = vpop.f32.mrb[26].mxu1  ;;  %7910 = vmatpush1.bf16.msra.mxu1 %v9274_v35  ;;  %v9563_v32 = vcombine.high %v4747_v27, %v4763_v12  ;;  %v8452_v35 = vrot.slane %v8444_v53, %v11182_v62  ;;  %v9595_v39 = vcombine.high %v4779_v40, %v4795_v42  ;;  %v4364_v53 = vld [vmem:[#allocation8 + $0x250] sm:$0xff] }
 0x986   :  { %v9618_v47 = vmul.f32 -1.442695, %v7770_v20  ;;  %v7774_v48 = vpop.f32.mrb[27].mxu1  ;;  %7911 = vmatprep.subr.bf16.mxu1 %v9307_v37  ;;  %v9562_v20 = vcombine.low %v4747_v27, %v4763_v12  ;;  %v4316_v41 = vld [vmem:[#allocation8 + $0xd0] sm:$0xff] }
 0x987   :  { %v9619_v51 = vmul.f32 -1.442695, %v7772_v44  ;;  %v4300_v44 = vld [vmem:[#allocation8 + $0x50] sm:$0xff] }
 0x988   :  { %10614 = vpow2.f32 %v9618_v47  ;;  %v9117_v47 = vcombine.high %v4300_v44, %v4316_v41  ;;  %v4332_v48 = vld [vmem:[#allocation8 + $0x150] sm:$0xff]  ;;  %v9116_v50 = vcombine.low %v4300_v44, %v4316_v41 }
 0x989   :  { %10616 = vpow2.f32 %v9619_v51  ;;  %7912 = vmatpush1.bf16.msra.mxu1 %v9306_v46  ;;  %v9594_v46 = vcombine.low %v4779_v40, %v4795_v42  ;;  %v4380_v51 = vld [vmem:[#allocation8 + $0x2d0] sm:$0xff] }
 0x98a   :  { %7913 = vmatprep.subr.bf16.mxu1 %v9339_v49  ;;  %v4348_v49 = vld [vmem:[#allocation8 + $0x1d0] sm:$0xff]  ;;  %v9181_v55 = vcombine.high %v4364_v53, %v4380_v51  ;;  %v9180_v58 = vcombine.low %v4364_v53, %v4380_v51 }
 0x98b   :  { %v9149_v16 = vcombine.high %v4332_v48, %v4348_v49  ;;  %v9148_v52 = vcombine.low %v4332_v48, %v4348_v49  ;;  %v4604_v40 = vld [vmem:[#allocation8 + $0x9d0] sm:$0xff] }
 0x98c   :  { %v4652_v49 = vld [vmem:[#allocation8 + $0xb50] sm:$0xff] }
 0x98d   :  { %7914 = vmatpush1.bf16.msra.mxu1 %v9338_v38  ;;  %v4396_v38 = vld [vmem:[#allocation8 + $0x350] sm:$0xff] }
 0x98e   :  { %7915 = vmatprep.subr.bf16.mxu1 %v9371_v57  ;;  %v4412_v57 = vld [vmem:[#allocation8 + $0x3d0] sm:$0xff] }
 0x98f   :  { %v9213_v59 = vcombine.high %v4396_v38, %v4412_v57  ;;  %v9212_v2 = vcombine.low %v4396_v38, %v4412_v57 }
 0x991   :  { %7916 = vmatpush1.bf16.msra.mxu1 %v9370_v60  ;;  %v4428_v60 = vld [vmem:[#allocation8 + $0x450] sm:$0xff] }
 0x992   :  { %v10615_v8 = vpop.eup %10614  ;;  %7917 = vmatprep.subr.bf16.mxu1 %v9403_v61  ;;  %v4444_v61 = vld [vmem:[#allocation8 + $0x4d0] sm:$0xff] }
 0x993   :  { %v10617_v56 = vpop.eup %10616  ;;  %v8292_v10 = vadd.f32 1.0, %v10615_v8  ;;  %v9245_v4 = vcombine.high %v4428_v60, %v4444_v61  ;;  %v4476_v8 = vld [vmem:[#allocation8 + $0x5d0] sm:$0xff] }
 0x994   :  { %v8293_v14 = vadd.f32 1.0, %v10617_v56 }
 0x995   :  { %10618 = vrcp.f32 %v8292_v10  ;;  %7918 = vmatpush1.bf16.msra.mxu1 %v9402_v5  ;;  %v4460_v5 = vld [vmem:[#allocation8 + $0x550] sm:$0xff] }
 0x996   :  { %10620 = vrcp.f32 %v8293_v14  ;;  %7919 = vmatprep.subr.bf16.mxu1 %v9435_v9  ;;  %v9244_v9 = vcombine.low %v4428_v60, %v4444_v61  ;;  %v9277_v56 = vcombine.high %v4460_v5, %v4476_v8  ;;  %v4492_v10 = vld [vmem:[#allocation8 + $0x650] sm:$0xff]  ;;  %v4865_v14 = vrot.slane %v11226_v54, %v11195_v45 }
 0x999   :  { %7920 = vmatpush1.bf16.msra.mxu1 %v9434_v17  ;;  %v9276_v17 = vcombine.low %v4460_v5, %v4476_v8  ;;  %v4764_v5 = vld [vmem:[#allocation8 + $0xed0] sm:$0xff] }
 0x99a   :  { %7921 = vmatprep.subr.bf16.mxu1 %v9467_v19  ;;  %v9309_v19 = vcombine.high %v4492_v10, %v4508_v11 }
 0x99d   :  { %7922 = vmatpush1.bf16.msra.mxu1 %v9466_v23  ;;  %v4540_v23 = vld [vmem:[#allocation8 + $0x7d0] sm:$0xff] }
 0x99e   :  { %7923 = vmatprep.subr.bf16.mxu1 %v9499_v24  ;;  %v9341_v12 = vcombine.high %v4524_v22, %v4540_v23 }
 0x99f   :  { %v10619_v26 = vpop.eup %10618 }
 0x9a0   :  { %v10621_v28 = vpop.eup %10620 }
 0x9a1   :  { %v8445_v29 = vcombine.low %v10619_v26, %v10621_v28  ;;  %7924 = vmatpush1.bf16.msra.mxu1 %v9498_v33 }
 0x9a2   :  { %7925 = vmatprep.subr.bf16.mxu1 %v9531_v34  ;;  %v9308_v34 = vcombine.low %v4492_v10, %v4508_v11  ;;  %v4780_v11 = vld [vmem:[#allocation8 + $0xf50] sm:$0xff] }
 0x9a3   :  { %v8459_v37 = vrot.slane %v8445_v29, %v11182_v62  ;;  %v4556_v29 = vld [vmem:[#allocation8 + $0x850] sm:$0xff] }
 0x9a5   :  { %v8460_v36 = vcombine.low %v8452_v35, %v8459_v37  ;;  %7926 = vmatpush1.bf16.msra.mxu1 %v9530_v31  ;;  %v4572_v31 = vld [vmem:[#allocation8 + $0x8d0] sm:$0xff] }
 0x9a6   :  { %7927 = vmatprep.subr.bf16.mxu1 %v9563_v32  ;;  %v9340_v32 = vcombine.low %v4524_v22, %v4540_v23  ;;  %v9373_v35 = vcombine.high %v4556_v29, %v4572_v31  ;;  %v4588_v37 = vld [vmem:[#allocation8 + $0x950] sm:$0xff]  ;;  %v9372_v42 = vcombine.low %v4556_v29, %v4572_v31  ;;  %v4413_v29 = vld [vmem:[#allocation8 + $0x3d8] sm:$0xff] }
 0x9a7   :  { %8556 = vst [vmem:[#allocation11 + $0x10] sm:$0xff] %v8460_v36  ;;  %v9405_v36 = vcombine.high %v4588_v37, %v4604_v40  ;;  %v9404_v44 = vcombine.low %v4588_v37, %v4604_v40  ;;  %v4445_v37 = vld [vmem:[#allocation8 + $0x4d8] sm:$0xff] }
 0x9a9   :  { %7928 = vmatpush1.bf16.msra.mxu1 %v9562_v20  ;;  %v4620_v20 = vld [vmem:[#allocation8 + $0xa50] sm:$0xff] }
 0x9aa   :  { %7929 = vmatprep.subr.bf16.mxu1 %v9595_v39  ;;  %v4636_v39 = vld [vmem:[#allocation8 + $0xad0] sm:$0xff] }
 0x9ab   :  { %v9436_v53 = vcombine.low %v4620_v20, %v4636_v39 }
 0x9ad   :  { %7930 = vmatpush1.bf16.msra.mxu1 %v9594_v46  ;;  %v9437_v46 = vcombine.high %v4620_v20, %v4636_v39  ;;  %v4477_v20 = vld [vmem:[#allocation8 + $0x5d8] sm:$0xff] }
 0x9ae   :  { %7940 = vmatprep.subr.bf16.mxu1 %v9117_v47 }
 0x9b0   :  { %7932 = vmatmul.mubr.bf16.vlgmr.msra.gmra.mrb[40].mxu1 %v11146_v7 }
 0x9b1   :  { %7941 = vmatpush1.bf16.msra.mxu1 %v9116_v50  ;;  %7972 = vmatprep.mubr.bf16.mxu1 %v11144_v6  ;;  %v4668_v50 = vld [vmem:[#allocation8 + $0xbd0] sm:$0xff] }
 0x9b2   :  { %7942 = vmatprep.subr.bf16.mxu1 %v9149_v16  ;;  %v9469_v51 = vcombine.high %v4652_v49, %v4668_v50  ;;  %v9468_v38 = vcombine.low %v4652_v49, %v4668_v50 }
 0x9b5   :  { %7943 = vmatpush1.bf16.msra.mxu1 %v9148_v52  ;;  %v4684_v52 = vld [vmem:[#allocation8 + $0xc50] sm:$0xff] }
 0x9b6   :  { %7944 = vmatprep.subr.bf16.mxu1 %v9181_v55  ;;  %v4700_v55 = vld [vmem:[#allocation8 + $0xcd0] sm:$0xff] }
 0x9b7   :  { %v9501_v57 = vcombine.high %v4684_v52, %v4700_v55  ;;  %v9500_v60 = vcombine.low %v4684_v52, %v4700_v55 }
 0x9b9   :  { %7945 = vmatpush1.bf16.msra.mxu1 %v9180_v58  ;;  %v4716_v58 = vld [vmem:[#allocation8 + $0xd50] sm:$0xff] }
 0x9ba   :  { %7946 = vmatprep.subr.bf16.mxu1 %v9213_v59  ;;  %v4732_v59 = vld [vmem:[#allocation8 + $0xdd0] sm:$0xff] }
 0x9bb   :  { %v9533_v61 = vcombine.high %v4716_v58, %v4732_v59 }
 0x9bd   :  { %7947 = vmatpush1.bf16.msra.mxu1 %v9212_v2 }
 0x9be   :  { %7948 = vmatprep.subr.bf16.mxu1 %v9245_v4  ;;  %v4748_v4 = vld [vmem:[#allocation8 + $0xe50] sm:$0xff] }
 0x9bf   :  { %v9565_v10 = vcombine.high %v4748_v4, %v4764_v5 }
 0x9c1   :  { %7949 = vmatpush1.bf16.msra.mxu1 %v9244_v9 }
 0x9c2   :  { %7950 = vmatprep.subr.bf16.mxu1 %v9277_v56  ;;  %v9532_v56 = vcombine.low %v4716_v58, %v4732_v59 }
 0x9c3   :  { %v7810_v21 = vpop.f32.mrb[28].mxu1 }
 0x9c4   :  { %v7811_v24 = vadd.f32 %v7810_v21, %v4861_v13  ;;  %v7812_v25 = vpop.f32.mrb[29].mxu1  ;;  %v4796_v13 = vld [vmem:[#allocation8 + $0xfd0] sm:$0xff]  ;;  %v4317_v21 = vld [vmem:[#allocation8 + $0xd8] sm:$0xff] }
 0x9c5   :  { %v7813_v30 = vadd.f32 %v7812_v25, %v4865_v14  ;;  %v7814_v33 = vpop.f32.mrb[30].mxu1  ;;  %7951 = vmatpush1.bf16.msra.mxu1 %v9276_v17  ;;  %v9564_v14 = vcombine.low %v4748_v4, %v4764_v5  ;;  %v9597_v17 = vcombine.high %v4780_v11, %v4796_v13  ;;  %v9596_v22 = vcombine.low %v4780_v11, %v4796_v13  ;;  %v4349_v25 = vld [vmem:[#allocation8 + $0x1d8] sm:$0xff] }
 0x9c6   :  { %v9620_v26 = vmul.f32 -1.442695, %v7811_v24  ;;  %v7815_v27 = vpop.f32.mrb[31].mxu1  ;;  %7952 = vmatprep.subr.bf16.mxu1 %v9309_v19  ;;  %v4301_v19 = vld [vmem:[#allocation8 + $0x58] sm:$0xff] }
 0x9c7   :  { %v9621_v28 = vmul.f32 -1.442695, %v7813_v30  ;;  %v9119_v23 = vcombine.high %v4301_v19, %v4317_v21  ;;  %v4333_v24 = vld [vmem:[#allocation8 + $0x158] sm:$0xff]  ;;  %v9118_v30 = vcombine.low %v4301_v19, %v4317_v21 }
 0x9c8   :  { %10622 = vpow2.f32 %v9620_v26  ;;  %v9151_v33 = vcombine.high %v4333_v24, %v4349_v25  ;;  %v4381_v26 = vld [vmem:[#allocation8 + $0x2d8] sm:$0xff]  ;;  %v9150_v27 = vcombine.low %v4333_v24, %v4349_v25 }
 0x9c9   :  { %10624 = vpow2.f32 %v9621_v28  ;;  %7953 = vmatpush1.bf16.msra.mxu1 %v9308_v34  ;;  %v4365_v34 = vld [vmem:[#allocation8 + $0x258] sm:$0xff] }
 0x9ca   :  { %7954 = vmatprep.subr.bf16.mxu1 %v9341_v12  ;;  %v9183_v12 = vcombine.high %v4365_v34, %v4381_v26  ;;  %v4397_v28 = vld [vmem:[#allocation8 + $0x358] sm:$0xff]  ;;  %v9182_v31 = vcombine.low %v4365_v34, %v4381_v26 }
 0x9cb   :  { %v9214_v40 = vcombine.low %v4397_v28, %v4413_v29  ;;  %v4557_v5 = vld [vmem:[#allocation8 + $0x858] sm:$0xff] }
 0x9cc   :  { %v4589_v11 = vld [vmem:[#allocation8 + $0x958] sm:$0xff] }
 0x9cd   :  { %7955 = vmatpush1.bf16.msra.mxu1 %v9340_v32  ;;  %v9215_v32 = vcombine.high %v4397_v28, %v4413_v29  ;;  %v4605_v13 = vld [vmem:[#allocation8 + $0x9d8] sm:$0xff] }
 0x9ce   :  { %7956 = vmatprep.subr.bf16.mxu1 %v9373_v35  ;;  %v4429_v35 = vld [vmem:[#allocation8 + $0x458] sm:$0xff] }
 0x9cf   :  { %v9246_v39 = vcombine.low %v4429_v35, %v4445_v37  ;;  %v4621_v19 = vld [vmem:[#allocation8 + $0xa58] sm:$0xff] }
 0x9d0   :  { %v4637_v21 = vld [vmem:[#allocation8 + $0xad8] sm:$0xff] }
 0x9d1   :  { %7957 = vmatpush1.bf16.msra.mxu1 %v9372_v42  ;;  %v9247_v42 = vcombine.high %v4429_v35, %v4445_v37  ;;  %v9439_v24 = vcombine.high %v4621_v19, %v4637_v21  ;;  %v4669_v34 = vld [vmem:[#allocation8 + $0xbd8] sm:$0xff] }
 0x9d2   :  { %v10623_v41 = vpop.eup %10622  ;;  %7958 = vmatprep.subr.bf16.mxu1 %v9405_v36  ;;  %v4461_v36 = vld [vmem:[#allocation8 + $0x558] sm:$0xff] }
 0x9d3   :  { %v10625_v47 = vpop.eup %10624  ;;  %v8294_v48 = vadd.f32 1.0, %v10623_v41  ;;  %v4493_v41 = vld [vmem:[#allocation8 + $0x658] sm:$0xff]  ;;  %v9278_v49 = vcombine.low %v4461_v36, %v4477_v20 }
 0x9d4   :  { %v8295_v16 = vadd.f32 1.0, %v10625_v47  ;;  %v4869_v47 = vrot.slane %v11226_v54, %v11210_v15  ;;  %v4685_v28 = vld [vmem:[#allocation8 + $0xc58] sm:$0xff] }
 0x9d5   :  { %10626 = vrcp.f32 %v8294_v48  ;;  %7959 = vmatpush1.bf16.msra.mxu1 %v9404_v44  ;;  %v9279_v44 = vcombine.high %v4461_v36, %v4477_v20  ;;  %v4873_v48 = vrot.slane %v11226_v54, %v11213_v18  ;;  %v4701_v29 = vld [vmem:[#allocation8 + $0xcd8] sm:$0xff] }
 0x9d6   :  { %10628 = vrcp.f32 %v8295_v16  ;;  %7960 = vmatprep.subr.bf16.mxu1 %v9437_v46  ;;  %v4509_v46 = vld [vmem:[#allocation8 + $0x6d8] sm:$0xff] }
 0x9d7   :  { %v9311_v50 = vcombine.high %v4493_v41, %v4509_v46  ;;  %v9310_v58 = vcombine.low %v4493_v41, %v4509_v46  ;;  %v4717_v35 = vld [vmem:[#allocation8 + $0xd58] sm:$0xff] }
 0x9d8   :  { %v4733_v37 = vld [vmem:[#allocation8 + $0xdd8] sm:$0xff] }
 0x9d9   :  { %7961 = vmatpush1.bf16.msra.mxu1 %v9436_v53  ;;  %v4525_v53 = vld [vmem:[#allocation8 + $0x758] sm:$0xff]  ;;  %v9534_v46 = vcombine.low %v4717_v35, %v4733_v37 }
 0x9da   :  { %7962 = vmatprep.subr.bf16.mxu1 %v9469_v51  ;;  %v4541_v51 = vld [vmem:[#allocation8 + $0x7d8] sm:$0xff] }
 0x9db   :  { %v9342_v54 = vcombine.low %v4525_v53, %v4541_v51  ;;  %v4749_v20 = vld [vmem:[#allocation8 + $0xe58] sm:$0xff] }
 0x9dd   :  { %7963 = vmatpush1.bf16.msra.mxu1 %v9468_v38 }
 0x9de   :  { %7964 = vmatprep.subr.bf16.mxu1 %v9501_v57 }
 0x9df   :  { %v11255_v2 = vpop.eup %10626 }
 0x9e0   :  { %v11257_v8 = vpop.eup %10628 }
 0x9e1   :  { %v8461_v9 = vcombine.low %v11255_v2, %v11257_v8  ;;  %7965 = vmatpush1.bf16.msra.mxu1 %v9500_v60 }
 0x9e2   :  { %7966 = vmatprep.subr.bf16.mxu1 %v9533_v61  ;;  %v9343_v61 = vcombine.high %v4525_v53, %v4541_v51 }
 0x9e5   :  { %7967 = vmatpush1.bf16.msra.mxu1 %v9532_v56  ;;  %v4573_v56 = vld [vmem:[#allocation8 + $0x8d8] sm:$0xff] }
 0x9e6   :  { %7968 = vmatprep.subr.bf16.mxu1 %v9565_v10  ;;  %v9375_v10 = vcombine.high %v4557_v5, %v4573_v56 }
 0x9e9   :  { %7969 = vmatpush1.bf16.msra.mxu1 %v9564_v14  ;;  %v9374_v14 = vcombine.low %v4557_v5, %v4573_v56  ;;  %v4398_v56 = vld [vmem:[#allocation8 + $0x360] sm:$0xff] }
 0x9ea   :  { %7970 = vmatprep.subr.bf16.mxu1 %v9597_v17  ;;  %v9407_v17 = vcombine.high %v4589_v11, %v4605_v13 }
 0x9ed   :  { %7971 = vmatpush1.bf16.msra.mxu1 %v9596_v22  ;;  %v9406_v22 = vcombine.low %v4589_v11, %v4605_v13  ;;  %v4430_v13 = vld [vmem:[#allocation8 + $0x460] sm:$0xff] }
 0x9ee   :  { %7981 = vmatprep.subr.bf16.mxu1 %v9119_v23 }
 0x9f0   :  { %7973 = vmatmul.mubr.bf16.vlgmr.msra.gmra.mrb[44].mxu1 %v11146_v7 }
 0x9f1   :  { %7982 = vmatpush1.bf16.msra.mxu1 %v9118_v30  ;;  %8013 = vmatprep.mubr.bf16.mxu1 %v11144_v6 }
 0x9f2   :  { %7983 = vmatprep.subr.bf16.mxu1 %v9151_v33  ;;  %v4653_v33 = vld [vmem:[#allocation8 + $0xb58] sm:$0xff] }
 0x9f5   :  { %7984 = vmatpush1.bf16.msra.mxu1 %v9150_v27  ;;  %v9438_v27 = vcombine.low %v4621_v19, %v4637_v21  ;;  %v4462_v21 = vld [vmem:[#allocation8 + $0x560] sm:$0xff] }
 0x9f6   :  { %7985 = vmatprep.subr.bf16.mxu1 %v9183_v12  ;;  %v9471_v12 = vcombine.high %v4653_v33, %v4669_v34 }
 0x9f9   :  { %7986 = vmatpush1.bf16.msra.mxu1 %v9182_v31  ;;  %v9470_v31 = vcombine.low %v4653_v33, %v4669_v34  ;;  %v4510_v33 = vld [vmem:[#allocation8 + $0x6e0] sm:$0xff] }
 0x9fa   :  { %7987 = vmatprep.subr.bf16.mxu1 %v9215_v32  ;;  %v9503_v32 = vcombine.high %v4685_v28, %v4701_v29 }
 0x9fd   :  { %7988 = vmatpush1.bf16.msra.mxu1 %v9214_v40  ;;  %v9502_v40 = vcombine.low %v4685_v28, %v4701_v29  ;;  %v4526_v29 = vld [vmem:[#allocation8 + $0x760] sm:$0xff] }
 0x9fe   :  { %7989 = vmatprep.subr.bf16.mxu1 %v9247_v42  ;;  %v9535_v42 = vcombine.high %v4717_v35, %v4733_v37 }
 0xa01   :  { %7990 = vmatpush1.bf16.msra.mxu1 %v9246_v39  ;;  %v4765_v39 = vld [vmem:[#allocation8 + $0xed8] sm:$0xff] }
 0xa02   :  { %7991 = vmatprep.subr.bf16.mxu1 %v9279_v44  ;;  %v9566_v51 = vcombine.low %v4749_v20, %v4765_v39 }
 0xa03   :  { %v7851_v16 = vpop.f32.mrb[32].mxu1 }
 0xa04   :  { %v7852_v52 = vadd.f32 %v7851_v16, %v4869_v47  ;;  %v7853_v55 = vpop.f32.mrb[33].mxu1  ;;  %v9567_v47 = vcombine.high %v4749_v20, %v4765_v39  ;;  %v4797_v16 = vld [vmem:[#allocation8 + $0xfd8] sm:$0xff] }
 0xa05   :  { %v7854_v38 = vadd.f32 %v7853_v55, %v4873_v48  ;;  %v7855_v57 = vpop.f32.mrb[34].mxu1  ;;  %7992 = vmatpush1.bf16.msra.mxu1 %v9278_v49  ;;  %v8469_v48 = vrot.slane %v8461_v9, %v11182_v62  ;;  %v4302_v55 = vld [vmem:[#allocation8 + $0x60] sm:$0xff] }
 0xa06   :  { %v9622_v59 = vmul.f32 -1.442695, %v7852_v52  ;;  %v7856_v60 = vpop.f32.mrb[35].mxu1  ;;  %7993 = vmatprep.subr.bf16.mxu1 %v9311_v50  ;;  %v4781_v50 = vld [vmem:[#allocation8 + $0xf58] sm:$0xff]  ;;  %v4366_v9 = vld [vmem:[#allocation8 + $0x260] sm:$0xff] }
 0xa07   :  { %v9623_v4 = vmul.f32 -1.442695, %v7854_v38  ;;  %v9599_v52 = vcombine.high %v4781_v50, %v4797_v16  ;;  %v4318_v38 = vld [vmem:[#allocation8 + $0xe0] sm:$0xff]  ;;  %v9598_v57 = vcombine.low %v4781_v50, %v4797_v16 }
 0xa08   :  { %10630 = vpow2.f32 %v9622_v59  ;;  %v4334_v59 = vld [vmem:[#allocation8 + $0x160] sm:$0xff]  ;;  %v9120_v2 = vcombine.low %v4302_v55, %v4318_v38 }
 0xa09   :  { %10632 = vpow2.f32 %v9623_v4  ;;  %7994 = vmatpush1.bf16.msra.mxu1 %v9310_v58  ;;  %v9121_v58 = vcombine.high %v4302_v55, %v4318_v38  ;;  %v4350_v60 = vld [vmem:[#allocation8 + $0x1e0] sm:$0xff] }
 0xa0a   :  { %7995 = vmatprep.subr.bf16.mxu1 %v9343_v61  ;;  %v9153_v8 = vcombine.high %v4334_v59, %v4350_v60  ;;  %v4382_v61 = vld [vmem:[#allocation8 + $0x2e0] sm:$0xff]  ;;  %v9152_v4 = vcombine.low %v4334_v59, %v4350_v60 }
 0xa0b   :  { %v9185_v5 = vcombine.high %v4366_v9, %v4382_v61  ;;  %v4606_v50 = vld [vmem:[#allocation8 + $0x9e0] sm:$0xff] }
 0xa0c   :  { %v4654_v60 = vld [vmem:[#allocation8 + $0xb60] sm:$0xff] }
 0xa0d   :  { %7996 = vmatpush1.bf16.msra.mxu1 %v9342_v54  ;;  %v4414_v54 = vld [vmem:[#allocation8 + $0x3e0] sm:$0xff] }
 0xa0e   :  { %7997 = vmatprep.subr.bf16.mxu1 %v9375_v10  ;;  %v9184_v10 = vcombine.low %v4366_v9, %v4382_v61  ;;  %v9217_v11 = vcombine.high %v4398_v56, %v4414_v54 }
 0xa11   :  { %7998 = vmatpush1.bf16.msra.mxu1 %v9374_v14  ;;  %v4446_v14 = vld [vmem:[#allocation8 + $0x4e0] sm:$0xff] }
 0xa12   :  { %v10631_v23 = vpop.eup %10630  ;;  %7999 = vmatprep.subr.bf16.mxu1 %v9407_v17  ;;  %v9216_v17 = vcombine.low %v4398_v56, %v4414_v54  ;;  %v9249_v19 = vcombine.high %v4430_v13, %v4446_v14 }
 0xa13   :  { %v10633_v25 = vpop.eup %10632  ;;  %v8296_v30 = vadd.f32 1.0, %v10631_v23  ;;  %v9248_v23 = vcombine.low %v4430_v13, %v4446_v14 }
 0xa14   :  { %v8297_v26 = vadd.f32 1.0, %v10633_v25 }
 0xa15   :  { %10634 = vrcp.f32 %v8296_v30  ;;  %8000 = vmatpush1.bf16.msra.mxu1 %v9406_v22  ;;  %v4478_v22 = vld [vmem:[#allocation8 + $0x5e0] sm:$0xff] }
 0xa16   :  { %10636 = vrcp.f32 %v8297_v26  ;;  %8001 = vmatprep.subr.bf16.mxu1 %v9439_v24  ;;  %v11274_v24 = vld [vmem:[#allocation10 + $0x10] sm:$0xff]  ;;  %v9281_v25 = vcombine.high %v4462_v21, %v4478_v22  ;;  %v4494_v30 = vld [vmem:[#allocation8 + $0x660] sm:$0xff] }
 0xa17   :  { %v4877_v34 = vrot.slane %v11274_v24, %v11132_v63  ;;  %v4881_v26 = vrot.slane %v11274_v24, %v11135_v1 }
 0xa19   :  { %8002 = vmatpush1.bf16.msra.mxu1 %v9438_v27  ;;  %v9280_v27 = vcombine.low %v4462_v21, %v4478_v22  ;;  %v4766_v21 = vld [vmem:[#allocation8 + $0xee0] sm:$0xff] }
 0xa1a   :  { %8003 = vmatprep.subr.bf16.mxu1 %v9471_v12  ;;  %v9313_v12 = vcombine.high %v4494_v30, %v4510_v33 }
 0xa1d   :  { %8004 = vmatpush1.bf16.msra.mxu1 %v9470_v31  ;;  %v4542_v31 = vld [vmem:[#allocation8 + $0x7e0] sm:$0xff] }
 0xa1e   :  { %8005 = vmatprep.subr.bf16.mxu1 %v9503_v32  ;;  %v9345_v39 = vcombine.high %v4526_v29, %v4542_v31 }
 0xa1f   :  { %v10635_v36 = vpop.eup %10634 }
 0xa20   :  { %v10637_v44 = vpop.eup %10636 }
 0xa21   :  { %v8462_v41 = vcombine.low %v10635_v36, %v10637_v44  ;;  %8006 = vmatpush1.bf16.msra.mxu1 %v9502_v40 }
 0xa22   :  { %8007 = vmatprep.subr.bf16.mxu1 %v9535_v42  ;;  %v9312_v42 = vcombine.low %v4494_v30, %v4510_v33  ;;  %v4782_v33 = vld [vmem:[#allocation8 + $0xf60] sm:$0xff] }
 0xa23   :  { %v8476_v49 = vrot.slane %v8462_v41, %v11182_v62  ;;  %v4558_v41 = vld [vmem:[#allocation8 + $0x860] sm:$0xff] }
 0xa25   :  { %v8477_v53 = vcombine.low %v8469_v48, %v8476_v49  ;;  %8008 = vmatpush1.bf16.msra.mxu1 %v9534_v46  ;;  %v4574_v46 = vld [vmem:[#allocation8 + $0x8e0] sm:$0xff] }
 0xa26   :  { %8009 = vmatprep.subr.bf16.mxu1 %v9567_v47  ;;  %v9344_v47 = vcombine.low %v4526_v29, %v4542_v31  ;;  %v9377_v48 = vcombine.high %v4558_v41, %v4574_v46  ;;  %v4590_v49 = vld [vmem:[#allocation8 + $0x960] sm:$0xff]  ;;  %v9376_v16 = vcombine.low %v4558_v41, %v4574_v46  ;;  %v4415_v41 = vld [vmem:[#allocation8 + $0x3e8] sm:$0xff] }
 0xa27   :  { %8557 = vst [vmem:[#allocation11 + $0x18] sm:$0xff] %v8477_v53  ;;  %v9409_v53 = vcombine.high %v4590_v49, %v4606_v50  ;;  %v9408_v55 = vcombine.low %v4590_v49, %v4606_v50  ;;  %v4447_v49 = vld [vmem:[#allocation8 + $0x4e8] sm:$0xff] }
 0xa29   :  { %8010 = vmatpush1.bf16.msra.mxu1 %v9566_v51  ;;  %v4622_v51 = vld [vmem:[#allocation8 + $0xa60] sm:$0xff] }
 0xa2a   :  { %8011 = vmatprep.subr.bf16.mxu1 %v9599_v52  ;;  %v4638_v52 = vld [vmem:[#allocation8 + $0xae0] sm:$0xff] }
 0xa2b   :  { %v9440_v9 = vcombine.low %v4622_v51, %v4638_v52 }
 0xa2d   :  { %8012 = vmatpush1.bf16.msra.mxu1 %v9598_v57  ;;  %v9441_v57 = vcombine.high %v4622_v51, %v4638_v52  ;;  %v4479_v51 = vld [vmem:[#allocation8 + $0x5e8] sm:$0xff] }
 0xa2e   :  { %8022 = vmatprep.subr.bf16.mxu1 %v9121_v58 }
 0xa30   :  { %8014 = vmatmul.mubr.bf16.vlgmr.msra.gmra.mrb[48].mxu1 %v11146_v7 }
 0xa31   :  { %8023 = vmatpush1.bf16.msra.mxu1 %v9120_v2  ;;  %8054 = vmatprep.mubr.bf16.mxu1 %v11144_v6  ;;  %v4670_v2 = vld [vmem:[#allocation8 + $0xbe0] sm:$0xff] }
 0xa32   :  { %8024 = vmatprep.subr.bf16.mxu1 %v9153_v8  ;;  %v9473_v61 = vcombine.high %v4654_v60, %v4670_v2  ;;  %v9472_v56 = vcombine.low %v4654_v60, %v4670_v2 }
 0xa35   :  { %8025 = vmatpush1.bf16.msra.mxu1 %v9152_v4  ;;  %v4686_v4 = vld [vmem:[#allocation8 + $0xc60] sm:$0xff] }
 0xa36   :  { %8026 = vmatprep.subr.bf16.mxu1 %v9185_v5  ;;  %v4702_v5 = vld [vmem:[#allocation8 + $0xce0] sm:$0xff] }
 0xa37   :  { %v9505_v54 = vcombine.high %v4686_v4, %v4702_v5  ;;  %v9504_v13 = vcombine.low %v4686_v4, %v4702_v5 }
 0xa39   :  { %8027 = vmatpush1.bf16.msra.mxu1 %v9184_v10  ;;  %v4718_v10 = vld [vmem:[#allocation8 + $0xd60] sm:$0xff] }
 0xa3a   :  { %8028 = vmatprep.subr.bf16.mxu1 %v9217_v11  ;;  %v4734_v11 = vld [vmem:[#allocation8 + $0xde0] sm:$0xff] }
 0xa3b   :  { %v9537_v14 = vcombine.high %v4718_v10, %v4734_v11 }
 0xa3d   :  { %8029 = vmatpush1.bf16.msra.mxu1 %v9216_v17 }
 0xa3e   :  { %8030 = vmatprep.subr.bf16.mxu1 %v9249_v19  ;;  %v4750_v19 = vld [vmem:[#allocation8 + $0xe60] sm:$0xff] }
 0xa3f   :  { %v9569_v30 = vcombine.high %v4750_v19, %v4766_v21 }
 0xa41   :  { %8031 = vmatpush1.bf16.msra.mxu1 %v9248_v23 }
 0xa42   :  { %8032 = vmatprep.subr.bf16.mxu1 %v9281_v25  ;;  %v9536_v25 = vcombine.low %v4718_v10, %v4734_v11 }
 0xa43   :  { %v7892_v28 = vpop.f32.mrb[36].mxu1 }
 0xa44   :  { %v7893_v32 = vadd.f32 %v7892_v28, %v4877_v34  ;;  %v7894_v35 = vpop.f32.mrb[37].mxu1  ;;  %v4798_v34 = vld [vmem:[#allocation8 + $0xfe0] sm:$0xff]  ;;  %v4319_v28 = vld [vmem:[#allocation8 + $0xe8] sm:$0xff] }
 0xa45   :  { %v7895_v37 = vadd.f32 %v7894_v35, %v4881_v26  ;;  %v7896_v40 = vpop.f32.mrb[38].mxu1  ;;  %8033 = vmatpush1.bf16.msra.mxu1 %v9280_v27  ;;  %v9568_v26 = vcombine.low %v4750_v19, %v4766_v21  ;;  %v9601_v27 = vcombine.high %v4782_v33, %v4798_v34  ;;  %v9600_v29 = vcombine.low %v4782_v33, %v4798_v34  ;;  %v4351_v35 = vld [vmem:[#allocation8 + $0x1e8] sm:$0xff] }
 0xa46   :  { %v9624_v36 = vmul.f32 -1.442695, %v7893_v32  ;;  %v7897_v20 = vpop.f32.mrb[39].mxu1  ;;  %8034 = vmatprep.subr.bf16.mxu1 %v9313_v12  ;;  %v4303_v12 = vld [vmem:[#allocation8 + $0x68] sm:$0xff] }
 0xa47   :  { %v9625_v44 = vmul.f32 -1.442695, %v7895_v37  ;;  %v9123_v31 = vcombine.high %v4303_v12, %v4319_v28  ;;  %v4335_v32 = vld [vmem:[#allocation8 + $0x168] sm:$0xff]  ;;  %v9122_v37 = vcombine.low %v4303_v12, %v4319_v28 }
 0xa48   :  { %10638 = vpow2.f32 %v9624_v36  ;;  %v9155_v40 = vcombine.high %v4335_v32, %v4351_v35  ;;  %v4383_v36 = vld [vmem:[#allocation8 + $0x2e8] sm:$0xff]  ;;  %v9154_v20 = vcombine.low %v4335_v32, %v4351_v35 }
 0xa49   :  { %10640 = vpow2.f32 %v9625_v44  ;;  %8035 = vmatpush1.bf16.msra.mxu1 %v9312_v42  ;;  %v4367_v42 = vld [vmem:[#allocation8 + $0x268] sm:$0xff] }
 0xa4a   :  { %8036 = vmatprep.subr.bf16.mxu1 %v9345_v39  ;;  %v9187_v39 = vcombine.high %v4367_v42, %v4383_v36  ;;  %v4399_v44 = vld [vmem:[#allocation8 + $0x368] sm:$0xff]  ;;  %v9186_v46 = vcombine.low %v4367_v42, %v4383_v36 }
 0xa4b   :  { %v9218_v50 = vcombine.low %v4399_v44, %v4415_v41  ;;  %v4559_v21 = vld [vmem:[#allocation8 + $0x868] sm:$0xff] }
 0xa4c   :  { %v4591_v34 = vld [vmem:[#allocation8 + $0x968] sm:$0xff] }
 0xa4d   :  { %8037 = vmatpush1.bf16.msra.mxu1 %v9344_v47  ;;  %v9219_v47 = vcombine.high %v4399_v44, %v4415_v41  ;;  %v4623_v28 = vld [vmem:[#allocation8 + $0xa68] sm:$0xff] }
 0xa4e   :  { %8038 = vmatprep.subr.bf16.mxu1 %v9377_v48  ;;  %v4431_v48 = vld [vmem:[#allocation8 + $0x468] sm:$0xff] }
 0xa4f   :  { %v9250_v52 = vcombine.low %v4431_v48, %v4447_v49  ;;  %v4655_v42 = vld [vmem:[#allocation8 + $0xb68] sm:$0xff] }
 0xa50   :  { %v4671_v36 = vld [vmem:[#allocation8 + $0xbe8] sm:$0xff] }
 0xa51   :  { %8039 = vmatpush1.bf16.msra.mxu1 %v9376_v16  ;;  %v9251_v16 = vcombine.high %v4431_v48, %v4447_v49  ;;  %v9475_v44 = vcombine.high %v4655_v42, %v4671_v36  ;;  %v4687_v41 = vld [vmem:[#allocation8 + $0xc68] sm:$0xff] }
 0xa52   :  { %v10639_v38 = vpop.eup %10638  ;;  %8040 = vmatprep.subr.bf16.mxu1 %v9409_v53  ;;  %v4463_v53 = vld [vmem:[#allocation8 + $0x568] sm:$0xff] }
 0xa53   :  { %v10641_v58 = vpop.eup %10640  ;;  %v8298_v59 = vadd.f32 1.0, %v10639_v38  ;;  %v4495_v38 = vld [vmem:[#allocation8 + $0x668] sm:$0xff]  ;;  %v9282_v60 = vcombine.low %v4463_v53, %v4479_v51 }
 0xa54   :  { %v8299_v8 = vadd.f32 1.0, %v10641_v58  ;;  %v4885_v58 = vrot.slane %v11274_v24, %v11172_v0  ;;  %v4719_v49 = vld [vmem:[#allocation8 + $0xd68] sm:$0xff] }
 0xa55   :  { %10642 = vrcp.f32 %v8298_v59  ;;  %8041 = vmatpush1.bf16.msra.mxu1 %v9408_v55  ;;  %v9283_v55 = vcombine.high %v4463_v53, %v4479_v51  ;;  %v4889_v59 = vrot.slane %v11274_v24, %v11175_v3 }
 0xa56   :  { %10644 = vrcp.f32 %v8299_v8  ;;  %8042 = vmatprep.subr.bf16.mxu1 %v9441_v57  ;;  %v4511_v57 = vld [vmem:[#allocation8 + $0x6e8] sm:$0xff] }
 0xa57   :  { %v9315_v2 = vcombine.high %v4495_v38, %v4511_v57  ;;  %v9314_v10 = vcombine.low %v4495_v38, %v4511_v57 }
 0xa59   :  { %8043 = vmatpush1.bf16.msra.mxu1 %v9440_v9  ;;  %v4527_v9 = vld [vmem:[#allocation8 + $0x768] sm:$0xff] }
 0xa5a   :  { %8044 = vmatprep.subr.bf16.mxu1 %v9473_v61  ;;  %v4543_v61 = vld [vmem:[#allocation8 + $0x7e8] sm:$0xff] }
 0xa5d   :  { %8045 = vmatpush1.bf16.msra.mxu1 %v9472_v56 }
 0xa5e   :  { %8046 = vmatprep.subr.bf16.mxu1 %v9505_v54 }
 0xa5f   :  { %v11280_v17 = vpop.eup %10642 }
 0xa60   :  { %v11282_v22 = vpop.eup %10644 }
 0xa61   :  { %v8478_v23 = vcombine.low %v11280_v17, %v11282_v22  ;;  %8047 = vmatpush1.bf16.msra.mxu1 %v9504_v13 }
 0xa62   :  { %8048 = vmatprep.subr.bf16.mxu1 %v9537_v14  ;;  %v9347_v14 = vcombine.high %v4527_v9, %v4543_v61 }
 0xa65   :  { %8049 = vmatpush1.bf16.msra.mxu1 %v9536_v25  ;;  %v4575_v25 = vld [vmem:[#allocation8 + $0x8e8] sm:$0xff] }
 0xa66   :  { %8050 = vmatprep.subr.bf16.mxu1 %v9569_v30  ;;  %v9346_v30 = vcombine.low %v4527_v9, %v4543_v61  ;;  %v9379_v33 = vcombine.high %v4559_v21, %v4575_v25  ;;  %v4799_v9 = vld [vmem:[#allocation8 + $0xfe8] sm:$0xff] }
 0xa69   :  { %8051 = vmatpush1.bf16.msra.mxu1 %v9568_v26  ;;  %v4607_v26 = vld [vmem:[#allocation8 + $0x9e8] sm:$0xff] }
 0xa6a   :  { %8052 = vmatprep.subr.bf16.mxu1 %v9601_v27  ;;  %v9378_v27 = vcombine.low %v4559_v21, %v4575_v25  ;;  %v9411_v12 = vcombine.high %v4591_v34, %v4607_v26 }
 0xa6d   :  { %8053 = vmatpush1.bf16.msra.mxu1 %v9600_v29  ;;  %v4639_v29 = vld [vmem:[#allocation8 + $0xae8] sm:$0xff] }
 0xa6e   :  { %8063 = vmatprep.subr.bf16.mxu1 %v9123_v31  ;;  %v9410_v31 = vcombine.low %v4591_v34, %v4607_v26  ;;  %v9443_v35 = vcombine.high %v4623_v28, %v4639_v29 }
 0xa70   :  { %8055 = vmatmul.mubr.bf16.vlgmr.msra.gmra.mrb[52].mxu1 %v11146_v7 }
 0xa71   :  { %8064 = vmatpush1.bf16.msra.mxu1 %v9122_v37  ;;  %8095 = vmatprep.mubr.bf16.mxu1 %v11144_v6 }
 0xa72   :  { %8065 = vmatprep.subr.bf16.mxu1 %v9155_v40 }
 0xa75   :  { %8066 = vmatpush1.bf16.msra.mxu1 %v9154_v20 }
 0xa76   :  { %8067 = vmatprep.subr.bf16.mxu1 %v9187_v39  ;;  %v9442_v39 = vcombine.low %v4623_v28, %v4639_v29 }
 0xa79   :  { %8068 = vmatpush1.bf16.msra.mxu1 %v9186_v46  ;;  %v4703_v46 = vld [vmem:[#allocation8 + $0xce8] sm:$0xff] }
 0xa7a   :  { %8069 = vmatprep.subr.bf16.mxu1 %v9219_v47  ;;  %v9474_v47 = vcombine.low %v4655_v42, %v4671_v36  ;;  %v9507_v48 = vcombine.high %v4687_v41, %v4703_v46  ;;  %v4512_v42 = vld [vmem:[#allocation8 + $0x6f0] sm:$0xff]  ;;  %v4893_v36 = vrot.slane %v11274_v24, %v11192_v43 }
 0xa7d   :  { %8070 = vmatpush1.bf16.msra.mxu1 %v9218_v50  ;;  %v4735_v50 = vld [vmem:[#allocation8 + $0xde8] sm:$0xff] }
 0xa7e   :  { %8071 = vmatprep.subr.bf16.mxu1 %v9251_v16  ;;  %v9506_v16 = vcombine.low %v4687_v41, %v4703_v46  ;;  %v9539_v53 = vcombine.high %v4719_v49, %v4735_v50  ;;  %v4528_v46 = vld [vmem:[#allocation8 + $0x770] sm:$0xff] }
 0xa81   :  { %8072 = vmatpush1.bf16.msra.mxu1 %v9250_v52  ;;  %v4751_v52 = vld [vmem:[#allocation8 + $0xe68] sm:$0xff] }
 0xa82   :  { %8073 = vmatprep.subr.bf16.mxu1 %v9283_v55  ;;  %v4767_v55 = vld [vmem:[#allocation8 + $0xee8] sm:$0xff] }
 0xa83   :  { %v7933_v8 = vpop.f32.mrb[40].mxu1 }
 0xa84   :  { %v7934_v4 = vadd.f32 %v7933_v8, %v4885_v58  ;;  %v7935_v5 = vpop.f32.mrb[41].mxu1  ;;  %v9538_v58 = vcombine.low %v4719_v49, %v4735_v50  ;;  %v4783_v8 = vld [vmem:[#allocation8 + $0xf68] sm:$0xff] }
 0xa85   :  { %v7936_v56 = vadd.f32 %v7935_v5, %v4889_v59  ;;  %v7937_v54 = vpop.f32.mrb[42].mxu1  ;;  %8074 = vmatpush1.bf16.msra.mxu1 %v9282_v60  ;;  %v9571_v59 = vcombine.high %v4751_v52, %v4767_v55  ;;  %v8486_v60 = vrot.slane %v8478_v23, %v11182_v62  ;;  %v9603_v5 = vcombine.high %v4783_v8, %v4799_v9  ;;  %v4368_v23 = vld [vmem:[#allocation8 + $0x270] sm:$0xff] }
 0xa86   :  { %v9626_v11 = vmul.f32 -1.442695, %v7934_v4  ;;  %v7938_v13 = vpop.f32.mrb[43].mxu1  ;;  %8075 = vmatprep.subr.bf16.mxu1 %v9315_v2  ;;  %v9570_v4 = vcombine.low %v4751_v52, %v4767_v55  ;;  %v4320_v54 = vld [vmem:[#allocation8 + $0xf0] sm:$0xff] }
 0xa87   :  { %v9627_v19 = vmul.f32 -1.442695, %v7936_v56  ;;  %v4304_v56 = vld [vmem:[#allocation8 + $0x70] sm:$0xff] }
 0xa88   :  { %10646 = vpow2.f32 %v9626_v11  ;;  %v9125_v11 = vcombine.high %v4304_v56, %v4320_v54  ;;  %v4336_v13 = vld [vmem:[#allocation8 + $0x170] sm:$0xff]  ;;  %v9124_v17 = vcombine.low %v4304_v56, %v4320_v54 }
 0xa89   :  { %10648 = vpow2.f32 %v9627_v19  ;;  %8076 = vmatpush1.bf16.msra.mxu1 %v9314_v10  ;;  %v9602_v10 = vcombine.low %v4783_v8, %v4799_v9  ;;  %v4384_v19 = vld [vmem:[#allocation8 + $0x2f0] sm:$0xff] }
 0xa8a   :  { %8077 = vmatprep.subr.bf16.mxu1 %v9347_v14  ;;  %v4352_v14 = vld [vmem:[#allocation8 + $0x1f0] sm:$0xff]  ;;  %v9189_v25 = vcombine.high %v4368_v23, %v4384_v19  ;;  %v9188_v34 = vcombine.low %v4368_v23, %v4384_v19 }
 0xa8b   :  { %v9157_v22 = vcombine.high %v4336_v13, %v4352_v14  ;;  %v9156_v21 = vcombine.low %v4336_v13, %v4352_v14  ;;  %v4608_v8 = vld [vmem:[#allocation8 + $0x9f0] sm:$0xff] }
 0xa8c   :  { %v4656_v14 = vld [vmem:[#allocation8 + $0xb70] sm:$0xff] }
 0xa8d   :  { %8078 = vmatpush1.bf16.msra.mxu1 %v9346_v30  ;;  %v4400_v30 = vld [vmem:[#allocation8 + $0x370] sm:$0xff] }
 0xa8e   :  { %8079 = vmatprep.subr.bf16.mxu1 %v9379_v33  ;;  %v4416_v33 = vld [vmem:[#allocation8 + $0x3f0] sm:$0xff] }
 0xa8f   :  { %v9221_v26 = vcombine.high %v4400_v30, %v4416_v33  ;;  %v9220_v28 = vcombine.low %v4400_v30, %v4416_v33 }
 0xa91   :  { %8080 = vmatpush1.bf16.msra.mxu1 %v9378_v27  ;;  %v4432_v27 = vld [vmem:[#allocation8 + $0x470] sm:$0xff] }
 0xa92   :  { %v10647_v32 = vpop.eup %10646  ;;  %8081 = vmatprep.subr.bf16.mxu1 %v9411_v12  ;;  %v4448_v12 = vld [vmem:[#allocation8 + $0x4f0] sm:$0xff] }
 0xa93   :  { %v10649_v37 = vpop.eup %10648  ;;  %v8300_v40 = vadd.f32 1.0, %v10647_v32  ;;  %v9253_v29 = vcombine.high %v4432_v27, %v4448_v12  ;;  %v4480_v32 = vld [vmem:[#allocation8 + $0x5f0] sm:$0xff] }
 0xa94   :  { %v8301_v20 = vadd.f32 1.0, %v10649_v37 }
 0xa95   :  { %10650 = vrcp.f32 %v8300_v40  ;;  %8082 = vmatpush1.bf16.msra.mxu1 %v9410_v31  ;;  %v4464_v31 = vld [vmem:[#allocation8 + $0x570] sm:$0xff] }
 0xa96   :  { %10652 = vrcp.f32 %v8301_v20  ;;  %8083 = vmatprep.subr.bf16.mxu1 %v9443_v35  ;;  %v9252_v35 = vcombine.low %v4432_v27, %v4448_v12  ;;  %v9285_v37 = vcombine.high %v4464_v31, %v4480_v32  ;;  %v4496_v40 = vld [vmem:[#allocation8 + $0x670] sm:$0xff]  ;;  %v4897_v20 = vrot.slane %v11274_v24, %v11195_v45 }
 0xa99   :  { %8084 = vmatpush1.bf16.msra.mxu1 %v9442_v39  ;;  %v9284_v39 = vcombine.low %v4464_v31, %v4480_v32  ;;  %v4768_v31 = vld [vmem:[#allocation8 + $0xef0] sm:$0xff] }
 0xa9a   :  { %8085 = vmatprep.subr.bf16.mxu1 %v9475_v44  ;;  %v9317_v44 = vcombine.high %v4496_v40, %v4512_v42 }
 0xa9d   :  { %8086 = vmatpush1.bf16.msra.mxu1 %v9474_v47  ;;  %v4544_v47 = vld [vmem:[#allocation8 + $0x7f0] sm:$0xff] }
 0xa9e   :  { %8087 = vmatprep.subr.bf16.mxu1 %v9507_v48  ;;  %v9349_v55 = vcombine.high %v4528_v46, %v4544_v47 }
 0xa9f   :  { %v10651_v51 = vpop.eup %10650 }
 0xaa0   :  { %v10653_v38 = vpop.eup %10652 }
 0xaa1   :  { %v8479_v57 = vcombine.low %v10651_v51, %v10653_v38  ;;  %8088 = vmatpush1.bf16.msra.mxu1 %v9506_v16 }
 0xaa2   :  { %8089 = vmatprep.subr.bf16.mxu1 %v9539_v53  ;;  %v9316_v53 = vcombine.low %v4496_v40, %v4512_v42  ;;  %v4784_v42 = vld [vmem:[#allocation8 + $0xf70] sm:$0xff] }
 0xaa3   :  { %v8493_v2 = vrot.slane %v8479_v57, %v11182_v62  ;;  %v4560_v57 = vld [vmem:[#allocation8 + $0x870] sm:$0xff] }
 0xaa5   :  { %v8494_v61 = vcombine.low %v8486_v60, %v8493_v2  ;;  %8090 = vmatpush1.bf16.msra.mxu1 %v9538_v58  ;;  %v4576_v58 = vld [vmem:[#allocation8 + $0x8f0] sm:$0xff] }
 0xaa6   :  { %8091 = vmatprep.subr.bf16.mxu1 %v9571_v59  ;;  %v9348_v59 = vcombine.low %v4528_v46, %v4544_v47  ;;  %v9381_v60 = vcombine.high %v4560_v57, %v4576_v58  ;;  %v4592_v2 = vld [vmem:[#allocation8 + $0x970] sm:$0xff]  ;;  %v9380_v9 = vcombine.low %v4560_v57, %v4576_v58  ;;  %v4417_v57 = vld [vmem:[#allocation8 + $0x3f8] sm:$0xff] }
 0xaa7   :  { %8558 = vst [vmem:[#allocation11 + $0x20] sm:$0xff] %v8494_v61  ;;  %v9413_v61 = vcombine.high %v4592_v2, %v4608_v8  ;;  %v9412_v56 = vcombine.low %v4592_v2, %v4608_v8  ;;  %v4449_v2 = vld [vmem:[#allocation8 + $0x4f8] sm:$0xff] }
 0xaa9   :  { %8092 = vmatpush1.bf16.msra.mxu1 %v9570_v4  ;;  %v4624_v4 = vld [vmem:[#allocation8 + $0xa70] sm:$0xff] }
 0xaaa   :  { %8093 = vmatprep.subr.bf16.mxu1 %v9603_v5  ;;  %v4640_v5 = vld [vmem:[#allocation8 + $0xaf0] sm:$0xff] }
 0xaab   :  { %v9444_v23 = vcombine.low %v4624_v4, %v4640_v5 }
 0xaad   :  { %8094 = vmatpush1.bf16.msra.mxu1 %v9602_v10  ;;  %v9445_v10 = vcombine.high %v4624_v4, %v4640_v5  ;;  %v4481_v4 = vld [vmem:[#allocation8 + $0x5f8] sm:$0xff] }
 0xaae   :  { %8104 = vmatprep.subr.bf16.mxu1 %v9125_v11 }
 0xab0   :  { %8096 = vmatmul.mubr.bf16.vlgmr.msra.gmra.mrb[56].mxu1 %v11146_v7 }
 0xab1   :  { %8105 = vmatpush1.bf16.msra.mxu1 %v9124_v17  ;;  %8136 = vmatprep.mubr.bf16.mxu1 %v11144_v6  ;;  %v4672_v17 = vld [vmem:[#allocation8 + $0xbf0] sm:$0xff] }
 0xab2   :  { %8106 = vmatprep.subr.bf16.mxu1 %v9157_v22  ;;  %v9477_v19 = vcombine.high %v4656_v14, %v4672_v17  ;;  %v9476_v30 = vcombine.low %v4656_v14, %v4672_v17 }
 0xab5   :  { %8107 = vmatpush1.bf16.msra.mxu1 %v9156_v21  ;;  %v4688_v21 = vld [vmem:[#allocation8 + $0xc70] sm:$0xff] }
 0xab6   :  { %8108 = vmatprep.subr.bf16.mxu1 %v9189_v25  ;;  %v4704_v25 = vld [vmem:[#allocation8 + $0xcf0] sm:$0xff] }
 0xab7   :  { %v9509_v33 = vcombine.high %v4688_v21, %v4704_v25  ;;  %v9508_v27 = vcombine.low %v4688_v21, %v4704_v25 }
 0xab9   :  { %8109 = vmatpush1.bf16.msra.mxu1 %v9188_v34  ;;  %v4720_v34 = vld [vmem:[#allocation8 + $0xd70] sm:$0xff] }
 0xaba   :  { %8110 = vmatprep.subr.bf16.mxu1 %v9221_v26  ;;  %v4736_v26 = vld [vmem:[#allocation8 + $0xdf0] sm:$0xff] }
 0xabb   :  { %v9541_v12 = vcombine.high %v4720_v34, %v4736_v26 }
 0xabd   :  { %8111 = vmatpush1.bf16.msra.mxu1 %v9220_v28 }
 0xabe   :  { %8112 = vmatprep.subr.bf16.mxu1 %v9253_v29  ;;  %v4752_v29 = vld [vmem:[#allocation8 + $0xe70] sm:$0xff] }
 0xabf   :  { %v9573_v40 = vcombine.high %v4752_v29, %v4768_v31 }
 0xac1   :  { %8113 = vmatpush1.bf16.msra.mxu1 %v9252_v35 }
 0xac2   :  { %8114 = vmatprep.subr.bf16.mxu1 %v9285_v37  ;;  %v9540_v37 = vcombine.low %v4720_v34, %v4736_v26 }
 0xac3   :  { %v7974_v41 = vpop.f32.mrb[44].mxu1 }
 0xac4   :  { %v7975_v48 = vadd.f32 %v7974_v41, %v4893_v36  ;;  %v7976_v49 = vpop.f32.mrb[45].mxu1  ;;  %v4800_v36 = vld [vmem:[#allocation8 + $0xff0] sm:$0xff]  ;;  %v4321_v41 = vld [vmem:[#allocation8 + $0xf8] sm:$0xff] }
 0xac5   :  { %v7977_v50 = vadd.f32 %v7976_v49, %v4897_v20  ;;  %v7978_v16 = vpop.f32.mrb[46].mxu1  ;;  %8115 = vmatpush1.bf16.msra.mxu1 %v9284_v39  ;;  %v9572_v20 = vcombine.low %v4752_v29, %v4768_v31  ;;  %v9605_v39 = vcombine.high %v4784_v42, %v4800_v36  ;;  %v9604_v46 = vcombine.low %v4784_v42, %v4800_v36  ;;  %v4353_v49 = vld [vmem:[#allocation8 + $0x1f8] sm:$0xff] }
 0xac6   :  { %v9628_v51 = vmul.f32 -1.442695, %v7975_v48  ;;  %v7979_v52 = vpop.f32.mrb[47].mxu1  ;;  %8116 = vmatprep.subr.bf16.mxu1 %v9317_v44  ;;  %v4305_v44 = vld [vmem:[#allocation8 + $0x78] sm:$0xff] }
 0xac7   :  { %v9629_v38 = vmul.f32 -1.442695, %v7977_v50  ;;  %v9127_v47 = vcombine.high %v4305_v44, %v4321_v41  ;;  %v4337_v48 = vld [vmem:[#allocation8 + $0x178] sm:$0xff]  ;;  %v9126_v50 = vcombine.low %v4305_v44, %v4321_v41 }
 0xac8   :  { %10654 = vpow2.f32 %v9628_v51  ;;  %v9159_v16 = vcombine.high %v4337_v48, %v4353_v49  ;;  %v4385_v51 = vld [vmem:[#allocation8 + $0x2f8] sm:$0xff]  ;;  %v9158_v52 = vcombine.low %v4337_v48, %v4353_v49 }
 0xac9   :  { %10656 = vpow2.f32 %v9629_v38  ;;  %8117 = vmatpush1.bf16.msra.mxu1 %v9316_v53  ;;  %v4369_v53 = vld [vmem:[#allocation8 + $0x278] sm:$0xff] }
 0xaca   :  { %8118 = vmatprep.subr.bf16.mxu1 %v9349_v55  ;;  %v9191_v55 = vcombine.high %v4369_v53, %v4385_v51  ;;  %v4401_v38 = vld [vmem:[#allocation8 + $0x378] sm:$0xff]  ;;  %v9190_v58 = vcombine.low %v4369_v53, %v4385_v51 }
 0xacb   :  { %v9222_v8 = vcombine.low %v4401_v38, %v4417_v57  ;;  %v4561_v29 = vld [vmem:[#allocation8 + $0x878] sm:$0xff] }
 0xacc   :  { %v4577_v31 = vld [vmem:[#allocation8 + $0x8f8] sm:$0xff] }
 0xacd   :  { %8119 = vmatpush1.bf16.msra.mxu1 %v9348_v59  ;;  %v9223_v59 = vcombine.high %v4401_v38, %v4417_v57  ;;  %v4609_v42 = vld [vmem:[#allocation8 + $0x9f8] sm:$0xff]  ;;  %v9382_v36 = vcombine.low %v4561_v29, %v4577_v31 }
 0xace   :  { %8120 = vmatprep.subr.bf16.mxu1 %v9381_v60  ;;  %v4433_v60 = vld [vmem:[#allocation8 + $0x478] sm:$0xff] }
 0xacf   :  { %v9254_v5 = vcombine.low %v4433_v60, %v4449_v2  ;;  %v4641_v44 = vld [vmem:[#allocation8 + $0xaf8] sm:$0xff] }
 0xad0   :  { %v4705_v38 = vld [vmem:[#allocation8 + $0xcf8] sm:$0xff] }
 0xad1   :  { %8121 = vmatpush1.bf16.msra.mxu1 %v9380_v9  ;;  %v9255_v9 = vcombine.high %v4433_v60, %v4449_v2  ;;  %v4737_v60 = vld [vmem:[#allocation8 + $0xdf8] sm:$0xff] }
 0xad2   :  { %v10655_v54 = vpop.eup %10654  ;;  %8122 = vmatprep.subr.bf16.mxu1 %v9413_v61  ;;  %v4465_v61 = vld [vmem:[#allocation8 + $0x578] sm:$0xff] }
 0xad3   :  { %v10657_v11 = vpop.eup %10656  ;;  %v8302_v13 = vadd.f32 1.0, %v10655_v54  ;;  %v4513_v54 = vld [vmem:[#allocation8 + $0x6f8] sm:$0xff] }
 0xad4   :  { %v8303_v22 = vadd.f32 1.0, %v10657_v11  ;;  %v4905_v11 = vrot.slane %v11274_v24, %v11213_v18 }
 0xad5   :  { %10658 = vrcp.f32 %v8302_v13  ;;  %8123 = vmatpush1.bf16.msra.mxu1 %v9412_v56  ;;  %v4497_v56 = vld [vmem:[#allocation8 + $0x678] sm:$0xff]  ;;  %v9286_v13 = vcombine.low %v4465_v61, %v4481_v4 }
 0xad6   :  { %10660 = vrcp.f32 %v8303_v22  ;;  %8124 = vmatprep.subr.bf16.mxu1 %v9445_v10  ;;  %v4901_v10 = vrot.slane %v11274_v24, %v11210_v15  ;;  %v9319_v14 = vcombine.high %v4497_v56, %v4513_v54  ;;  %v4529_v22 = vld [vmem:[#allocation8 + $0x778] sm:$0xff] }
 0xad9   :  { %8125 = vmatpush1.bf16.msra.mxu1 %v9444_v23  ;;  %v4545_v23 = vld [vmem:[#allocation8 + $0x7f8] sm:$0xff] }
 0xada   :  { %8126 = vmatprep.subr.bf16.mxu1 %v9477_v19  ;;  %v9350_v24 = vcombine.low %v4529_v22, %v4545_v23 }
 0xadd   :  { %8127 = vmatpush1.bf16.msra.mxu1 %v9476_v30 }
 0xade   :  { %8128 = vmatprep.subr.bf16.mxu1 %v9509_v33  ;;  %v9318_v33 = vcombine.low %v4497_v56, %v4513_v54 }
 0xadf   :  { %v11303_v28 = vpop.eup %10658 }
 0xae0   :  { %v11305_v32 = vpop.eup %10660 }
 0xae1   :  { %v8495_v35 = vcombine.low %v11303_v28, %v11305_v32  ;;  %8129 = vmatpush1.bf16.msra.mxu1 %v9508_v27  ;;  %v9351_v27 = vcombine.high %v4529_v22, %v4545_v23 }
 0xae2   :  { %8130 = vmatprep.subr.bf16.mxu1 %v9541_v12 }
 0xae5   :  { %8131 = vmatpush1.bf16.msra.mxu1 %v9540_v37  ;;  %v9383_v37 = vcombine.high %v4561_v29, %v4577_v31 }
 0xae6   :  { %8132 = vmatprep.subr.bf16.mxu1 %v9573_v40  ;;  %v4593_v40 = vld [vmem:[#allocation8 + $0x978] sm:$0xff] }
 0xae7   :  { %v9414_v41 = vcombine.low %v4593_v40, %v4609_v42 }
 0xae9   :  { %8133 = vmatpush1.bf16.msra.mxu1 %v9572_v20  ;;  %v9415_v20 = vcombine.high %v4593_v40, %v4609_v42 }
 0xaea   :  { %8134 = vmatprep.subr.bf16.mxu1 %v9605_v39  ;;  %v4625_v39 = vld [vmem:[#allocation8 + $0xa78] sm:$0xff] }
 0xaeb   :  { %v9446_v51 = vcombine.low %v4625_v39, %v4641_v44 }
 0xaed   :  { %8135 = vmatpush1.bf16.msra.mxu1 %v9604_v46 }
 0xaee   :  { %8145 = vmatprep.subr.bf16.mxu1 %v9127_v47  ;;  %v9447_v47 = vcombine.high %v4625_v39, %v4641_v44 }
 0xaf0   :  { %8137 = vmatmul.mubr.bf16.vlgmr.msra.gmra.mrb[60].mxu1 %v11146_v7 }
 0xaf1   :  { %8146 = vmatpush1.bf16.msra.mxu1 %v9126_v50  ;;  %8177 = vmatprep.mubr.bf16.mxu1 %v11144_v6  ;;  %v9287_v6 = vcombine.high %v4465_v61, %v4481_v4  ;;  %v4657_v50 = vld [vmem:[#allocation8 + $0xb78] sm:$0xff] }
 0xaf2   :  { %8147 = vmatprep.subr.bf16.mxu1 %v9159_v16  ;;  %v4673_v16 = vld [vmem:[#allocation8 + $0xbf8] sm:$0xff] }
 0xaf3   :  { %v9478_v57 = vcombine.low %v4657_v50, %v4673_v16  ;;  %v4753_v61 = vld [vmem:[#allocation8 + $0xe78] sm:$0xff] }
 0xaf4   :  { %v4769_v4 = vld [vmem:[#allocation8 + $0xef8] sm:$0xff] }
 0xaf5   :  { %8148 = vmatpush1.bf16.msra.mxu1 %v9158_v52  ;;  %v9479_v52 = vcombine.high %v4657_v50, %v4673_v16  ;;  %v9575_v54 = vcombine.high %v4753_v61, %v4769_v4  ;;  %v9574_v22 = vcombine.low %v4753_v61, %v4769_v4 }
 0xaf6   :  { %8149 = vmatprep.subr.bf16.mxu1 %v9191_v55  ;;  %v4689_v55 = vld [vmem:[#allocation8 + $0xc78] sm:$0xff] }
 0xaf7   :  { %v9510_v2 = vcombine.low %v4689_v55, %v4705_v38 }
 0xaf9   :  { %8150 = vmatpush1.bf16.msra.mxu1 %v9190_v58  ;;  %v9511_v58 = vcombine.high %v4689_v55, %v4705_v38 }
 0xafa   :  { %8151 = vmatprep.subr.bf16.mxu1 %v9223_v59  ;;  %v4721_v59 = vld [vmem:[#allocation8 + $0xd78] sm:$0xff] }
 0xafb   :  { %v9542_v56 = vcombine.low %v4721_v59, %v4737_v60 }
 0xafd   :  { %8152 = vmatpush1.bf16.msra.mxu1 %v9222_v8  ;;  %v9543_v8 = vcombine.high %v4721_v59, %v4737_v60 }
 0xafe   :  { %8153 = vmatprep.subr.bf16.mxu1 %v9255_v9 }
 0xb01   :  { %8154 = vmatpush1.bf16.msra.mxu1 %v9254_v5 }
 0xb02   :  { %8155 = vmatprep.subr.bf16.mxu1 %v9287_v6 }
 0xb03   :  { %v8015_v17 = vpop.f32.mrb[48].mxu1 }
 0xb04   :  { %v8016_v19 = vadd.f32 %v8015_v17, %v4901_v10  ;;  %v8017_v21 = vpop.f32.mrb[49].mxu1  ;;  %v8503_v10 = vrot.slane %v8495_v35, %v11182_v62 }
 0xb05   :  { %v8018_v25 = vadd.f32 %v8017_v21, %v4905_v11  ;;  %v8019_v30 = vpop.f32.mrb[50].mxu1  ;;  %8156 = vmatpush1.bf16.msra.mxu1 %v9286_v13  ;;  %v4785_v13 = vld [vmem:[#allocation8 + $0xf78] sm:$0xff] }
 0xb06   :  { %v9630_v34 = vmul.f32 -1.442695, %v8016_v19  ;;  %v8020_v26 = vpop.f32.mrb[51].mxu1  ;;  %8157 = vmatprep.subr.bf16.mxu1 %v9319_v14  ;;  %v4801_v14 = vld [vmem:[#allocation8 + $0xff8] sm:$0xff] }
 0xb07   :  { %v9631_v12 = vmul.f32 -1.442695, %v8018_v25  ;;  %v9607_v23 = vcombine.high %v4785_v13, %v4801_v14  ;;  %v9606_v19 = vcombine.low %v4785_v13, %v4801_v14  ;;  %v11321_v21 = vld [vmem:[#allocation10 + $0x18] sm:$0xff] }
 0xb08   :  { %10662 = vpow2.f32 %v9630_v34  ;;  %v4909_v28 = vrot.slane %v11321_v21, %v11132_v63  ;;  %v4913_v32 = vrot.slane %v11321_v21, %v11135_v1  ;;  %v4917_v1 = vrot.slane %v11321_v21, %v11172_v0 }
 0xb09   :  { %10664 = vpow2.f32 %v9631_v12  ;;  %8158 = vmatpush1.bf16.msra.mxu1 %v9318_v33  ;;  %v4921_v42 = vrot.slane %v11321_v21, %v11175_v3  ;;  %v4937_v14 = vrot.slane %v11321_v21, %v11213_v18 }
 0xb0a   :  { %8159 = vmatprep.subr.bf16.mxu1 %v9351_v27 }
 0xb0d   :  { %8160 = vmatpush1.bf16.msra.mxu1 %v9350_v24 }
 0xb0e   :  { %8161 = vmatprep.subr.bf16.mxu1 %v9383_v37 }
 0xb11   :  { %8162 = vmatpush1.bf16.msra.mxu1 %v9382_v36 }
 0xb12   :  { %v10663_v46 = vpop.eup %10662  ;;  %8163 = vmatprep.subr.bf16.mxu1 %v9415_v20 }
 0xb13   :  { %v10665_v48 = vpop.eup %10664  ;;  %v8304_v49 = vadd.f32 1.0, %v10663_v46 }
 0xb14   :  { %v8305_v53 = vadd.f32 1.0, %v10665_v48 }
 0xb15   :  { %10666 = vrcp.f32 %v8304_v49  ;;  %8164 = vmatpush1.bf16.msra.mxu1 %v9414_v41 }
 0xb16   :  { %10668 = vrcp.f32 %v8305_v53  ;;  %8165 = vmatprep.subr.bf16.mxu1 %v9447_v47 }
 0xb19   :  { %8166 = vmatpush1.bf16.msra.mxu1 %v9446_v51 }
 0xb1a   :  { %8167 = vmatprep.subr.bf16.mxu1 %v9479_v52 }
 0xb1d   :  { %8168 = vmatpush1.bf16.msra.mxu1 %v9478_v57  ;;  %v4925_v57 = vrot.slane %v11321_v21, %v11192_v43 }
 0xb1e   :  { %8169 = vmatprep.subr.bf16.mxu1 %v9511_v58  ;;  %v4929_v58 = vrot.slane %v11321_v21, %v11195_v45  ;;  %v4933_v45 = vrot.slane %v11321_v21, %v11210_v15 }
 0xb1f   :  { %v10667_v9 = vpop.eup %10666 }
 0xb20   :  { %v10669_v5 = vpop.eup %10668 }
 0xb21   :  { %v8496_v6 = vcombine.low %v10667_v9, %v10669_v5  ;;  %8170 = vmatpush1.bf16.msra.mxu1 %v9510_v2 }
 0xb22   :  { %8171 = vmatprep.subr.bf16.mxu1 %v9543_v8 }
 0xb23   :  { %v8510_v11 = vrot.slane %v8496_v6, %v11182_v62 }
 0xb25   :  { %v8511_v17 = vcombine.low %v8503_v10, %v8510_v11  ;;  %8172 = vmatpush1.bf16.msra.mxu1 %v9542_v56 }
 0xb26   :  { %8173 = vmatprep.subr.bf16.mxu1 %v9575_v54 }
 0xb27   :  { %8559 = vst [vmem:[#allocation11 + $0x28] sm:$0xff] %v8511_v17 }
 0xb29   :  { %8174 = vmatpush1.bf16.msra.mxu1 %v9574_v22 }
 0xb2a   :  { %8175 = vmatprep.subr.bf16.mxu1 %v9607_v23 }
 0xb2d   :  { %8176 = vmatpush1.bf16.msra.mxu1 %v9606_v19 }
 0xb30   :  { %8178 = vmatmul.mubr.bf16.vlgmr.msra.gmra.mrb[64].mxu1 %v11146_v7 }
 0xb43   :  { %v8056_v35 = vpop.f32.mrb[52].mxu1 }
 0xb44   :  { %v8057_v25 = vadd.f32 %v8056_v35, %v4909_v28  ;;  %v8058_v30 = vpop.f32.mrb[53].mxu1 }
 0xb45   :  { %v8059_v33 = vadd.f32 %v8058_v30, %v4913_v32  ;;  %v8060_v34 = vpop.f32.mrb[54].mxu1 }
 0xb46   :  { %v9632_v26 = vmul.f32 -1.442695, %v8057_v25  ;;  %v8061_v27 = vpop.f32.mrb[55].mxu1 }
 0xb47   :  { %v9633_v12 = vmul.f32 -1.442695, %v8059_v33 }
 0xb48   :  { %10670 = vpow2.f32 %v9632_v26 }
 0xb49   :  { %10672 = vpow2.f32 %v9633_v12 }
 0xb52   :  { %v10671_v29 = vpop.eup %10670 }
 0xb53   :  { %v10673_v7 = vpop.eup %10672  ;;  %v8306_v31 = vadd.f32 1.0, %v10671_v29 }
 0xb54   :  { %v8307_v24 = vadd.f32 1.0, %v10673_v7 }
 0xb55   :  { %10674 = vrcp.f32 %v8306_v31 }
 0xb56   :  { %10676 = vrcp.f32 %v8307_v24 }
 0xb5f   :  { %v10675_v63 = vpop.eup %10674 }
 0xb60   :  { %v10677_v37 = vpop.eup %10676 }
 0xb61   :  { %v8512_v40 = vcombine.low %v10675_v63, %v10677_v37 }
 0xb63   :  { %v8520_v3 = vrot.slane %v8512_v40, %v11182_v62 }
 0xb83   :  { %v8097_v36 = vpop.f32.mrb[56].mxu1 }
 0xb84   :  { %v8098_v20 = vadd.f32 %v8097_v36, %v4917_v1  ;;  %v8099_v39 = vpop.f32.mrb[57].mxu1 }
 0xb85   :  { %v8100_v44 = vadd.f32 %v8099_v39, %v4921_v42  ;;  %v8101_v41 = vpop.f32.mrb[58].mxu1 }
 0xb86   :  { %v9634_v46 = vmul.f32 -1.442695, %v8098_v20  ;;  %v8102_v47 = vpop.f32.mrb[59].mxu1 }
 0xb87   :  { %v9635_v48 = vmul.f32 -1.442695, %v8100_v44 }
 0xb88   :  { %10678 = vpow2.f32 %v9634_v46 }
 0xb89   :  { %10680 = vpow2.f32 %v9635_v48 }
 0xb92   :  { %v10679_v49 = vpop.eup %10678 }
 0xb93   :  { %v10681_v50 = vpop.eup %10680  ;;  %v8308_v16 = vadd.f32 1.0, %v10679_v49 }
 0xb94   :  { %v8309_v53 = vadd.f32 1.0, %v10681_v50 }
 0xb95   :  { %10682 = vrcp.f32 %v8308_v16 }
 0xb96   :  { %10684 = vrcp.f32 %v8309_v53 }
 0xb9f   :  { %v10683_v0 = vpop.eup %10682 }
 0xba0   :  { %v10685_v51 = vpop.eup %10684 }
 0xba1   :  { %v8513_v52 = vcombine.low %v10683_v0, %v10685_v51 }
 0xba3   :  { %v8527_v55 = vrot.slane %v8513_v52, %v11182_v62 }
 0xba5   :  { %v8528_v38 = vcombine.low %v8520_v3, %v8527_v55 }
 0xba7   :  { %8560 = vst [vmem:[#allocation11 + $0x30] sm:$0xff] %v8528_v38 }
 0xbc3   :  { %v8138_v59 = vpop.f32.mrb[60].mxu1 }
 0xbc4   :  { %v8139_v60 = vadd.f32 %v8138_v59, %v4925_v57  ;;  %v8140_v2 = vpop.f32.mrb[61].mxu1 }
 0xbc5   :  { %v8141_v8 = vadd.f32 %v8140_v2, %v4929_v58  ;;  %v8142_v9 = vpop.f32.mrb[62].mxu1 }
 0xbc6   :  { %v9636_v61 = vmul.f32 -1.442695, %v8139_v60  ;;  %v8143_v4 = vpop.f32.mrb[63].mxu1 }
 0xbc7   :  { %v9637_v5 = vmul.f32 -1.442695, %v8141_v8 }
 0xbc8   :  { %10686 = vpow2.f32 %v9636_v61 }
 0xbc9   :  { %10688 = vpow2.f32 %v9637_v5 }
 0xbd2   :  { %v10687_v6 = vpop.eup %10686 }
 0xbd3   :  { %v10689_v56 = vpop.eup %10688  ;;  %v8310_v54 = vadd.f32 1.0, %v10687_v6 }
 0xbd4   :  { %v8311_v10 = vadd.f32 1.0, %v10689_v56 }
 0xbd5   :  { %10690 = vrcp.f32 %v8310_v54 }
 0xbd6   :  { %10692 = vrcp.f32 %v8311_v10 }
 0xbdf   :  { %v10691_v43 = vpop.eup %10690 }
 0xbe0   :  { %v10693_v11 = vpop.eup %10692 }
 0xbe1   :  { %v8529_v13 = vcombine.low %v10691_v43, %v10693_v11 }
 0xbe3   :  { %v8537_v18 = vrot.slane %v8529_v13, %v11182_v62 }
 0xc03   :  { %v8179_v17 = vpop.f32.mrb[64].mxu1 }
 0xc04   :  { %v8180_v22 = vadd.f32 %v8179_v17, %v4933_v45  ;;  %v8181_v23 = vpop.f32.mrb[65].mxu1 }
 0xc05   :  { %v8182_v19 = vadd.f32 %v8181_v23, %v4937_v14  ;;  %v8183_v28 = vpop.f32.mrb[66].mxu1 }
 0xc06   :  { %v9638_v32 = vmul.f32 -1.442695, %v8180_v22  ;;  %v8184_v35 = vpop.f32.mrb[67].mxu1 }
 0xc07   :  { %v9639_v25 = vmul.f32 -1.442695, %v8182_v19 }
 0xc08   :  { %10694 = vpow2.f32 %v9638_v32 }
 0xc09   :  { %10696 = vpow2.f32 %v9639_v25 }
 0xc12   :  { %v10695_v30 = vpop.eup %10694 }
 0xc13   :  { %v10697_v33 = vpop.eup %10696  ;;  %v8312_v34 = vadd.f32 1.0, %v10695_v30 }
 0xc14   :  { %v8313_v26 = vadd.f32 1.0, %v10697_v33 }
 0xc15   :  { %10698 = vrcp.f32 %v8312_v34 }
 0xc16   :  { %10700 = vrcp.f32 %v8313_v26 }
 0xc1f   :  { %v10699_v15 = vpop.eup %10698 }
 0xc20   :  { %v10701_v27 = vpop.eup %10700 }
 0xc21   :  { %v8530_v12 = vcombine.low %v10699_v15, %v10701_v27 }
 0xc23   :  { %v8544_v21 = vrot.slane %v8530_v12, %v11182_v62 }
 0xc25   :  { %v8545_v29 = vcombine.low %v8537_v18, %v8544_v21 }
 0xc27   :  { %8561 = vst [vmem:[#allocation11 + $0x38] sm:$0xff] %v8545_v29 }
 0xc28   :  { %10823 = shalt.err (!%p10820_p2)
}
 0xc29   :  { %s10824_s18 = scalar_lea.hbm %s11361_s6, 1024 }
 0xc2a   :  { %p10825_p3 = scmp.ne.s32.totalorder %s11361_s6, %s10824_s18  ;;  %p10828_p4 = scmp.lt.u32.totalorder %s10824_s18, %s11361_s6 }
 0xc2c   :  { %p10830_p5 = pnand %p10828_p4, %p10825_p3 }
 0xc2e   :  { %10833 = shalt.err (!%p10830_p5)
}
 0xc2f   :  { %8571 = dma.vmem_to_hbm [thread:$0]  %s8569_s24, 1024, %s11361_s6, [#allocation4]  }
 0xc30   :  { %10840 = dma.done.wait [#allocation4], 1024  }
 0xc31   :  { %10841 = vsyncadd [#allocation4], 4294966272 }
 0xc32   :  { %8579 = vsyncpa [#allocation3], 1 }
 0xc33   :  { %8580 = vsyncpa [#allocation6], 1 }
 0xc34   :  { %8581 = vsyncpa [#allocation9], 1 }
 0xc35   :  { %8582 = vsyncpa [#allocation4], 1 }

</bundles_post_ra>
